<compile_context>
chip_gen: v7x
topology: tpu7x:2x2x1
jax: 0.10.0
libtpu: 0.0.40
codegen_flags: <defaults>
</compile_context>

<pallas_src>
import functools

import jax
import jax.numpy as jnp
from jax.experimental import pallas as pl
from jax.experimental.pallas import tpu as pltpu


# ----------------------------------------------------------------------------
# Kernel 1: generic 3x3 conv (pad done outside) + folded BN + ReLU + fused pool
# ----------------------------------------------------------------------------
def _conv3x3_bn_relu_pool_kernel(xp_ref, w_ref, s_ref, b_ref, o_ref, *, B, H, W, pool):
    cin = xp_ref.shape[-1]
    tco = o_ref.shape[-1]

    # shift-and-matmul over the 9 taps, accumulate locally in f32 (bf16 MXU inputs)
    acc = None
    for kh in range(3):
        for kw in range(3):
            tap = xp_ref[:, pl.ds(kh, H), pl.ds(kw, W), :]          # (B, H, W, cin) bf16
            part = jnp.dot(tap.reshape(B * H * W, cin), w_ref[kh * 3 + kw],
                           preferred_element_type=jnp.float32)      # (B*H*W, tco) f32
            acc = part if acc is None else acc + part

    # folded BN + ReLU epilogue in f32
    y = jnp.maximum(acc * s_ref[...] + b_ref[...], 0.0)             # (B*H*W, tco)

    if pool:  # fused 2x2 average pool (rows are ordered (b, h, w))
        y = y.reshape(B, H // 2, 2, W, tco)
        y = y[:, :, 0] + y[:, :, 1]                                  # pool over H
        y = y.reshape(B, H // 2, W // 2, 2, tco)
        y = (y[:, :, :, 0, :] + y[:, :, :, 1, :]) * 0.25             # pool over W
        y = y.reshape(B * (H // 2) * (W // 2), tco)

    o_ref[...] = y.astype(o_ref.dtype)


def conv3x3_bn_relu_pool(x, w, scale, bias, *, pool):
    """x: (B,H,W,Cin) bf16, w: (9,Cin,Cout) bf16, scale/bias: (Cout,) f32.

    Returns (B, Ho, Wo, Cout) bf16 with Ho,Wo = H//2,W//2 if pool else H,W.
    """
    B, H, W, Cin = x.shape
    Cout = w.shape[-1]
    if pool:
        assert H % 2 == 0 and W % 2 == 0, (H, W)
    Ho, Wo = (H // 2, W // 2) if pool else (H, W)

    xp = jnp.pad(x, ((0, 0), (1, 1), (1, 1), (0, 0)))
    tco = Cout if Cout <= 256 else 256
    assert Cout % tco == 0

    out2d = pl.pallas_call(
        functools.partial(_conv3x3_bn_relu_pool_kernel, B=B, H=H, W=W, pool=pool),
        out_shape=jax.ShapeDtypeStruct((B * Ho * Wo, Cout), jnp.bfloat16),
        grid=(Cout // tco,),
        in_specs=[
            # full padded activation, constant index map -> DMA'd once, stays resident
            pl.BlockSpec((B, H + 2, W + 2, Cin), lambda co: (0, 0, 0, 0)),
            pl.BlockSpec((9, Cin, tco), lambda co: (0, 0, co)),
            pl.BlockSpec((1, tco), lambda co: (0, co)),
            pl.BlockSpec((1, tco), lambda co: (0, co)),
        ],
        out_specs=pl.BlockSpec((B * Ho * Wo, tco), lambda co: (0, co)),
        compiler_params=pltpu.CompilerParams(
            dimension_semantics=("parallel",),          # Cout tiles independent (v7x 2 TCs)
            vmem_limit_bytes=48 * 1024 * 1024),
    )(xp, w, scale.reshape(1, Cout), bias.reshape(1, Cout))
    return out2d.reshape(B, Ho, Wo, Cout)


# ----------------------------------------------------------------------------
# Kernel 2: first conv (Cin=1) via im2col -> K=9 matmul + folded BN + ReLU
# ----------------------------------------------------------------------------
def _conv1_im2col_kernel(p_ref, w_ref, s_ref, b_ref, o_ref):
    acc = jnp.dot(p_ref[...], w_ref[...], preferred_element_type=jnp.float32)
    y = jnp.maximum(acc * s_ref[...] + b_ref[...], 0.0)
    o_ref[...] = y.astype(o_ref.dtype)


def conv_first_bn_relu(x2d, w9, scale, bias):
    """x2d: (B,H,W) f32 single-channel mel, w9: (9,Cout) bf16 -> (B,H,W,Cout) bf16."""
    B, H, W = x2d.shape
    Cout = w9.shape[-1]
    xp = jnp.pad(x2d, ((0, 0), (1, 1), (1, 1)))
    patches = jnp.stack(
        [xp[:, kh:kh + H, kw:kw + W] for kh in range(3) for kw in range(3)],
        axis=-1).reshape(B * H * W, 9).astype(jnp.bfloat16)
    M = B * H * W

    out = pl.pallas_call(
        _conv1_im2col_kernel,
        out_shape=jax.ShapeDtypeStruct((M, Cout), jnp.bfloat16),
        grid=(1,),
        in_specs=[
            pl.BlockSpec((M, 9), lambda i: (0, 0)),
            pl.BlockSpec((9, Cout), lambda i: (0, 0)),
            pl.BlockSpec((1, Cout), lambda i: (0, 0)),
            pl.BlockSpec((1, Cout), lambda i: (0, 0)),
        ],
        out_specs=pl.BlockSpec((M, Cout), lambda i: (0, 0)),
        compiler_params=pltpu.CompilerParams(vmem_limit_bytes=48 * 1024 * 1024),
    )(patches, w9, scale.reshape(1, Cout), bias.reshape(1, Cout))
    return out.reshape(B, H, W, Cout)


# ----------------------------------------------------------------------------
# Kernel 3: mean over frequency + 1x1 conv (skip heads), T-tiled grid
# ----------------------------------------------------------------------------
def _fmean_conv1x1_kernel(x_ref, w_ref, b_ref, o_ref):
    x = x_ref[...].astype(jnp.float32)               # (B, tt, F, C)
    m = jnp.mean(x, axis=2)                          # (B, tt, C)
    B, tt, C = m.shape
    y = jnp.dot(m.reshape(B * tt, C).astype(jnp.bfloat16), w_ref[...],
                preferred_element_type=jnp.float32) + b_ref[...]
    o_ref[...] = y.reshape(B, tt, -1)


def fmean_conv1x1(x, w, b):
    """x: (B,T,F,C) bf16, w: (C,Cout) bf16, b: (Cout,) f32 -> (B, T, Cout) f32."""
    B, T, F, C = x.shape
    Cout = w.shape[-1]
    tt = 256 if (T > 256 and T % 256 == 0) else T
    return pl.pallas_call(
        _fmean_conv1x1_kernel,
        out_shape=jax.ShapeDtypeStruct((B, T, Cout), jnp.float32),
        grid=(T // tt,),
        in_specs=[
            pl.BlockSpec((B, tt, F, C), lambda t: (0, t, 0, 0)),
            pl.BlockSpec((C, Cout), lambda t: (0, 0)),
            pl.BlockSpec((1, Cout), lambda t: (0, 0)),
        ],
        out_specs=pl.BlockSpec((B, tt, Cout), lambda t: (0, t, 0)),
        compiler_params=pltpu.CompilerParams(dimension_semantics=("parallel",)),
    )(x, w, b.reshape(1, Cout))


# ----------------------------------------------------------------------------
# Kernel 4: mean over frequency + proj 1x1 conv + label Linear + broadcast add
# ----------------------------------------------------------------------------
def _proj_label_kernel(x_ref, w_ref, b_ref, le_ref, wl_ref, bl_ref, o_ref):
    x = x_ref[...].astype(jnp.float32)               # (B, tt, Fp, C)
    m = jnp.mean(x, axis=2)                          # (B, tt, C)
    B, tt, C = m.shape
    z = jnp.dot(m.reshape(B * tt, C).astype(jnp.bfloat16), w_ref[...],
                preferred_element_type=jnp.float32) + b_ref[...]       # (B*tt, D)
    lm = jnp.dot(le_ref[...], wl_ref[...],
                 preferred_element_type=jnp.float32) + bl_ref[...]     # (B, D)
    o_ref[...] = z.reshape(B, tt, -1) + lm[:, None, :]


def proj_with_label(feat4d, w_proj, b_proj, label_emb, w_lab, b_lab):
    """feat4d: (B,Tp,Fp,2048) bf16 -> z_e channel-last (B, Tp, D) f32."""
    B, Tp, Fp, C = feat4d.shape
    D = w_proj.shape[-1]
    L = label_emb.shape[-1]
    tt = 256 if (Tp > 256 and Tp % 256 == 0) else Tp
    return pl.pallas_call(
        _proj_label_kernel,
        out_shape=jax.ShapeDtypeStruct((B, Tp, D), jnp.float32),
        grid=(Tp // tt,),
        in_specs=[
            pl.BlockSpec((B, tt, Fp, C), lambda t: (0, t, 0, 0)),
            pl.BlockSpec((C, D), lambda t: (0, 0)),
            pl.BlockSpec((1, D), lambda t: (0, 0)),
            pl.BlockSpec((B, L), lambda t: (0, 0)),
            pl.BlockSpec((L, D), lambda t: (0, 0)),
            pl.BlockSpec((1, D), lambda t: (0, 0)),
        ],
        out_specs=pl.BlockSpec((B, tt, D), lambda t: (0, t, 0)),
        compiler_params=pltpu.CompilerParams(dimension_semantics=("parallel",)),
    )(feat4d, w_proj, b_proj.reshape(1, D), label_emb, w_lab, b_lab.reshape(1, D))


# ----------------------------------------------------------------------------
# Deterministic synthetic parameters (shapes follow Cnn14 + PANNSEncoder heads).
# ----------------------------------------------------------------------------
CONV_CHANNELS = [  # (Cin, Cout) for the 12 3x3 convs of conv_block1..conv_block6
    (1, 64), (64, 64),
    (64, 128), (128, 128),
    (128, 256), (256, 256),
    (256, 512), (512, 512),
    (512, 1024), (1024, 1024),
    (1024, 2048), (2048, 2048),
]
SKIP_CHANNELS = [64, 128, 256, 512, 1024]


def init_params(key, latent_dim, label_embed_dim):
    keys = list(jax.random.split(key, 128))
    ki = iter(keys)
    eps = 1e-5
    params = {"convs": [], "skips": []}
    for idx, (cin, cout) in enumerate(CONV_CHANNELS):
        w = jax.random.normal(next(ki), (9, cin, cout), jnp.float32) * (2.0 / (9 * cin)) ** 0.5
        gamma = 1.0 + 0.1 * jax.random.normal(next(ki), (cout,), jnp.float32)
        beta = 0.1 * jax.random.normal(next(ki), (cout,), jnp.float32)
        rmean = 0.1 * jax.random.normal(next(ki), (cout,), jnp.float32)
        rvar = 0.5 + jax.random.uniform(next(ki), (cout,), jnp.float32)
        scale = gamma / jnp.sqrt(rvar + eps)               # folded BN (inference)
        bias = beta - rmean * scale
        if idx == 0:
            wk = w.reshape(9, cout).astype(jnp.bfloat16)   # Cin == 1 -> (9, Cout)
        else:
            wk = w.astype(jnp.bfloat16)                    # (9, Cin, Cout)
        params["convs"].append((wk, scale, bias))
    for c in SKIP_CHANNELS:
        w = jax.random.normal(next(ki), (c, c), jnp.float32) * (1.0 / c) ** 0.5
        b = 0.01 * jax.random.normal(next(ki), (c,), jnp.float32)
        params["skips"].append((w.astype(jnp.bfloat16), b))
    params["proj_w"] = (jax.random.normal(next(ki), (2048, latent_dim), jnp.float32)
                        * (1.0 / 2048) ** 0.5).astype(jnp.bfloat16)
    params["proj_b"] = 0.01 * jax.random.normal(next(ki), (latent_dim,), jnp.float32)
    params["lab_w"] = jax.random.normal(next(ki), (label_embed_dim, latent_dim),
                                        jnp.float32) * (1.0 / label_embed_dim) ** 0.5
    params["lab_b"] = 0.01 * jax.random.normal(next(ki), (latent_dim,), jnp.float32)
    return params


# ----------------------------------------------------------------------------
# Forward pass (matches PANNSEncoder.forward semantics)
# ----------------------------------------------------------------------------
def panns_encoder_forward(params, x, label_emb, return_skips=False):
    """x: (B, T, F) f32, label_emb: (B, label_embed_dim) f32 -> z_e: (B, latent, T//32)."""
    convs = params["convs"]

    # conv_block1 (pool 2x2 after the second conv of each block)
    h = conv_first_bn_relu(x, *convs[0])                              # (B, T, F, 64)
    x1 = conv3x3_bn_relu_pool(h, *convs[1], pool=True)
    # conv_block2
    h = conv3x3_bn_relu_pool(x1, *convs[2], pool=False)
    x2 = conv3x3_bn_relu_pool(h, *convs[3], pool=True)
    # conv_block3
    h = conv3x3_bn_relu_pool(x2, *convs[4], pool=False)
    x3 = conv3x3_bn_relu_pool(h, *convs[5], pool=True)
    # conv_block4
    h = conv3x3_bn_relu_pool(x3, *convs[6], pool=False)
    x4 = conv3x3_bn_relu_pool(h, *convs[7], pool=True)
    # conv_block5
    h = conv3x3_bn_relu_pool(x4, *convs[8], pool=False)
    x5 = conv3x3_bn_relu_pool(h, *convs[9], pool=True)
    # conv_block6 (pool_size=(1,1) == identity)
    h = conv3x3_bn_relu_pool(x5, *convs[10], pool=False)
    feat_4d = conv3x3_bn_relu_pool(h, *convs[11], pool=False)

    # skip heads: mean over frequency + 1x1 conv (computed as in the reference forward)
    skips = [fmean_conv1x1(xi, ws, bs)
             for xi, (ws, bs) in zip((x1, x2, x3, x4, x5), params["skips"])]

    # z_e = proj(mean_f(feat_4d)) + label_proj(label_emb) broadcast over time
    z_e_chlast = proj_with_label(feat_4d, params["proj_w"], params["proj_b"],
                                 label_emb, params["lab_w"], params["lab_b"])
    z_e = jnp.transpose(z_e_chlast, (0, 2, 1))                        # (B, latent, Tp)

    if return_skips:
        skip1, skip2, skip3, skip4, skip5 = skips
        # matches the reference: [skip4, skip3, skip2, skip1, skip1]
        skips_for_decoder = [jnp.transpose(s, (0, 2, 1))
                             for s in (skip4, skip3, skip2, skip1, skip1)]
        return z_e, skips_for_decoder
    return z_e


if __name__ == "__main__":
    B, T, F = 2, 32, 32
    latent_dim, label_embed_dim = 32, 16

    key = jax.random.PRNGKey(0)
    k_par, k_x, k_l = jax.random.split(key, 3)
    params = init_params(k_par, latent_dim, label_embed_dim)
    x = jax.random.normal(k_x, (B, T, F), jnp.float32)
    label_emb = jax.random.normal(k_l, (B, label_embed_dim), jnp.float32)

    z_e = panns_encoder_forward(params, x, label_emb, return_skips=False)
    z_e = jax.block_until_ready(z_e)

    assert z_e.shape == (B, latent_dim, T // 32), z_e.shape
    assert bool(jnp.all(jnp.isfinite(z_e)))
    print("KERNEL_OK")
</pallas_src>

<mosaic_0001>
module attributes {stable_mosaic.version = 11 : i64} {
  func.func @_conv1_im2col_kernel(%arg0: i32, %arg1: memref<2048x9xbf16, #tpu.memory_space<vmem>>, %arg2: memref<9x64xbf16, #tpu.memory_space<vmem>>, %arg3: memref<1x64xf32, #tpu.memory_space<vmem>>, %arg4: memref<1x64xf32, #tpu.memory_space<vmem>>, %arg5: memref<2048x64xbf16, #tpu.memory_space<vmem>>) attributes {dimension_semantics = [#tpu.dimension_semantics<arbitrary>], iteration_bounds = array<i64: 1>, scalar_prefetch = 0 : i64, scratch_operands = 0 : i64, tpu.core_type = #tpu.core_type<tc>, window_params = [{pipeline_mode = #tpu.pipeline_mode<synchronous>, transform_indices = @transform_0, window_bounds = array<i64: 2048, 9>}, {pipeline_mode = #tpu.pipeline_mode<synchronous>, transform_indices = @transform_1, window_bounds = array<i64: 9, 64>}, {pipeline_mode = #tpu.pipeline_mode<synchronous>, transform_indices = @transform_2, window_bounds = array<i64: 1, 64>}, {pipeline_mode = #tpu.pipeline_mode<synchronous>, transform_indices = @transform_3, window_bounds = array<i64: 1, 64>}, {pipeline_mode = #tpu.pipeline_mode<synchronous>, transform_indices = @transform_4, window_bounds = array<i64: 2048, 64>}]} {
    %c0 = arith.constant 0 : index
    %c0_0 = arith.constant 0 : index
    %0 = vector.load %arg1[%c0, %c0_0] : memref<2048x9xbf16, #tpu.memory_space<vmem>>, vector<2048x9xbf16>
    %c0_1 = arith.constant 0 : index
    %c0_2 = arith.constant 0 : index
    %1 = vector.load %arg2[%c0_1, %c0_2] : memref<9x64xbf16, #tpu.memory_space<vmem>>, vector<9x64xbf16>
    %cst = arith.constant dense<0.000000e+00> : vector<2048x64xf32>
    %2 = tpu.matmul %0, %1, %cst {dimension_numbers = #tpu.dot_dimension_numbers<[1], [0], [0], [1], [0, 0, 1, 1], [], []>} : vector<2048x9xbf16>, vector<9x64xbf16>, vector<2048x64xf32> -> vector<2048x64xf32>
    %c0_3 = arith.constant 0 : index
    %c0_4 = arith.constant 0 : index
    %3 = vector.load %arg3[%c0_3, %c0_4] : memref<1x64xf32, #tpu.memory_space<vmem>>, vector<1x64xf32>
    %4 = vector.broadcast %3 : vector<1x64xf32> to vector<2048x64xf32>
    %5 = arith.mulf %2, %4 : vector<2048x64xf32>
    %c0_5 = arith.constant 0 : index
    %c0_6 = arith.constant 0 : index
    %6 = vector.load %arg4[%c0_5, %c0_6] : memref<1x64xf32, #tpu.memory_space<vmem>>, vector<1x64xf32>
    %7 = vector.broadcast %6 : vector<1x64xf32> to vector<2048x64xf32>
    %8 = arith.addf %5, %7 : vector<2048x64xf32>
    %cst_7 = arith.constant 0.000000e+00 : f32
    %9 = vector.broadcast %cst_7 : f32 to vector<2048x64xf32>
    %10 = arith.maximumf %8, %9 : vector<2048x64xf32>
    %11 = arith.truncf %10 : vector<2048x64xf32> to vector<2048x64xbf16>
    %c0_8 = arith.constant 0 : index
    %c0_9 = arith.constant 0 : index
    %12 = vector.load %arg5[%c0_8, %c0_9] : memref<2048x64xbf16, #tpu.memory_space<vmem>>, vector<2048x64xbf16>
    tpu.vector_store %arg5[%c0_8, %c0_9], %11 {strides = array<i32>} : memref<2048x64xbf16, #tpu.memory_space<vmem>>, vector<2048x64xbf16>,
    return
  }
  func.func @transform_0(%arg0: i32) -> (i32, i32) {
    %c0_i32 = arith.constant 0 : i32
    %c0_i32_0 = arith.constant 0 : i32
    %c0_i32_1 = arith.constant 0 : i32
    return %c0_i32, %c0_i32_0 : i32, i32
  }
  func.func @transform_1(%arg0: i32) -> (i32, i32) {
    %c0_i32 = arith.constant 0 : i32
    %c0_i32_0 = arith.constant 0 : i32
    %c0_i32_1 = arith.constant 0 : i32
    return %c0_i32, %c0_i32_0 : i32, i32
  }
  func.func @transform_2(%arg0: i32) -> (i32, i32) {
    %c0_i32 = arith.constant 0 : i32
    %c0_i32_0 = arith.constant 0 : i32
    %c0_i32_1 = arith.constant 0 : i32
    return %c0_i32, %c0_i32_0 : i32, i32
  }
  func.func @transform_3(%arg0: i32) -> (i32, i32) {
    %c0_i32 = arith.constant 0 : i32
    %c0_i32_0 = arith.constant 0 : i32
    %c0_i32_1 = arith.constant 0 : i32
    return %c0_i32, %c0_i32_0 : i32, i32
  }
  func.func @transform_4(%arg0: i32) -> (i32, i32) {
    %c0_i32 = arith.constant 0 : i32
    %c0_i32_0 = arith.constant 0 : i32
    %c0_i32_1 = arith.constant 0 : i32
    return %c0_i32, %c0_i32_0 : i32, i32
  }
}

</mosaic_0001>

<bundles_post_ra>
// kernel: tpu_custom_call.1
= control target key start
LH: loop header
LB: loop body
LE: loop exit
PB: predicated region body
PF: predicated region fallthrough
CT: control target
= control target key end

     0   :  { %vm1306_vm0 = vcmask 1043456   ;;  %vm1307_vm1 = vcmask 1044480   ;;  %vm921_vm2 = vcmask 72704   ;;  %v5731_v1 = vmov 65535   ;;  %s7838_s1 = inlined_call_operand.vmem [shape: bf16[9,64], index: 1, kind: input, shape index: {}]   ;;  %s7839_s0 = inlined_call_operand.vmem [shape: bf16[2048,9], index: 0, kind: input, shape index: {}]   ;;  %s7840_s2 = inlined_call_operand.vmem [shape: f32[1,64], index: 2, kind: input, shape index: {}]   ;;  %s7841_s3 = inlined_call_operand.vmem [shape: f32[1,64], index: 3, kind: input, shape index: {}]   ;;  %s7842_s4 = inlined_call_operand.vmem [shape: bf16[2048,64], index: 4, kind: output, shape index: {}]  }
   0x1   :  { %v5598_v0 = vld [vmem:[%s7838_s1] sm:$0x1f]   ;;  %v1308_v2 = vsel %vm1306_vm0, 4294967295, %v5731_v1  ;;  %v5601_v7 = vld [vmem:[%s7839_s0 + $0x8] sm:$0xff]   ;;  %v5603_v9 = vld [vmem:[%s7839_s0 + $0x10] sm:$0xff]   ;;  %vm4176_vm3 = vcmask 519168  }
   0x2   :  { %v5599_v3 = vld [vmem:[%s7839_s0] sm:$0xff]   ;;  %v1309_v4 = vsel %vm1307_vm1, %v1308_v2, 0  ;;  %v5602_v8 = vld [vmem:[%s7839_s0 + $0x208] sm:$0xff]   ;;  %v5604_v10 = vld [vmem:[%s7839_s0 + $0x210] sm:$0xff]  }
   0x3   :  { %v5600_v5 = vld [vmem:[%s7839_s0 + $0x200] sm:$0xff]   ;;  %v1311_v6 = vand.u32 %v5598_v0, %v1309_v4  ;;  %5339 = vmatprep.mubr.msk.bf16.mxu0 %vm921_vm2, %v5599_v3  ;;  %v5605_v11 = vld [vmem:[%s7839_s0 + $0x18] sm:$0xff]   ;;  %v5609_v15 = vld [vmem:[%s7839_s0 + $0x28] sm:$0xff]  }
   0x4   :  { %5467 = vmatprep.mubr.msk.bf16.mxu1 %vm921_vm2, %v5600_v5  ;;  %v5606_v12 = vld [vmem:[%s7839_s0 + $0x218] sm:$0xff]   ;;  %v5607_v13 = vld [vmem:[%s7839_s0 + $0x20] sm:$0xff]   ;;  %v5610_v16 = vld [vmem:[%s7839_s0 + $0x228] sm:$0xff]  }
   0x5   :  { %5337 = vmatprep.subr.bf16.mxu0 %v1311_v6  ;;  %5595 = vmatprep.subr.bf16.mxu1 %v1311_v6  ;;  %v5608_v14 = vld [vmem:[%s7839_s0 + $0x220] sm:$0xff]   ;;  %v5611_v17 = vld [vmem:[%s7839_s0 + $0x30] sm:$0xff]   ;;  %v5613_v19 = vld [vmem:[%s7839_s0 + $0x38] sm:$0xff]  }
   0x6   :  { %5338 = vmatpush3.bf16.msra.mxu0 %v1311_v6  ;;  %5596 = vmatpush3.bf16.msra.mxu1 %v1311_v6  ;;  %v5612_v18 = vld [vmem:[%s7839_s0 + $0x230] sm:$0xff]   ;;  %v5614_v20 = vld [vmem:[%s7839_s0 + $0x238] sm:$0xff]   ;;  %v5615_v21 = vld [vmem:[%s7839_s0 + $0x40] sm:$0xff]  }
   0x7   :  { %v5616_v22 = vld [vmem:[%s7839_s0 + $0x240] sm:$0xff]   ;;  %v5617_v23 = vld [vmem:[%s7839_s0 + $0x48] sm:$0xff]   ;;  %v5619_v25 = vld [vmem:[%s7839_s0 + $0x50] sm:$0xff]  }
   0x8   :  { %v5618_v24 = vld [vmem:[%s7839_s0 + $0x248] sm:$0xff]   ;;  %v5620_v26 = vld [vmem:[%s7839_s0 + $0x250] sm:$0xff]   ;;  %v5621_v27 = vld [vmem:[%s7839_s0 + $0x58] sm:$0xff]  }
   0x9   :  { %5340 = vmatmul.mubr.msk.bf16.vlgmr.msra.gmra.mrb[0].mxu0 %vm921_vm2, %v5601_v7  ;;  %5468 = vmatmul.mubr.msk.bf16.vlgmr.msra.gmra.mrb[0].mxu1 %vm921_vm2, %v5602_v8  ;;  %v5622_v28 = vld [vmem:[%s7839_s0 + $0x258] sm:$0xff]   ;;  %v5623_v29 = vld [vmem:[%s7839_s0 + $0x60] sm:$0xff]   ;;  %v5625_v31 = vld [vmem:[%s7839_s0 + $0x68] sm:$0xff]  }
   0xa   :  { %5343 = vmatprep.mubr.msk.bf16.mxu0 %vm921_vm2, %v5603_v9  ;;  %5471 = vmatprep.mubr.msk.bf16.mxu1 %vm921_vm2, %v5604_v10  ;;  %v5624_v30 = vld [vmem:[%s7839_s0 + $0x260] sm:$0xff]   ;;  %v5626_v32 = vld [vmem:[%s7839_s0 + $0x268] sm:$0xff]   ;;  %v5627_v33 = vld [vmem:[%s7839_s0 + $0x70] sm:$0xff]  }
   0xb   :  { %v5628_v34 = vld [vmem:[%s7839_s0 + $0x270] sm:$0xff]   ;;  %v5629_v35 = vld [vmem:[%s7839_s0 + $0x78] sm:$0xff]   ;;  %v5631_v37 = vld [vmem:[%s7839_s0 + $0x80] sm:$0xff]  }
   0xc   :  { %v5630_v36 = vld [vmem:[%s7839_s0 + $0x278] sm:$0xff]   ;;  %v5632_v38 = vld [vmem:[%s7839_s0 + $0x280] sm:$0xff]   ;;  %v5633_v39 = vld [vmem:[%s7839_s0 + $0x88] sm:$0xff]  }
   0xd   :  { %v5634_v40 = vld [vmem:[%s7839_s0 + $0x288] sm:$0xff]   ;;  %v5635_v41 = vld [vmem:[%s7839_s0 + $0x90] sm:$0xff]   ;;  %v5637_v43 = vld [vmem:[%s7839_s0 + $0x98] sm:$0xff]  }
   0xe   :  { %v5636_v42 = vld [vmem:[%s7839_s0 + $0x290] sm:$0xff]   ;;  %v5638_v44 = vld [vmem:[%s7839_s0 + $0x298] sm:$0xff]   ;;  %v5639_v45 = vld [vmem:[%s7839_s0 + $0xa0] sm:$0xff]  }
   0xf   :  { %v5640_v46 = vld [vmem:[%s7839_s0 + $0x2a0] sm:$0xff]   ;;  %v5641_v47 = vld [vmem:[%s7839_s0 + $0xa8] sm:$0xff]   ;;  %v5643_v49 = vld [vmem:[%s7839_s0 + $0xb0] sm:$0xff]  }
  0x10   :  { %v5642_v48 = vld [vmem:[%s7839_s0 + $0x2a8] sm:$0xff]   ;;  %v5644_v50 = vld [vmem:[%s7839_s0 + $0x2b0] sm:$0xff]   ;;  %v5645_v51 = vld [vmem:[%s7839_s0 + $0xb8] sm:$0xff]  }
  0x11   :  { %5344 = vmatmul.mubr.msk.bf16.gmra.mrb[4].mxu0 %vm921_vm2, %v5605_v11  ;;  %5472 = vmatmul.mubr.msk.bf16.gmra.mrb[4].mxu1 %vm921_vm2, %v5606_v12  ;;  %v5646_v52 = vld [vmem:[%s7839_s0 + $0x2b8] sm:$0xff]   ;;  %v5647_v53 = vld [vmem:[%s7839_s0 + $0xc0] sm:$0xff]   ;;  %v5649_v55 = vld [vmem:[%s7839_s0 + $0xc8] sm:$0xff]  }
  0x12   :  { %5347 = vmatprep.mubr.msk.bf16.mxu0 %vm921_vm2, %v5607_v13  ;;  %5475 = vmatprep.mubr.msk.bf16.mxu1 %vm921_vm2, %v5608_v14  ;;  %v5648_v54 = vld [vmem:[%s7839_s0 + $0x2c0] sm:$0xff]   ;;  %v5650_v56 = vld [vmem:[%s7839_s0 + $0x2c8] sm:$0xff]   ;;  %v5651_v57 = vld [vmem:[%s7839_s0 + $0xd0] sm:$0xff]  }
  0x13   :  { %v5652_v58 = vld [vmem:[%s7839_s0 + $0x2d0] sm:$0xff]   ;;  %v5653_v59 = vld [vmem:[%s7839_s0 + $0xd8] sm:$0xff]   ;;  %v5655_v61 = vld [vmem:[%s7839_s0 + $0xe0] sm:$0xff]  }
  0x14   :  { %v5654_v60 = vld [vmem:[%s7839_s0 + $0x2d8] sm:$0xff]   ;;  %v5656_v62 = vld [vmem:[%s7839_s0 + $0x2e0] sm:$0xff]   ;;  %v5657_v63 = vld [vmem:[%s7839_s0 + $0xe8] sm:$0xff]  }
  0x15   :  { %v5658_v0 = vld [vmem:[%s7839_s0 + $0x2e8] sm:$0xff]   ;;  %v5659_v1 = vld [vmem:[%s7839_s0 + $0xf0] sm:$0xff]   ;;  %v5661_v3 = vld [vmem:[%s7839_s0 + $0xf8] sm:$0xff]  }
  0x16   :  { %v5660_v2 = vld [vmem:[%s7839_s0 + $0x2f0] sm:$0xff]   ;;  %v5662_v4 = vld [vmem:[%s7839_s0 + $0x2f8] sm:$0xff]   ;;  %v5663_v5 = vld [vmem:[%s7839_s0 + $0x100] sm:$0xff]  }
  0x17   :  { %v5664_v6 = vld [vmem:[%s7839_s0 + $0x300] sm:$0xff]   ;;  %v5665_v7 = vld [vmem:[%s7839_s0 + $0x108] sm:$0xff]   ;;  %v5667_v9 = vld [vmem:[%s7839_s0 + $0x110] sm:$0xff]  }
  0x18   :  { %v5666_v8 = vld [vmem:[%s7839_s0 + $0x308] sm:$0xff]   ;;  %v5668_v10 = vld [vmem:[%s7839_s0 + $0x310] sm:$0xff]   ;;  %v5669_v11 = vld [vmem:[%s7839_s0 + $0x118] sm:$0xff]  }
  0x19   :  { %5348 = vmatmul.mubr.msk.bf16.gmra.mrb[8].mxu0 %vm921_vm2, %v5609_v15  ;;  %5476 = vmatmul.mubr.msk.bf16.gmra.mrb[8].mxu1 %vm921_vm2, %v5610_v16  ;;  %v5670_v12 = vld [vmem:[%s7839_s0 + $0x318] sm:$0xff]   ;;  %v5671_v13 = vld [vmem:[%s7839_s0 + $0x120] sm:$0xff]   ;;  %v5673_v15 = vld [vmem:[%s7839_s0 + $0x128] sm:$0xff]  }
  0x1a   :  { %5351 = vmatprep.mubr.msk.bf16.mxu0 %vm921_vm2, %v5611_v17  ;;  %5479 = vmatprep.mubr.msk.bf16.mxu1 %vm921_vm2, %v5612_v18  ;;  %v5672_v14 = vld [vmem:[%s7839_s0 + $0x320] sm:$0xff]   ;;  %v5674_v16 = vld [vmem:[%s7839_s0 + $0x328] sm:$0xff]   ;;  %v5675_v17 = vld [vmem:[%s7839_s0 + $0x130] sm:$0xff]  }
  0x1b   :  { %v5676_v18 = vld [vmem:[%s7839_s0 + $0x330] sm:$0xff]  }
  0x21   :  { %5352 = vmatmul.mubr.msk.bf16.gmra.mrb[12].mxu0 %vm921_vm2, %v5613_v19  ;;  %5480 = vmatmul.mubr.msk.bf16.gmra.mrb[12].mxu1 %vm921_vm2, %v5614_v20  ;;  %v5677_v19 = vld [vmem:[%s7839_s0 + $0x138] sm:$0xff]  }
  0x22   :  { %5355 = vmatprep.mubr.msk.bf16.mxu0 %vm921_vm2, %v5615_v21  ;;  %5483 = vmatprep.mubr.msk.bf16.mxu1 %vm921_vm2, %v5616_v22  ;;  %v5678_v20 = vld [vmem:[%s7839_s0 + $0x338] sm:$0xff]   ;;  %v5679_v21 = vld [vmem:[%s7839_s0 + $0x140] sm:$0xff]  }
  0x23   :  { %v5680_v22 = vld [vmem:[%s7839_s0 + $0x340] sm:$0xff]  }
  0x29   :  { %5356 = vmatmul.mubr.msk.bf16.gmra.mrb[16].mxu0 %vm921_vm2, %v5617_v23  ;;  %5484 = vmatmul.mubr.msk.bf16.gmra.mrb[16].mxu1 %vm921_vm2, %v5618_v24  ;;  %v5681_v23 = vld [vmem:[%s7839_s0 + $0x148] sm:$0xff]  }
  0x2a   :  { %5359 = vmatprep.mubr.msk.bf16.mxu0 %vm921_vm2, %v5619_v25  ;;  %5487 = vmatprep.mubr.msk.bf16.mxu1 %vm921_vm2, %v5620_v26  ;;  %v5682_v24 = vld [vmem:[%s7839_s0 + $0x348] sm:$0xff]   ;;  %v5683_v25 = vld [vmem:[%s7839_s0 + $0x150] sm:$0xff]  }
  0x2b   :  { %v5684_v26 = vld [vmem:[%s7839_s0 + $0x350] sm:$0xff]  }
  0x31   :  { %5360 = vmatmul.mubr.msk.bf16.gmra.mrb[20].mxu0 %vm921_vm2, %v5621_v27  ;;  %5488 = vmatmul.mubr.msk.bf16.gmra.mrb[20].mxu1 %vm921_vm2, %v5622_v28  ;;  %v5685_v27 = vld [vmem:[%s7839_s0 + $0x158] sm:$0xff]  }
  0x32   :  { %5363 = vmatprep.mubr.msk.bf16.mxu0 %vm921_vm2, %v5623_v29  ;;  %5491 = vmatprep.mubr.msk.bf16.mxu1 %vm921_vm2, %v5624_v30  ;;  %v5686_v28 = vld [vmem:[%s7839_s0 + $0x358] sm:$0xff]   ;;  %v5687_v29 = vld [vmem:[%s7839_s0 + $0x160] sm:$0xff]  }
  0x33   :  { %v5688_v30 = vld [vmem:[%s7839_s0 + $0x360] sm:$0xff]  }
  0x39   :  { %5364 = vmatmul.mubr.msk.bf16.gmra.mrb[24].mxu0 %vm921_vm2, %v5625_v31  ;;  %5492 = vmatmul.mubr.msk.bf16.gmra.mrb[24].mxu1 %vm921_vm2, %v5626_v32  ;;  %v5689_v31 = vld [vmem:[%s7839_s0 + $0x168] sm:$0xff]  }
  0x3a   :  { %5367 = vmatprep.mubr.msk.bf16.mxu0 %vm921_vm2, %v5627_v33  ;;  %5495 = vmatprep.mubr.msk.bf16.mxu1 %vm921_vm2, %v5628_v34  ;;  %v5690_v32 = vld [vmem:[%s7839_s0 + $0x368] sm:$0xff]   ;;  %v5691_v33 = vld [vmem:[%s7839_s0 + $0x170] sm:$0xff]  }
  0x3b   :  { %v5692_v34 = vld [vmem:[%s7839_s0 + $0x370] sm:$0xff]  }
  0x41   :  { %5368 = vmatmul.mubr.msk.bf16.gmra.mrb[28].mxu0 %vm921_vm2, %v5629_v35  ;;  %5496 = vmatmul.mubr.msk.bf16.gmra.mrb[28].mxu1 %vm921_vm2, %v5630_v36  ;;  %v5693_v35 = vld [vmem:[%s7839_s0 + $0x178] sm:$0xff]  }
  0x42   :  { %5371 = vmatprep.mubr.msk.bf16.mxu0 %vm921_vm2, %v5631_v37  ;;  %5499 = vmatprep.mubr.msk.bf16.mxu1 %vm921_vm2, %v5632_v38  ;;  %v5694_v36 = vld [vmem:[%s7839_s0 + $0x378] sm:$0xff]   ;;  %v5695_v37 = vld [vmem:[%s7839_s0 + $0x180] sm:$0xff]  }
  0x43   :  { %v5696_v38 = vld [vmem:[%s7839_s0 + $0x380] sm:$0xff]  }
  0x49   :  { %5372 = vmatmul.mubr.msk.bf16.gmra.mrb[32].mxu0 %vm921_vm2, %v5633_v39  ;;  %5500 = vmatmul.mubr.msk.bf16.gmra.mrb[32].mxu1 %vm921_vm2, %v5634_v40  ;;  %v5697_v39 = vld [vmem:[%s7839_s0 + $0x188] sm:$0xff]  }
  0x4a   :  { %5375 = vmatprep.mubr.msk.bf16.mxu0 %vm921_vm2, %v5635_v41  ;;  %5503 = vmatprep.mubr.msk.bf16.mxu1 %vm921_vm2, %v5636_v42  ;;  %v5698_v40 = vld [vmem:[%s7839_s0 + $0x388] sm:$0xff]   ;;  %v5699_v41 = vld [vmem:[%s7839_s0 + $0x190] sm:$0xff]  }
  0x4b   :  { %v5700_v42 = vld [vmem:[%s7839_s0 + $0x390] sm:$0xff]  }
  0x51   :  { %5376 = vmatmul.mubr.msk.bf16.gmra.mrb[36].mxu0 %vm921_vm2, %v5637_v43  ;;  %5504 = vmatmul.mubr.msk.bf16.gmra.mrb[36].mxu1 %vm921_vm2, %v5638_v44  ;;  %v5701_v43 = vld [vmem:[%s7839_s0 + $0x198] sm:$0xff]  }
  0x52   :  { %5379 = vmatprep.mubr.msk.bf16.mxu0 %vm921_vm2, %v5639_v45  ;;  %5507 = vmatprep.mubr.msk.bf16.mxu1 %vm921_vm2, %v5640_v46  ;;  %v5702_v44 = vld [vmem:[%s7839_s0 + $0x398] sm:$0xff]   ;;  %v5703_v45 = vld [vmem:[%s7839_s0 + $0x1a0] sm:$0xff]  }
  0x53   :  { %v5704_v46 = vld [vmem:[%s7839_s0 + $0x3a0] sm:$0xff]  }
  0x59   :  { %5380 = vmatmul.mubr.msk.bf16.gmra.mrb[40].mxu0 %vm921_vm2, %v5641_v47  ;;  %5508 = vmatmul.mubr.msk.bf16.gmra.mrb[40].mxu1 %vm921_vm2, %v5642_v48  ;;  %v5705_v47 = vld [vmem:[%s7839_s0 + $0x1a8] sm:$0xff]  }
  0x5a   :  { %5383 = vmatprep.mubr.msk.bf16.mxu0 %vm921_vm2, %v5643_v49  ;;  %5511 = vmatprep.mubr.msk.bf16.mxu1 %vm921_vm2, %v5644_v50  ;;  %v5706_v48 = vld [vmem:[%s7839_s0 + $0x3a8] sm:$0xff]   ;;  %v5707_v49 = vld [vmem:[%s7839_s0 + $0x1b0] sm:$0xff]  }
  0x5b   :  { %v5708_v50 = vld [vmem:[%s7839_s0 + $0x3b0] sm:$0xff]  }
  0x61   :  { %5384 = vmatmul.mubr.msk.bf16.gmra.mrb[44].mxu0 %vm921_vm2, %v5645_v51  ;;  %5512 = vmatmul.mubr.msk.bf16.gmra.mrb[44].mxu1 %vm921_vm2, %v5646_v52  ;;  %v6201_v51 = vld [vmem:[%s7840_s2] ss:$0 sm:$0xff] }
  0x62   :  { %5387 = vmatprep.mubr.msk.bf16.mxu0 %vm921_vm2, %v5647_v53  ;;  %5515 = vmatprep.mubr.msk.bf16.mxu1 %vm921_vm2, %v5648_v54  ;;  %v6208_v53 = vld [vmem:[%s7841_s3] ss:$0 sm:$0xff] }
  0x69   :  { %5388 = vmatmul.mubr.msk.bf16.gmra.mrb[48].mxu0 %vm921_vm2, %v5649_v55  ;;  %5516 = vmatmul.mubr.msk.bf16.gmra.mrb[48].mxu1 %vm921_vm2, %v5650_v56 }
  0x6a   :  { %5391 = vmatprep.mubr.msk.bf16.mxu0 %vm921_vm2, %v5651_v57  ;;  %5519 = vmatprep.mubr.msk.bf16.mxu1 %vm921_vm2, %v5652_v58 }
  0x71   :  { %5392 = vmatmul.mubr.msk.bf16.gmra.mrb[52].mxu0 %vm921_vm2, %v5653_v59  ;;  %5520 = vmatmul.mubr.msk.bf16.gmra.mrb[52].mxu1 %vm921_vm2, %v5654_v60  ;;  %v5709_v59 = vld [vmem:[%s7839_s0 + $0x1b8] sm:$0xff]  }
  0x72   :  { %5395 = vmatprep.mubr.msk.bf16.mxu0 %vm921_vm2, %v5655_v61  ;;  %5523 = vmatprep.mubr.msk.bf16.mxu1 %vm921_vm2, %v5656_v62  ;;  %v5710_v60 = vld [vmem:[%s7839_s0 + $0x3b8] sm:$0xff]  }
  0x79   :  { %5396 = vmatmul.mubr.msk.bf16.gmra.mrb[56].mxu0 %vm921_vm2, %v5657_v63  ;;  %5524 = vmatmul.mubr.msk.bf16.gmra.mrb[56].mxu1 %vm921_vm2, %v5658_v0 }
  0x7a   :  { %5399 = vmatprep.mubr.msk.bf16.mxu0 %vm921_vm2, %v5659_v1  ;;  %5527 = vmatprep.mubr.msk.bf16.mxu1 %vm921_vm2, %v5660_v2  ;;  %v5711_v1 = vld [vmem:[%s7839_s0 + $0x1c0] sm:$0xff]  }
  0x7b   :  { %v5712_v2 = vld [vmem:[%s7839_s0 + $0x3c0] sm:$0xff]  }
  0x81   :  { %5400 = vmatmul.mubr.msk.bf16.gmra.mrb[60].mxu0 %vm921_vm2, %v5661_v3  ;;  %5528 = vmatmul.mubr.msk.bf16.gmra.mrb[60].mxu1 %vm921_vm2, %v5662_v4 }
  0x82   :  { %5403 = vmatprep.mubr.msk.bf16.mxu0 %vm921_vm2, %v5663_v5  ;;  %5531 = vmatprep.mubr.msk.bf16.mxu1 %vm921_vm2, %v5664_v6 }
  0x89   :  { %5404 = vmatmul.mubr.msk.bf16.gmra.mrb[64].mxu0 %vm921_vm2, %v5665_v7  ;;  %5532 = vmatmul.mubr.msk.bf16.gmra.mrb[64].mxu1 %vm921_vm2, %v5666_v8 }
  0x8a   :  { %5407 = vmatprep.mubr.msk.bf16.mxu0 %vm921_vm2, %v5667_v9  ;;  %5535 = vmatprep.mubr.msk.bf16.mxu1 %vm921_vm2, %v5668_v10 }
  0x91   :  { %5408 = vmatmul.mubr.msk.bf16.gmra.mrb[68].mxu0 %vm921_vm2, %v5669_v11  ;;  %5536 = vmatmul.mubr.msk.bf16.gmra.mrb[68].mxu1 %vm921_vm2, %v5670_v12 }
  0x92   :  { %5411 = vmatprep.mubr.msk.bf16.mxu0 %vm921_vm2, %v5671_v13  ;;  %5539 = vmatprep.mubr.msk.bf16.mxu1 %vm921_vm2, %v5672_v14 }
  0x99   :  { %5412 = vmatmul.mubr.msk.bf16.gmra.mrb[72].mxu0 %vm921_vm2, %v5673_v15  ;;  %5540 = vmatmul.mubr.msk.bf16.gmra.mrb[72].mxu1 %vm921_vm2, %v5674_v16 }
  0x9a   :  { %5415 = vmatprep.mubr.msk.bf16.mxu0 %vm921_vm2, %v5675_v17  ;;  %5543 = vmatprep.mubr.msk.bf16.mxu1 %vm921_vm2, %v5676_v18 }
  0xa1   :  { %5416 = vmatmul.mubr.msk.bf16.gmra.mrb[76].mxu0 %vm921_vm2, %v5677_v19  ;;  %5544 = vmatmul.mubr.msk.bf16.gmra.mrb[76].mxu1 %vm921_vm2, %v5678_v20 }
  0xa2   :  { %5419 = vmatprep.mubr.msk.bf16.mxu0 %vm921_vm2, %v5679_v21  ;;  %5547 = vmatprep.mubr.msk.bf16.mxu1 %vm921_vm2, %v5680_v22 }
  0xa9   :  { %5420 = vmatmul.mubr.msk.bf16.gmra.mrb[80].mxu0 %vm921_vm2, %v5681_v23  ;;  %5548 = vmatmul.mubr.msk.bf16.gmra.mrb[80].mxu1 %vm921_vm2, %v5682_v24 }
  0xaa   :  { %5423 = vmatprep.mubr.msk.bf16.mxu0 %vm921_vm2, %v5683_v25  ;;  %5551 = vmatprep.mubr.msk.bf16.mxu1 %vm921_vm2, %v5684_v26 }
  0xb1   :  { %5424 = vmatmul.mubr.msk.bf16.gmra.mrb[84].mxu0 %vm921_vm2, %v5685_v27  ;;  %5552 = vmatmul.mubr.msk.bf16.gmra.mrb[84].mxu1 %vm921_vm2, %v5686_v28 }
  0xb2   :  { %5427 = vmatprep.mubr.msk.bf16.mxu0 %vm921_vm2, %v5687_v29  ;;  %5555 = vmatprep.mubr.msk.bf16.mxu1 %vm921_vm2, %v5688_v30 }
  0xb9   :  { %5428 = vmatmul.mubr.msk.bf16.gmra.mrb[88].mxu0 %vm921_vm2, %v5689_v31  ;;  %5556 = vmatmul.mubr.msk.bf16.gmra.mrb[88].mxu1 %vm921_vm2, %v5690_v32 }
  0xba   :  { %5431 = vmatprep.mubr.msk.bf16.mxu0 %vm921_vm2, %v5691_v33  ;;  %5559 = vmatprep.mubr.msk.bf16.mxu1 %vm921_vm2, %v5692_v34 }
  0xc1   :  { %5432 = vmatmul.mubr.msk.bf16.gmra.mrb[92].mxu0 %vm921_vm2, %v5693_v35  ;;  %5560 = vmatmul.mubr.msk.bf16.gmra.mrb[92].mxu1 %vm921_vm2, %v5694_v36 }
  0xc2   :  { %5435 = vmatprep.mubr.msk.bf16.mxu0 %vm921_vm2, %v5695_v37  ;;  %5563 = vmatprep.mubr.msk.bf16.mxu1 %vm921_vm2, %v5696_v38  ;;  %v5713_v37 = vld [vmem:[%s7839_s0 + $0x1c8] sm:$0xff]  }
  0xc3   :  { %v5714_v38 = vld [vmem:[%s7839_s0 + $0x3c8] sm:$0xff]  }
  0xc9   :  { %5436 = vmatmul.mubr.msk.bf16.gmra.mrb[96].mxu0 %vm921_vm2, %v5697_v39  ;;  %5564 = vmatmul.mubr.msk.bf16.gmra.mrb[96].mxu1 %vm921_vm2, %v5698_v40 }
  0xca   :  { %5439 = vmatprep.mubr.msk.bf16.mxu0 %vm921_vm2, %v5699_v41  ;;  %5567 = vmatprep.mubr.msk.bf16.mxu1 %vm921_vm2, %v5700_v42 }
  0xd1   :  { %5440 = vmatmul.mubr.msk.bf16.gmra.mrb[100].mxu0 %vm921_vm2, %v5701_v43  ;;  %5568 = vmatmul.mubr.msk.bf16.gmra.mrb[100].mxu1 %vm921_vm2, %v5702_v44 }
  0xd2   :  { %5443 = vmatprep.mubr.msk.bf16.mxu0 %vm921_vm2, %v5703_v45  ;;  %5571 = vmatprep.mubr.msk.bf16.mxu1 %vm921_vm2, %v5704_v46  ;;  %v5715_v45 = vld [vmem:[%s7839_s0 + $0x1d0] sm:$0xff]  }
  0xd3   :  { %v5716_v46 = vld [vmem:[%s7839_s0 + $0x3d0] sm:$0xff]  }
  0xd9   :  { %5444 = vmatmul.mubr.msk.bf16.gmra.mrb[104].mxu0 %vm921_vm2, %v5705_v47  ;;  %5572 = vmatmul.mubr.msk.bf16.gmra.mrb[104].mxu1 %vm921_vm2, %v5706_v48 }
  0xda   :  { %5447 = vmatprep.mubr.msk.bf16.mxu0 %vm921_vm2, %v5707_v49  ;;  %5575 = vmatprep.mubr.msk.bf16.mxu1 %vm921_vm2, %v5708_v50 }
  0xdc   :  { %v5341_v52 = vpop.f32.mrb[0].mxu0  ;;  %v5469_v54 = vpop.f32.mrb[0].mxu1 }
  0xdd   :  { %v2379_v55 = vmul.f32 %v5341_v52, %v6201_v51  ;;  %v2507_v56 = vmul.f32 %v5469_v54, %v6201_v51  ;;  %v1347_v57 = vpop.f32.mrb[1].mxu0  ;;  %v1859_v58 = vpop.f32.mrb[1].mxu1 }
  0xde   :  { %v2377_v61 = vmul.f32 %v6201_v51, %v1347_v57  ;;  %v2505_v62 = vmul.f32 %v6201_v51, %v1859_v58  ;;  %v5342_v63 = vpop.f32.mrb[2].mxu0  ;;  %v5470_v0 = vpop.f32.mrb[2].mxu1 }
  0xdf   :  { %v2642_v3 = vadd.f32 %v6208_v53, %v2379_v55  ;;  %v2770_v4 = vadd.f32 %v6208_v53, %v2507_v56  ;;  %v2380_v5 = vmul.f32 %v5342_v63, %v6201_v51  ;;  %v2508_v6 = vmul.f32 %v5470_v0, %v6201_v51  ;;  %v1350_v7 = vpop.f32.mrb[3].mxu0  ;;  %v1862_v8 = vpop.f32.mrb[3].mxu1 }
  0xe0   :  { %v2640_v9 = vadd.f32 %v6208_v53, %v2377_v61  ;;  %v2768_v10 = vadd.f32 %v6208_v53, %v2505_v62  ;;  %v2378_v11 = vmul.f32 %v6201_v51, %v1350_v7  ;;  %v2506_v12 = vmul.f32 %v6201_v51, %v1862_v8 }
  0xe1   :  { %v2898_v13 = vmax.f32 %v2642_v3, 0.0  ;;  %v3026_v14 = vmax.f32 %v2770_v4, 0.0  ;;  %v2643_v15 = vadd.f32 %v6208_v53, %v2380_v5  ;;  %v2771_v16 = vadd.f32 %v6208_v53, %v2508_v6  ;;  %5448 = vmatmul.mubr.msk.bf16.gmra.mrb[108].mxu0 %vm921_vm2, %v5709_v59  ;;  %5576 = vmatmul.mubr.msk.bf16.gmra.mrb[108].mxu1 %vm921_vm2, %v5710_v60 }
  0xe2   :  { %v2896_v17 = vmax.f32 %v2640_v9, 0.0  ;;  %v3024_v18 = vmax.f32 %v2768_v10, 0.0  ;;  %v2641_v19 = vadd.f32 %v6208_v53, %v2378_v11  ;;  %v2769_v20 = vadd.f32 %v6208_v53, %v2506_v12  ;;  %5451 = vmatprep.mubr.msk.bf16.mxu0 %vm921_vm2, %v5711_v1  ;;  %5579 = vmatprep.mubr.msk.bf16.mxu1 %vm921_vm2, %v5712_v2 }
  0xe3   :  { %v4954_v21 = vpack.c.bf16 %v2898_v13, %v2898_v13  ;;  %v5082_v22 = vpack.c.bf16 %v3026_v14, %v3026_v14  ;;  %v2899_v23 = vmax.f32 %v2643_v15, 0.0  ;;  %v3027_v24 = vmax.f32 %v2771_v16, 0.0 }
  0xe4   :  { %v4952_v25 = vpack.c.bf16 %v2896_v17, %v2896_v17  ;;  %v5080_v26 = vpack.c.bf16 %v3024_v18, %v3024_v18  ;;  %v2897_v27 = vmax.f32 %v2641_v19, 0.0  ;;  %v3025_v28 = vmax.f32 %v2769_v20, 0.0  ;;  %v5345_v29 = vpop.f32.mrb[4].mxu0  ;;  %v5473_v30 = vpop.f32.mrb[4].mxu1  ;;  %v5717_v19 = vld [vmem:[%s7839_s0 + $0x1d8] sm:$0xff]  }
  0xe5   :  { %4179 = vst.msk [vmem:[%s7842_s4 + $0x8] sm:$0xf] %vm4176_vm3, %v4954_v21  ;;  %4307 = vst.msk [vmem:[%s7842_s4 + $0x208] sm:$0xf] %vm4176_vm3, %v5082_v22  ;;  %v4955_v31 = vpack.c.bf16 %v2899_v23, %v2899_v23  ;;  %v5083_v32 = vpack.c.bf16 %v3027_v24, %v3027_v24  ;;  %v2383_v33 = vmul.f32 %v5345_v29, %v6201_v51  ;;  %v1363_v35 = vpop.f32.mrb[5].mxu0  ;;  %v1875_v36 = vpop.f32.mrb[5].mxu1 }
  0xe6   :  { %v2511_v34 = vmul.f32 %v5473_v30, %v6201_v51  ;;  %4177 = vst.msk [vmem:[%s7842_s4] sm:$0xf] %vm4176_vm3, %v4952_v25  ;;  %4305 = vst.msk [vmem:[%s7842_s4 + $0x200] sm:$0xf] %vm4176_vm3, %v5080_v26  ;;  %v4953_v39 = vpack.c.bf16 %v2897_v27, %v2897_v27  ;;  %v5081_v40 = vpack.c.bf16 %v3025_v28, %v3025_v28  ;;  %v5346_v43 = vpop.f32.mrb[6].mxu0  ;;  %v5474_v44 = vpop.f32.mrb[6].mxu1 }
  0xe7   :  { %v2381_v41 = vmul.f32 %v6201_v51, %v1363_v35  ;;  %v2509_v42 = vmul.f32 %v6201_v51, %v1875_v36  ;;  %4180 = vst.msk [vmem:[%s7842_s4 + $0xc] sm:$0xf] %vm4176_vm3, %v4955_v31  ;;  %4308 = vst.msk [vmem:[%s7842_s4 + $0x20c] sm:$0xf] %vm4176_vm3, %v5083_v32  ;;  %v2646_v47 = vadd.f32 %v6208_v53, %v2383_v33  ;;  %v1366_v52 = vpop.f32.mrb[7].mxu0  ;;  %v1878_v54 = vpop.f32.mrb[7].mxu1 }
  0xe8   :  { %v2774_v48 = vadd.f32 %v6208_v53, %v2511_v34  ;;  %v2384_v49 = vmul.f32 %v5346_v43, %v6201_v51  ;;  %v2512_v50 = vmul.f32 %v5474_v44, %v6201_v51  ;;  %4178 = vst.msk [vmem:[%s7842_s4 + $0x4] sm:$0xf] %vm4176_vm3, %v4953_v39  ;;  %4306 = vst.msk [vmem:[%s7842_s4 + $0x204] sm:$0xf] %vm4176_vm3, %v5081_v40  ;;  %v5718_v20 = vld [vmem:[%s7839_s0 + $0x3d8] sm:$0xff]   ;;  %v5719_v27 = vld [vmem:[%s7839_s0 + $0x1e0] sm:$0xff]  }
  0xe9   :  { %v2644_v55 = vadd.f32 %v6208_v53, %v2381_v41  ;;  %v2772_v56 = vadd.f32 %v6208_v53, %v2509_v42  ;;  %v2382_v57 = vmul.f32 %v6201_v51, %v1366_v52  ;;  %v2510_v58 = vmul.f32 %v6201_v51, %v1878_v54  ;;  %5452 = vmatmul.mubr.msk.bf16.gmra.mrb[112].mxu0 %vm921_vm2, %v5713_v37  ;;  %v5720_v28 = vld [vmem:[%s7839_s0 + $0x3e0] sm:$0xff]  }
  0xea   :  { %v2902_v59 = vmax.f32 %v2646_v47, 0.0  ;;  %v3030_v60 = vmax.f32 %v2774_v48, 0.0  ;;  %v2647_v61 = vadd.f32 %v6208_v53, %v2384_v49  ;;  %v2775_v62 = vadd.f32 %v6208_v53, %v2512_v50  ;;  %5580 = vmatmul.mubr.msk.bf16.gmra.mrb[112].mxu1 %vm921_vm2, %v5714_v38  ;;  %5455 = vmatprep.mubr.msk.bf16.mxu0 %vm921_vm2, %v5715_v45 }
  0xeb   :  { %v2900_v63 = vmax.f32 %v2644_v55, 0.0  ;;  %v3028_v0 = vmax.f32 %v2772_v56, 0.0  ;;  %v2645_v1 = vadd.f32 %v6208_v53, %v2382_v57  ;;  %v2773_v2 = vadd.f32 %v6208_v53, %v2510_v58  ;;  %5583 = vmatprep.mubr.msk.bf16.mxu1 %vm921_vm2, %v5716_v46 }
  0xec   :  { %v4958_v3 = vpack.c.bf16 %v2902_v59, %v2902_v59  ;;  %v5086_v4 = vpack.c.bf16 %v3030_v60, %v3030_v60  ;;  %v2903_v5 = vmax.f32 %v2647_v61, 0.0  ;;  %v3031_v6 = vmax.f32 %v2775_v62, 0.0  ;;  %v5349_v11 = vpop.f32.mrb[8].mxu0  ;;  %v5477_v12 = vpop.f32.mrb[8].mxu1 }
  0xed   :  { %v4956_v7 = vpack.c.bf16 %v2900_v63, %v2900_v63  ;;  %v5084_v8 = vpack.c.bf16 %v3028_v0, %v3028_v0  ;;  %v2901_v9 = vmax.f32 %v2645_v1, 0.0  ;;  %v3029_v10 = vmax.f32 %v2773_v2, 0.0  ;;  %v1379_v17 = vpop.f32.mrb[9].mxu0  ;;  %v1891_v18 = vpop.f32.mrb[9].mxu1  ;;  %v5721_v1 = vld [vmem:[%s7839_s0 + $0x1e8] sm:$0xff]  }
  0xee   :  { %4183 = vst.msk [vmem:[%s7842_s4 + $0x18] sm:$0xf] %vm4176_vm3, %v4958_v3  ;;  %4311 = vst.msk [vmem:[%s7842_s4 + $0x218] sm:$0xf] %vm4176_vm3, %v5086_v4  ;;  %v4959_v13 = vpack.c.bf16 %v2903_v5, %v2903_v5  ;;  %v5087_v14 = vpack.c.bf16 %v3031_v6, %v3031_v6  ;;  %v2387_v15 = vmul.f32 %v5349_v11, %v6201_v51  ;;  %v5350_v25 = vpop.f32.mrb[10].mxu0  ;;  %v5478_v26 = vpop.f32.mrb[10].mxu1 }
  0xef   :  { %v2515_v16 = vmul.f32 %v5477_v12, %v6201_v51  ;;  %4181 = vst.msk [vmem:[%s7842_s4 + $0x10] sm:$0xf] %vm4176_vm3, %v4956_v7  ;;  %4309 = vst.msk [vmem:[%s7842_s4 + $0x210] sm:$0xf] %vm4176_vm3, %v5084_v8  ;;  %v4957_v21 = vpack.c.bf16 %v2901_v9, %v2901_v9  ;;  %v5085_v22 = vpack.c.bf16 %v3029_v10, %v3029_v10  ;;  %v1382_v33 = vpop.f32.mrb[11].mxu0  ;;  %v1894_v34 = vpop.f32.mrb[11].mxu1 }
  0xf0   :  { %v2385_v23 = vmul.f32 %v6201_v51, %v1379_v17  ;;  %v2513_v24 = vmul.f32 %v6201_v51, %v1891_v18  ;;  %4184 = vst.msk [vmem:[%s7842_s4 + $0x1c] sm:$0xf] %vm4176_vm3, %v4959_v13  ;;  %4312 = vst.msk [vmem:[%s7842_s4 + $0x21c] sm:$0xf] %vm4176_vm3, %v5087_v14  ;;  %v2650_v29 = vadd.f32 %v6208_v53, %v2387_v15  ;;  %v5722_v2 = vld [vmem:[%s7839_s0 + $0x3e8] sm:$0xff]   ;;  %v5723_v9 = vld [vmem:[%s7839_s0 + $0x1f0] sm:$0xff]  }
  0xf1   :  { %v2778_v30 = vadd.f32 %v6208_v53, %v2515_v16  ;;  %v2388_v31 = vmul.f32 %v5350_v25, %v6201_v51  ;;  %v2516_v32 = vmul.f32 %v5478_v26, %v6201_v51  ;;  %4182 = vst.msk [vmem:[%s7842_s4 + $0x14] sm:$0xf] %vm4176_vm3, %v4957_v21  ;;  %4310 = vst.msk [vmem:[%s7842_s4 + $0x214] sm:$0xf] %vm4176_vm3, %v5085_v22  ;;  %5456 = vmatmul.mubr.msk.bf16.gmra.mrb[116].mxu0 %vm921_vm2, %v5717_v19  ;;  %v5724_v10 = vld [vmem:[%s7839_s0 + $0x3f0] sm:$0xff]  }
  0xf2   :  { %v2648_v35 = vadd.f32 %v6208_v53, %v2385_v23  ;;  %v2776_v36 = vadd.f32 %v6208_v53, %v2513_v24  ;;  %v2386_v37 = vmul.f32 %v6201_v51, %v1382_v33  ;;  %v2514_v38 = vmul.f32 %v6201_v51, %v1894_v34  ;;  %5584 = vmatmul.mubr.msk.bf16.gmra.mrb[116].mxu1 %vm921_vm2, %v5718_v20 }
  0xf3   :  { %v2906_v39 = vmax.f32 %v2650_v29, 0.0  ;;  %v3034_v40 = vmax.f32 %v2778_v30, 0.0  ;;  %v2651_v41 = vadd.f32 %v6208_v53, %v2388_v31  ;;  %v2779_v42 = vadd.f32 %v6208_v53, %v2516_v32  ;;  %5459 = vmatprep.mubr.msk.bf16.mxu0 %vm921_vm2, %v5719_v27  ;;  %5587 = vmatprep.mubr.msk.bf16.mxu1 %vm921_vm2, %v5720_v28 }
  0xf4   :  { %v2904_v43 = vmax.f32 %v2648_v35, 0.0  ;;  %v3032_v44 = vmax.f32 %v2776_v36, 0.0  ;;  %v2649_v45 = vadd.f32 %v6208_v53, %v2386_v37  ;;  %v2777_v46 = vadd.f32 %v6208_v53, %v2514_v38  ;;  %v5353_v57 = vpop.f32.mrb[12].mxu0  ;;  %v5481_v58 = vpop.f32.mrb[12].mxu1 }
  0xf5   :  { %v4962_v47 = vpack.c.bf16 %v2906_v39, %v2906_v39  ;;  %v5090_v48 = vpack.c.bf16 %v3034_v40, %v3034_v40  ;;  %v2907_v49 = vmax.f32 %v2651_v41, 0.0  ;;  %v3035_v50 = vmax.f32 %v2779_v42, 0.0  ;;  %v1395_v63 = vpop.f32.mrb[13].mxu0  ;;  %v1907_v0 = vpop.f32.mrb[13].mxu1 }
  0xf6   :  { %v4960_v52 = vpack.c.bf16 %v2904_v43, %v2904_v43  ;;  %v5088_v54 = vpack.c.bf16 %v3032_v44, %v3032_v44  ;;  %v2905_v55 = vmax.f32 %v2649_v45, 0.0  ;;  %v3033_v56 = vmax.f32 %v2777_v46, 0.0  ;;  %v5354_v7 = vpop.f32.mrb[14].mxu0  ;;  %v5482_v8 = vpop.f32.mrb[14].mxu1  ;;  %v5725_v45 = vld [vmem:[%s7839_s0 + $0x1f8] sm:$0xff]  }
  0xf7   :  { %4187 = vst.msk [vmem:[%s7842_s4 + $0x28] sm:$0xf] %vm4176_vm3, %v4962_v47  ;;  %4315 = vst.msk [vmem:[%s7842_s4 + $0x228] sm:$0xf] %vm4176_vm3, %v5090_v48  ;;  %v4963_v59 = vpack.c.bf16 %v2907_v49, %v2907_v49  ;;  %v5091_v60 = vpack.c.bf16 %v3035_v50, %v3035_v50  ;;  %v2391_v61 = vmul.f32 %v5353_v57, %v6201_v51  ;;  %v1398_v15 = vpop.f32.mrb[15].mxu0  ;;  %v1910_v16 = vpop.f32.mrb[15].mxu1 }
  0xf8   :  { %v2519_v62 = vmul.f32 %v5481_v58, %v6201_v51  ;;  %4185 = vst.msk [vmem:[%s7842_s4 + $0x20] sm:$0xf] %vm4176_vm3, %v4960_v52  ;;  %4313 = vst.msk [vmem:[%s7842_s4 + $0x220] sm:$0xf] %vm4176_vm3, %v5088_v54  ;;  %v4961_v3 = vpack.c.bf16 %v2905_v55, %v2905_v55  ;;  %v5089_v4 = vpack.c.bf16 %v3033_v56, %v3033_v56  ;;  %v5726_v46 = vld [vmem:[%s7839_s0 + $0x3f8] sm:$0xff]  }
  0xf9   :  { %v2389_v5 = vmul.f32 %v6201_v51, %v1395_v63  ;;  %v2517_v6 = vmul.f32 %v6201_v51, %v1907_v0  ;;  %4188 = vst.msk [vmem:[%s7842_s4 + $0x2c] sm:$0xf] %vm4176_vm3, %v4963_v59  ;;  %4316 = vst.msk [vmem:[%s7842_s4 + $0x22c] sm:$0xf] %vm4176_vm3, %v5091_v60  ;;  %v2654_v11 = vadd.f32 %v6208_v53, %v2391_v61  ;;  %5460 = vmatmul.mubr.msk.bf16.gmra.mrb[120].mxu0 %vm921_vm2, %v5721_v1 }
  0xfa   :  { %v2782_v12 = vadd.f32 %v6208_v53, %v2519_v62  ;;  %v2392_v13 = vmul.f32 %v5354_v7, %v6201_v51  ;;  %v2520_v14 = vmul.f32 %v5482_v8, %v6201_v51  ;;  %4186 = vst.msk [vmem:[%s7842_s4 + $0x24] sm:$0xf] %vm4176_vm3, %v4961_v3  ;;  %4314 = vst.msk [vmem:[%s7842_s4 + $0x224] sm:$0xf] %vm4176_vm3, %v5089_v4  ;;  %5588 = vmatmul.mubr.msk.bf16.gmra.mrb[120].mxu1 %vm921_vm2, %v5722_v2 }
  0xfb   :  { %v2652_v17 = vadd.f32 %v6208_v53, %v2389_v5  ;;  %v2780_v18 = vadd.f32 %v6208_v53, %v2517_v6  ;;  %v2390_v19 = vmul.f32 %v6201_v51, %v1398_v15  ;;  %v2518_v20 = vmul.f32 %v6201_v51, %v1910_v16  ;;  %5463 = vmatprep.mubr.msk.bf16.mxu0 %vm921_vm2, %v5723_v9 }
  0xfc   :  { %v2910_v21 = vmax.f32 %v2654_v11, 0.0  ;;  %v3038_v22 = vmax.f32 %v2782_v12, 0.0  ;;  %v2655_v23 = vadd.f32 %v6208_v53, %v2392_v13  ;;  %v2783_v24 = vadd.f32 %v6208_v53, %v2520_v14  ;;  %5591 = vmatprep.mubr.msk.bf16.mxu1 %vm921_vm2, %v5724_v10  ;;  %v5357_v37 = vpop.f32.mrb[16].mxu0  ;;  %v5485_v38 = vpop.f32.mrb[16].mxu1 }
  0xfd   :  { %v2908_v25 = vmax.f32 %v2652_v17, 0.0  ;;  %v3036_v26 = vmax.f32 %v2780_v18, 0.0  ;;  %v2653_v27 = vadd.f32 %v6208_v53, %v2390_v19  ;;  %v2781_v28 = vadd.f32 %v6208_v53, %v2518_v20  ;;  %v1411_v43 = vpop.f32.mrb[17].mxu0  ;;  %v1923_v44 = vpop.f32.mrb[17].mxu1 }
  0xfe   :  { %v4966_v29 = vpack.c.bf16 %v2910_v21, %v2910_v21  ;;  %v5094_v30 = vpack.c.bf16 %v3038_v22, %v3038_v22  ;;  %v2911_v31 = vmax.f32 %v2655_v23, 0.0  ;;  %v3039_v32 = vmax.f32 %v2783_v24, 0.0  ;;  %v5358_v52 = vpop.f32.mrb[18].mxu0  ;;  %v5486_v54 = vpop.f32.mrb[18].mxu1 }
  0xff   :  { %v4964_v33 = vpack.c.bf16 %v2908_v25, %v2908_v25  ;;  %v5092_v34 = vpack.c.bf16 %v3036_v26, %v3036_v26  ;;  %v2909_v35 = vmax.f32 %v2653_v27, 0.0  ;;  %v3037_v36 = vmax.f32 %v2781_v28, 0.0  ;;  %v1414_v59 = vpop.f32.mrb[19].mxu0  ;;  %v1926_v60 = vpop.f32.mrb[19].mxu1 }
 0x100   :  { %4191 = vst.msk [vmem:[%s7842_s4 + $0x38] sm:$0xf] %vm4176_vm3, %v4966_v29  ;;  %4319 = vst.msk [vmem:[%s7842_s4 + $0x238] sm:$0xf] %vm4176_vm3, %v5094_v30  ;;  %v4967_v39 = vpack.c.bf16 %v2911_v31, %v2911_v31  ;;  %v5095_v40 = vpack.c.bf16 %v3039_v32, %v3039_v32  ;;  %v2395_v41 = vmul.f32 %v5357_v37, %v6201_v51 }
 0x101   :  { %v2523_v42 = vmul.f32 %v5485_v38, %v6201_v51  ;;  %4189 = vst.msk [vmem:[%s7842_s4 + $0x30] sm:$0xf] %vm4176_vm3, %v4964_v33  ;;  %4317 = vst.msk [vmem:[%s7842_s4 + $0x230] sm:$0xf] %vm4176_vm3, %v5092_v34  ;;  %v4965_v47 = vpack.c.bf16 %v2909_v35, %v2909_v35  ;;  %v5093_v48 = vpack.c.bf16 %v3037_v36, %v3037_v36  ;;  %5464 = vmatmul.mubr.msk.bf16.gmra.mrb[124].mxu0 %vm921_vm2, %v5725_v45 }
 0x102   :  { %v2393_v49 = vmul.f32 %v6201_v51, %v1411_v43  ;;  %v2521_v50 = vmul.f32 %v6201_v51, %v1923_v44  ;;  %4192 = vst.msk [vmem:[%s7842_s4 + $0x3c] sm:$0xf] %vm4176_vm3, %v4967_v39  ;;  %4320 = vst.msk [vmem:[%s7842_s4 + $0x23c] sm:$0xf] %vm4176_vm3, %v5095_v40  ;;  %v2658_v55 = vadd.f32 %v6208_v53, %v2395_v41  ;;  %5592 = vmatmul.mubr.msk.bf16.gmra.mrb[124].mxu1 %vm921_vm2, %v5726_v46 }
 0x103   :  { %v2786_v56 = vadd.f32 %v6208_v53, %v2523_v42  ;;  %v2396_v57 = vmul.f32 %v5358_v52, %v6201_v51  ;;  %v2524_v58 = vmul.f32 %v5486_v54, %v6201_v51  ;;  %4190 = vst.msk [vmem:[%s7842_s4 + $0x34] sm:$0xf] %vm4176_vm3, %v4965_v47  ;;  %4318 = vst.msk [vmem:[%s7842_s4 + $0x234] sm:$0xf] %vm4176_vm3, %v5093_v48 }
 0x104   :  { %v2656_v61 = vadd.f32 %v6208_v53, %v2393_v49  ;;  %v2784_v62 = vadd.f32 %v6208_v53, %v2521_v50  ;;  %v2394_v63 = vmul.f32 %v6201_v51, %v1414_v59  ;;  %v2522_v0 = vmul.f32 %v6201_v51, %v1926_v60  ;;  %v5361_v17 = vpop.f32.mrb[20].mxu0  ;;  %v5489_v18 = vpop.f32.mrb[20].mxu1 }
 0x105   :  { %v2914_v1 = vmax.f32 %v2658_v55, 0.0  ;;  %v3042_v2 = vmax.f32 %v2786_v56, 0.0  ;;  %v2659_v3 = vadd.f32 %v6208_v53, %v2396_v57  ;;  %v2787_v4 = vadd.f32 %v6208_v53, %v2524_v58  ;;  %v1427_v23 = vpop.f32.mrb[21].mxu0  ;;  %v1939_v24 = vpop.f32.mrb[21].mxu1 }
 0x106   :  { %v2912_v5 = vmax.f32 %v2656_v61, 0.0  ;;  %v3040_v6 = vmax.f32 %v2784_v62, 0.0  ;;  %v2657_v7 = vadd.f32 %v6208_v53, %v2394_v63  ;;  %v2785_v8 = vadd.f32 %v6208_v53, %v2522_v0  ;;  %v5362_v29 = vpop.f32.mrb[22].mxu0  ;;  %v5490_v30 = vpop.f32.mrb[22].mxu1 }
 0x107   :  { %v4970_v9 = vpack.c.bf16 %v2914_v1, %v2914_v1  ;;  %v5098_v10 = vpack.c.bf16 %v3042_v2, %v3042_v2  ;;  %v2915_v11 = vmax.f32 %v2659_v3, 0.0  ;;  %v3043_v12 = vmax.f32 %v2787_v4, 0.0  ;;  %v1430_v35 = vpop.f32.mrb[23].mxu0  ;;  %v1942_v36 = vpop.f32.mrb[23].mxu1 }
 0x108   :  { %v4968_v13 = vpack.c.bf16 %v2912_v5, %v2912_v5  ;;  %v5096_v14 = vpack.c.bf16 %v3040_v6, %v3040_v6  ;;  %v2913_v15 = vmax.f32 %v2657_v7, 0.0  ;;  %v3041_v16 = vmax.f32 %v2785_v8, 0.0 }
 0x109   :  { %4195 = vst.msk [vmem:[%s7842_s4 + $0x48] sm:$0xf] %vm4176_vm3, %v4970_v9  ;;  %4323 = vst.msk [vmem:[%s7842_s4 + $0x248] sm:$0xf] %vm4176_vm3, %v5098_v10  ;;  %v4971_v19 = vpack.c.bf16 %v2915_v11, %v2915_v11  ;;  %v5099_v20 = vpack.c.bf16 %v3043_v12, %v3043_v12  ;;  %v2399_v21 = vmul.f32 %v5361_v17, %v6201_v51 }
 0x10a   :  { %v2527_v22 = vmul.f32 %v5489_v18, %v6201_v51  ;;  %4193 = vst.msk [vmem:[%s7842_s4 + $0x40] sm:$0xf] %vm4176_vm3, %v4968_v13  ;;  %4321 = vst.msk [vmem:[%s7842_s4 + $0x240] sm:$0xf] %vm4176_vm3, %v5096_v14  ;;  %v4969_v25 = vpack.c.bf16 %v2913_v15, %v2913_v15  ;;  %v5097_v26 = vpack.c.bf16 %v3041_v16, %v3041_v16 }
 0x10b   :  { %v2397_v27 = vmul.f32 %v6201_v51, %v1427_v23  ;;  %v2525_v28 = vmul.f32 %v6201_v51, %v1939_v24  ;;  %4196 = vst.msk [vmem:[%s7842_s4 + $0x4c] sm:$0xf] %vm4176_vm3, %v4971_v19  ;;  %4324 = vst.msk [vmem:[%s7842_s4 + $0x24c] sm:$0xf] %vm4176_vm3, %v5099_v20  ;;  %v2662_v31 = vadd.f32 %v6208_v53, %v2399_v21 }
 0x10c   :  { %v2790_v32 = vadd.f32 %v6208_v53, %v2527_v22  ;;  %v2400_v33 = vmul.f32 %v5362_v29, %v6201_v51  ;;  %v2528_v34 = vmul.f32 %v5490_v30, %v6201_v51  ;;  %4194 = vst.msk [vmem:[%s7842_s4 + $0x44] sm:$0xf] %vm4176_vm3, %v4969_v25  ;;  %4322 = vst.msk [vmem:[%s7842_s4 + $0x244] sm:$0xf] %vm4176_vm3, %v5097_v26  ;;  %v5365_v59 = vpop.f32.mrb[24].mxu0  ;;  %v5493_v60 = vpop.f32.mrb[24].mxu1 }
 0x10d   :  { %v2660_v37 = vadd.f32 %v6208_v53, %v2397_v27  ;;  %v2788_v38 = vadd.f32 %v6208_v53, %v2525_v28  ;;  %v2398_v39 = vmul.f32 %v6201_v51, %v1430_v35  ;;  %v2526_v40 = vmul.f32 %v6201_v51, %v1942_v36  ;;  %v1443_v1 = vpop.f32.mrb[25].mxu0  ;;  %v1955_v2 = vpop.f32.mrb[25].mxu1 }
 0x10e   :  { %v2918_v41 = vmax.f32 %v2662_v31, 0.0  ;;  %v3046_v42 = vmax.f32 %v2790_v32, 0.0  ;;  %v2663_v43 = vadd.f32 %v6208_v53, %v2400_v33  ;;  %v2791_v44 = vadd.f32 %v6208_v53, %v2528_v34  ;;  %v5366_v7 = vpop.f32.mrb[26].mxu0  ;;  %v5494_v8 = vpop.f32.mrb[26].mxu1 }
 0x10f   :  { %v2916_v45 = vmax.f32 %v2660_v37, 0.0  ;;  %v3044_v46 = vmax.f32 %v2788_v38, 0.0  ;;  %v2661_v47 = vadd.f32 %v6208_v53, %v2398_v39  ;;  %v2789_v48 = vadd.f32 %v6208_v53, %v2526_v40  ;;  %v1446_v13 = vpop.f32.mrb[27].mxu0  ;;  %v1958_v14 = vpop.f32.mrb[27].mxu1 }
 0x110   :  { %v4974_v49 = vpack.c.bf16 %v2918_v41, %v2918_v41  ;;  %v5102_v50 = vpack.c.bf16 %v3046_v42, %v3046_v42  ;;  %v2919_v52 = vmax.f32 %v2663_v43, 0.0  ;;  %v3047_v54 = vmax.f32 %v2791_v44, 0.0 }
 0x111   :  { %v4972_v55 = vpack.c.bf16 %v2916_v45, %v2916_v45  ;;  %v5100_v56 = vpack.c.bf16 %v3044_v46, %v3044_v46  ;;  %v2917_v57 = vmax.f32 %v2661_v47, 0.0  ;;  %v3045_v58 = vmax.f32 %v2789_v48, 0.0 }
 0x112   :  { %4199 = vst.msk [vmem:[%s7842_s4 + $0x58] sm:$0xf] %vm4176_vm3, %v4974_v49  ;;  %4327 = vst.msk [vmem:[%s7842_s4 + $0x258] sm:$0xf] %vm4176_vm3, %v5102_v50  ;;  %v4975_v61 = vpack.c.bf16 %v2919_v52, %v2919_v52  ;;  %v5103_v62 = vpack.c.bf16 %v3047_v54, %v3047_v54  ;;  %v2403_v63 = vmul.f32 %v5365_v59, %v6201_v51 }
 0x113   :  { %v2531_v0 = vmul.f32 %v5493_v60, %v6201_v51  ;;  %4197 = vst.msk [vmem:[%s7842_s4 + $0x50] sm:$0xf] %vm4176_vm3, %v4972_v55  ;;  %4325 = vst.msk [vmem:[%s7842_s4 + $0x250] sm:$0xf] %vm4176_vm3, %v5100_v56  ;;  %v4973_v3 = vpack.c.bf16 %v2917_v57, %v2917_v57  ;;  %v5101_v4 = vpack.c.bf16 %v3045_v58, %v3045_v58 }
 0x114   :  { %v2401_v5 = vmul.f32 %v6201_v51, %v1443_v1  ;;  %v2529_v6 = vmul.f32 %v6201_v51, %v1955_v2  ;;  %4200 = vst.msk [vmem:[%s7842_s4 + $0x5c] sm:$0xf] %vm4176_vm3, %v4975_v61  ;;  %4328 = vst.msk [vmem:[%s7842_s4 + $0x25c] sm:$0xf] %vm4176_vm3, %v5103_v62  ;;  %v2666_v9 = vadd.f32 %v6208_v53, %v2403_v63  ;;  %v5369_v35 = vpop.f32.mrb[28].mxu0  ;;  %v5497_v36 = vpop.f32.mrb[28].mxu1 }
 0x115   :  { %v2794_v10 = vadd.f32 %v6208_v53, %v2531_v0  ;;  %v2404_v11 = vmul.f32 %v5366_v7, %v6201_v51  ;;  %v2532_v12 = vmul.f32 %v5494_v8, %v6201_v51  ;;  %4198 = vst.msk [vmem:[%s7842_s4 + $0x54] sm:$0xf] %vm4176_vm3, %v4973_v3  ;;  %4326 = vst.msk [vmem:[%s7842_s4 + $0x254] sm:$0xf] %vm4176_vm3, %v5101_v4  ;;  %v1459_v41 = vpop.f32.mrb[29].mxu0  ;;  %v1971_v42 = vpop.f32.mrb[29].mxu1 }
 0x116   :  { %v2664_v15 = vadd.f32 %v6208_v53, %v2401_v5  ;;  %v2792_v16 = vadd.f32 %v6208_v53, %v2529_v6  ;;  %v2402_v17 = vmul.f32 %v6201_v51, %v1446_v13  ;;  %v2530_v18 = vmul.f32 %v6201_v51, %v1958_v14  ;;  %v5370_v47 = vpop.f32.mrb[30].mxu0  ;;  %v5498_v48 = vpop.f32.mrb[30].mxu1 }
 0x117   :  { %v2922_v19 = vmax.f32 %v2666_v9, 0.0  ;;  %v3050_v20 = vmax.f32 %v2794_v10, 0.0  ;;  %v2667_v21 = vadd.f32 %v6208_v53, %v2404_v11  ;;  %v2795_v22 = vadd.f32 %v6208_v53, %v2532_v12  ;;  %v1462_v55 = vpop.f32.mrb[31].mxu0  ;;  %v1974_v56 = vpop.f32.mrb[31].mxu1 }
 0x118   :  { %v2920_v23 = vmax.f32 %v2664_v15, 0.0  ;;  %v3048_v24 = vmax.f32 %v2792_v16, 0.0  ;;  %v2665_v25 = vadd.f32 %v6208_v53, %v2402_v17  ;;  %v2793_v26 = vadd.f32 %v6208_v53, %v2530_v18 }
 0x119   :  { %v4978_v27 = vpack.c.bf16 %v2922_v19, %v2922_v19  ;;  %v5106_v28 = vpack.c.bf16 %v3050_v20, %v3050_v20  ;;  %v2923_v29 = vmax.f32 %v2667_v21, 0.0  ;;  %v3051_v30 = vmax.f32 %v2795_v22, 0.0 }
 0x11a   :  { %v4976_v31 = vpack.c.bf16 %v2920_v23, %v2920_v23  ;;  %v5104_v32 = vpack.c.bf16 %v3048_v24, %v3048_v24  ;;  %v2921_v33 = vmax.f32 %v2665_v25, 0.0  ;;  %v3049_v34 = vmax.f32 %v2793_v26, 0.0 }
 0x11b   :  { %4203 = vst.msk [vmem:[%s7842_s4 + $0x68] sm:$0xf] %vm4176_vm3, %v4978_v27  ;;  %4331 = vst.msk [vmem:[%s7842_s4 + $0x268] sm:$0xf] %vm4176_vm3, %v5106_v28  ;;  %v4979_v37 = vpack.c.bf16 %v2923_v29, %v2923_v29  ;;  %v5107_v38 = vpack.c.bf16 %v3051_v30, %v3051_v30  ;;  %v2407_v39 = vmul.f32 %v5369_v35, %v6201_v51 }
 0x11c   :  { %v2535_v40 = vmul.f32 %v5497_v36, %v6201_v51  ;;  %4201 = vst.msk [vmem:[%s7842_s4 + $0x60] sm:$0xf] %vm4176_vm3, %v4976_v31  ;;  %4329 = vst.msk [vmem:[%s7842_s4 + $0x260] sm:$0xf] %vm4176_vm3, %v5104_v32  ;;  %v4977_v43 = vpack.c.bf16 %v2921_v33, %v2921_v33  ;;  %v5105_v44 = vpack.c.bf16 %v3049_v34, %v3049_v34  ;;  %v5373_v13 = vpop.f32.mrb[32].mxu0  ;;  %v5501_v14 = vpop.f32.mrb[32].mxu1 }
 0x11d   :  { %v2405_v45 = vmul.f32 %v6201_v51, %v1459_v41  ;;  %v2533_v46 = vmul.f32 %v6201_v51, %v1971_v42  ;;  %4204 = vst.msk [vmem:[%s7842_s4 + $0x6c] sm:$0xf] %vm4176_vm3, %v4979_v37  ;;  %4332 = vst.msk [vmem:[%s7842_s4 + $0x26c] sm:$0xf] %vm4176_vm3, %v5107_v38  ;;  %v2670_v49 = vadd.f32 %v6208_v53, %v2407_v39  ;;  %v1475_v19 = vpop.f32.mrb[33].mxu0  ;;  %v1987_v20 = vpop.f32.mrb[33].mxu1 }
 0x11e   :  { %v2798_v50 = vadd.f32 %v6208_v53, %v2535_v40  ;;  %v2408_v52 = vmul.f32 %v5370_v47, %v6201_v51  ;;  %v2536_v54 = vmul.f32 %v5498_v48, %v6201_v51  ;;  %4202 = vst.msk [vmem:[%s7842_s4 + $0x64] sm:$0xf] %vm4176_vm3, %v4977_v43  ;;  %4330 = vst.msk [vmem:[%s7842_s4 + $0x264] sm:$0xf] %vm4176_vm3, %v5105_v44  ;;  %v5374_v25 = vpop.f32.mrb[34].mxu0  ;;  %v5502_v26 = vpop.f32.mrb[34].mxu1 }
 0x11f   :  { %v2668_v57 = vadd.f32 %v6208_v53, %v2405_v45  ;;  %v2796_v58 = vadd.f32 %v6208_v53, %v2533_v46  ;;  %v2406_v59 = vmul.f32 %v6201_v51, %v1462_v55  ;;  %v2534_v60 = vmul.f32 %v6201_v51, %v1974_v56  ;;  %v1478_v31 = vpop.f32.mrb[35].mxu0  ;;  %v1990_v32 = vpop.f32.mrb[35].mxu1 }
 0x120   :  { %v2926_v61 = vmax.f32 %v2670_v49, 0.0  ;;  %v3054_v62 = vmax.f32 %v2798_v50, 0.0  ;;  %v2671_v63 = vadd.f32 %v6208_v53, %v2408_v52  ;;  %v2799_v0 = vadd.f32 %v6208_v53, %v2536_v54 }
 0x121   :  { %v2924_v1 = vmax.f32 %v2668_v57, 0.0  ;;  %v3052_v2 = vmax.f32 %v2796_v58, 0.0  ;;  %v2669_v3 = vadd.f32 %v6208_v53, %v2406_v59  ;;  %v2797_v4 = vadd.f32 %v6208_v53, %v2534_v60 }
 0x122   :  { %v4982_v5 = vpack.c.bf16 %v2926_v61, %v2926_v61  ;;  %v5110_v6 = vpack.c.bf16 %v3054_v62, %v3054_v62  ;;  %v2927_v7 = vmax.f32 %v2671_v63, 0.0  ;;  %v3055_v8 = vmax.f32 %v2799_v0, 0.0 }
 0x123   :  { %v4980_v9 = vpack.c.bf16 %v2924_v1, %v2924_v1  ;;  %v5108_v10 = vpack.c.bf16 %v3052_v2, %v3052_v2  ;;  %v2925_v11 = vmax.f32 %v2669_v3, 0.0  ;;  %v3053_v12 = vmax.f32 %v2797_v4, 0.0 }
 0x124   :  { %4207 = vst.msk [vmem:[%s7842_s4 + $0x78] sm:$0xf] %vm4176_vm3, %v4982_v5  ;;  %4335 = vst.msk [vmem:[%s7842_s4 + $0x278] sm:$0xf] %vm4176_vm3, %v5110_v6  ;;  %v4983_v15 = vpack.c.bf16 %v2927_v7, %v2927_v7  ;;  %v5111_v16 = vpack.c.bf16 %v3055_v8, %v3055_v8  ;;  %v2411_v17 = vmul.f32 %v5373_v13, %v6201_v51  ;;  %v5377_v55 = vpop.f32.mrb[36].mxu0  ;;  %v5505_v56 = vpop.f32.mrb[36].mxu1 }
 0x125   :  { %v2539_v18 = vmul.f32 %v5501_v14, %v6201_v51  ;;  %4205 = vst.msk [vmem:[%s7842_s4 + $0x70] sm:$0xf] %vm4176_vm3, %v4980_v9  ;;  %4333 = vst.msk [vmem:[%s7842_s4 + $0x270] sm:$0xf] %vm4176_vm3, %v5108_v10  ;;  %v4981_v21 = vpack.c.bf16 %v2925_v11, %v2925_v11  ;;  %v5109_v22 = vpack.c.bf16 %v3053_v12, %v3053_v12  ;;  %v1491_v61 = vpop.f32.mrb[37].mxu0  ;;  %v2003_v62 = vpop.f32.mrb[37].mxu1 }
 0x126   :  { %v2409_v23 = vmul.f32 %v6201_v51, %v1475_v19  ;;  %v2537_v24 = vmul.f32 %v6201_v51, %v1987_v20  ;;  %4208 = vst.msk [vmem:[%s7842_s4 + $0x7c] sm:$0xf] %vm4176_vm3, %v4983_v15  ;;  %4336 = vst.msk [vmem:[%s7842_s4 + $0x27c] sm:$0xf] %vm4176_vm3, %v5111_v16  ;;  %v2674_v27 = vadd.f32 %v6208_v53, %v2411_v17  ;;  %v5378_v3 = vpop.f32.mrb[38].mxu0  ;;  %v5506_v4 = vpop.f32.mrb[38].mxu1 }
 0x127   :  { %v2802_v28 = vadd.f32 %v6208_v53, %v2539_v18  ;;  %v2412_v29 = vmul.f32 %v5374_v25, %v6201_v51  ;;  %v2540_v30 = vmul.f32 %v5502_v26, %v6201_v51  ;;  %4206 = vst.msk [vmem:[%s7842_s4 + $0x74] sm:$0xf] %vm4176_vm3, %v4981_v21  ;;  %4334 = vst.msk [vmem:[%s7842_s4 + $0x274] sm:$0xf] %vm4176_vm3, %v5109_v22  ;;  %v1494_v9 = vpop.f32.mrb[39].mxu0  ;;  %v2006_v10 = vpop.f32.mrb[39].mxu1 }
 0x128   :  { %v2672_v33 = vadd.f32 %v6208_v53, %v2409_v23  ;;  %v2800_v34 = vadd.f32 %v6208_v53, %v2537_v24  ;;  %v2410_v35 = vmul.f32 %v6201_v51, %v1478_v31  ;;  %v2538_v36 = vmul.f32 %v6201_v51, %v1990_v32 }
 0x129   :  { %v2930_v37 = vmax.f32 %v2674_v27, 0.0  ;;  %v3058_v38 = vmax.f32 %v2802_v28, 0.0  ;;  %v2675_v39 = vadd.f32 %v6208_v53, %v2412_v29  ;;  %v2803_v40 = vadd.f32 %v6208_v53, %v2540_v30 }
 0x12a   :  { %v2928_v41 = vmax.f32 %v2672_v33, 0.0  ;;  %v3056_v42 = vmax.f32 %v2800_v34, 0.0  ;;  %v2673_v43 = vadd.f32 %v6208_v53, %v2410_v35  ;;  %v2801_v44 = vadd.f32 %v6208_v53, %v2538_v36  ;;  %v6741_v33 = vld [vmem:[%s7840_s2] ss:$0 sm:$0xff] }
 0x12b   :  { %v4986_v45 = vpack.c.bf16 %v2930_v37, %v2930_v37  ;;  %v5114_v46 = vpack.c.bf16 %v3058_v38, %v3058_v38  ;;  %v2931_v47 = vmax.f32 %v2675_v39, 0.0  ;;  %v3059_v48 = vmax.f32 %v2803_v40, 0.0 }
 0x12c   :  { %v4984_v49 = vpack.c.bf16 %v2928_v41, %v2928_v41  ;;  %v5112_v50 = vpack.c.bf16 %v3056_v42, %v3056_v42  ;;  %v2929_v52 = vmax.f32 %v2673_v43, 0.0  ;;  %v3057_v54 = vmax.f32 %v2801_v44, 0.0  ;;  %v5381_v30 = vpop.f32.mrb[40].mxu0  ;;  %v5509_v31 = vpop.f32.mrb[40].mxu1  ;;  %v6766_v44 = vld [vmem:[%s7841_s3] ss:$0 sm:$0xff] }
 0x12d   :  { %4211 = vst.msk [vmem:[%s7842_s4 + $0x88] sm:$0xf] %vm4176_vm3, %v4986_v45  ;;  %4339 = vst.msk [vmem:[%s7842_s4 + $0x288] sm:$0xf] %vm4176_vm3, %v5114_v46  ;;  %v4987_v57 = vpack.c.bf16 %v2931_v47, %v2931_v47  ;;  %v5115_v58 = vpack.c.bf16 %v3059_v48, %v3059_v48  ;;  %v2415_v59 = vmul.f32 %v5377_v55, %v6201_v51  ;;  %v1507_v36 = vpop.f32.mrb[41].mxu0  ;;  %v2019_v37 = vpop.f32.mrb[41].mxu1 }
 0x12e   :  { %v2543_v60 = vmul.f32 %v5505_v56, %v6201_v51  ;;  %4209 = vst.msk [vmem:[%s7842_s4 + $0x80] sm:$0xf] %vm4176_vm3, %v4984_v49  ;;  %4337 = vst.msk [vmem:[%s7842_s4 + $0x280] sm:$0xf] %vm4176_vm3, %v5112_v50  ;;  %v4985_v63 = vpack.c.bf16 %v2929_v52, %v2929_v52  ;;  %v5113_v0 = vpack.c.bf16 %v3057_v54, %v3057_v54  ;;  %v5382_v42 = vpop.f32.mrb[42].mxu0  ;;  %v5510_v43 = vpop.f32.mrb[42].mxu1 }
 0x12f   :  { %v2413_v1 = vmul.f32 %v6201_v51, %v1491_v61  ;;  %v2541_v2 = vmul.f32 %v6201_v51, %v2003_v62  ;;  %4212 = vst.msk [vmem:[%s7842_s4 + $0x8c] sm:$0xf] %vm4176_vm3, %v4987_v57  ;;  %4340 = vst.msk [vmem:[%s7842_s4 + $0x28c] sm:$0xf] %vm4176_vm3, %v5115_v58  ;;  %v2678_v5 = vadd.f32 %v6208_v53, %v2415_v59  ;;  %v1510_v49 = vpop.f32.mrb[43].mxu0  ;;  %v2022_v50 = vpop.f32.mrb[43].mxu1 }
 0x130   :  { %v2806_v6 = vadd.f32 %v6208_v53, %v2543_v60  ;;  %v2416_v7 = vmul.f32 %v5378_v3, %v6201_v51  ;;  %v2544_v8 = vmul.f32 %v5506_v4, %v6201_v51  ;;  %4210 = vst.msk [vmem:[%s7842_s4 + $0x84] sm:$0xf] %vm4176_vm3, %v4985_v63  ;;  %4338 = vst.msk [vmem:[%s7842_s4 + $0x284] sm:$0xf] %vm4176_vm3, %v5113_v0 }
 0x131   :  { %v2676_v11 = vadd.f32 %v6208_v53, %v2413_v1  ;;  %v2804_v12 = vadd.f32 %v6208_v53, %v2541_v2  ;;  %v2414_v13 = vmul.f32 %v6201_v51, %v1494_v9  ;;  %v2542_v14 = vmul.f32 %v6201_v51, %v2006_v10 }
 0x132   :  { %v2934_v15 = vmax.f32 %v2678_v5, 0.0  ;;  %v3062_v16 = vmax.f32 %v2806_v6, 0.0  ;;  %v2679_v17 = vadd.f32 %v6208_v53, %v2416_v7  ;;  %v2807_v18 = vadd.f32 %v6208_v53, %v2544_v8 }
 0x133   :  { %v2932_v19 = vmax.f32 %v2676_v11, 0.0  ;;  %v3060_v20 = vmax.f32 %v2804_v12, 0.0  ;;  %v2677_v21 = vadd.f32 %v6208_v53, %v2414_v13  ;;  %v2805_v22 = vadd.f32 %v6208_v53, %v2542_v14 }
 0x134   :  { %v4990_v23 = vpack.c.bf16 %v2934_v15, %v2934_v15  ;;  %v5118_v24 = vpack.c.bf16 %v3062_v16, %v3062_v16  ;;  %v2935_v25 = vmax.f32 %v2679_v17, 0.0  ;;  %v3063_v26 = vmax.f32 %v2807_v18, 0.0  ;;  %v5385_v9 = vpop.f32.mrb[44].mxu0  ;;  %v5513_v10 = vpop.f32.mrb[44].mxu1 }
 0x135   :  { %v4988_v27 = vpack.c.bf16 %v2932_v19, %v2932_v19  ;;  %v5116_v28 = vpack.c.bf16 %v3060_v20, %v3060_v20  ;;  %v2933_v29 = vmax.f32 %v2677_v21, 0.0  ;;  %v3061_v51 = vmax.f32 %v2805_v22, 0.0  ;;  %v1523_v15 = vpop.f32.mrb[45].mxu0  ;;  %v2035_v16 = vpop.f32.mrb[45].mxu1 }
 0x136   :  { %4215 = vst.msk [vmem:[%s7842_s4 + $0x98] sm:$0xf] %vm4176_vm3, %v4990_v23  ;;  %4343 = vst.msk [vmem:[%s7842_s4 + $0x298] sm:$0xf] %vm4176_vm3, %v5118_v24  ;;  %v4991_v53 = vpack.c.bf16 %v2935_v25, %v2935_v25  ;;  %v5119_v32 = vpack.c.bf16 %v3063_v26, %v3063_v26  ;;  %v2419_v34 = vmul.f32 %v6741_v33, %v5381_v30  ;;  %v5386_v21 = vpop.f32.mrb[46].mxu0  ;;  %v5514_v22 = vpop.f32.mrb[46].mxu1 }
 0x137   :  { %v2547_v35 = vmul.f32 %v6741_v33, %v5509_v31  ;;  %4213 = vst.msk [vmem:[%s7842_s4 + $0x90] sm:$0xf] %vm4176_vm3, %v4988_v27  ;;  %4341 = vst.msk [vmem:[%s7842_s4 + $0x290] sm:$0xf] %vm4176_vm3, %v5116_v28  ;;  %v4989_v38 = vpack.c.bf16 %v2933_v29, %v2933_v29  ;;  %v5117_v39 = vpack.c.bf16 %v3061_v51, %v3061_v51  ;;  %v1526_v27 = vpop.f32.mrb[47].mxu0  ;;  %v2038_v28 = vpop.f32.mrb[47].mxu1 }
 0x138   :  { %v2417_v40 = vmul.f32 %v6741_v33, %v1507_v36  ;;  %v2545_v41 = vmul.f32 %v6741_v33, %v2019_v37  ;;  %4216 = vst.msk [vmem:[%s7842_s4 + $0x9c] sm:$0xf] %vm4176_vm3, %v4991_v53  ;;  %4344 = vst.msk [vmem:[%s7842_s4 + $0x29c] sm:$0xf] %vm4176_vm3, %v5119_v32  ;;  %v2682_v45 = vadd.f32 %v6766_v44, %v2419_v34 }
 0x139   :  { %v2810_v46 = vadd.f32 %v6766_v44, %v2547_v35  ;;  %v2420_v47 = vmul.f32 %v6741_v33, %v5382_v42  ;;  %v2548_v48 = vmul.f32 %v6741_v33, %v5510_v43  ;;  %4214 = vst.msk [vmem:[%s7842_s4 + $0x94] sm:$0xf] %vm4176_vm3, %v4989_v38  ;;  %4342 = vst.msk [vmem:[%s7842_s4 + $0x294] sm:$0xf] %vm4176_vm3, %v5117_v39 }
 0x13a   :  { %v2680_v52 = vadd.f32 %v6766_v44, %v2417_v40  ;;  %v2808_v54 = vadd.f32 %v6766_v44, %v2545_v41  ;;  %v2418_v55 = vmul.f32 %v6741_v33, %v1510_v49  ;;  %v2546_v56 = vmul.f32 %v6741_v33, %v2022_v50 }
 0x13b   :  { %v2938_v57 = vmax.f32 %v2682_v45, 0.0  ;;  %v3066_v58 = vmax.f32 %v2810_v46, 0.0  ;;  %v2683_v59 = vadd.f32 %v6766_v44, %v2420_v47  ;;  %v2811_v60 = vadd.f32 %v6766_v44, %v2548_v48 }
 0x13c   :  { %v2936_v61 = vmax.f32 %v2680_v52, 0.0  ;;  %v3064_v62 = vmax.f32 %v2808_v54, 0.0  ;;  %v2681_v63 = vadd.f32 %v6766_v44, %v2418_v55  ;;  %v2809_v0 = vadd.f32 %v6766_v44, %v2546_v56  ;;  %v5389_v49 = vpop.f32.mrb[48].mxu0  ;;  %v5517_v50 = vpop.f32.mrb[48].mxu1 }
 0x13d   :  { %v4994_v1 = vpack.c.bf16 %v2938_v57, %v2938_v57  ;;  %v5122_v2 = vpack.c.bf16 %v3066_v58, %v3066_v58  ;;  %v2939_v3 = vmax.f32 %v2683_v59, 0.0  ;;  %v3067_v4 = vmax.f32 %v2811_v60, 0.0  ;;  %v1539_v57 = vpop.f32.mrb[49].mxu0  ;;  %v2051_v58 = vpop.f32.mrb[49].mxu1 }
 0x13e   :  { %v4992_v5 = vpack.c.bf16 %v2936_v61, %v2936_v61  ;;  %v5120_v6 = vpack.c.bf16 %v3064_v62, %v3064_v62  ;;  %v2937_v7 = vmax.f32 %v2681_v63, 0.0  ;;  %v3065_v8 = vmax.f32 %v2809_v0, 0.0  ;;  %v5390_v63 = vpop.f32.mrb[50].mxu0  ;;  %v5518_v0 = vpop.f32.mrb[50].mxu1 }
 0x13f   :  { %4219 = vst.msk [vmem:[%s7842_s4 + $0xa8] sm:$0xf] %vm4176_vm3, %v4994_v1  ;;  %4347 = vst.msk [vmem:[%s7842_s4 + $0x2a8] sm:$0xf] %vm4176_vm3, %v5122_v2  ;;  %v4995_v11 = vpack.c.bf16 %v2939_v3, %v2939_v3  ;;  %v5123_v12 = vpack.c.bf16 %v3067_v4, %v3067_v4  ;;  %v2423_v13 = vmul.f32 %v6741_v33, %v5385_v9 }
 0x140   :  { %v2551_v14 = vmul.f32 %v6741_v33, %v5513_v10  ;;  %4217 = vst.msk [vmem:[%s7842_s4 + $0xa0] sm:$0xf] %vm4176_vm3, %v4992_v5  ;;  %4345 = vst.msk [vmem:[%s7842_s4 + $0x2a0] sm:$0xf] %vm4176_vm3, %v5120_v6  ;;  %v4993_v17 = vpack.c.bf16 %v2937_v7, %v2937_v7  ;;  %v5121_v18 = vpack.c.bf16 %v3065_v8, %v3065_v8  ;;  %v1542_v5 = vpop.f32.mrb[51].mxu0  ;;  %v2054_v6 = vpop.f32.mrb[51].mxu1 }
 0x141   :  { %v2421_v19 = vmul.f32 %v6741_v33, %v1523_v15  ;;  %v2549_v20 = vmul.f32 %v6741_v33, %v2035_v16  ;;  %4220 = vst.msk [vmem:[%s7842_s4 + $0xac] sm:$0xf] %vm4176_vm3, %v4995_v11  ;;  %4348 = vst.msk [vmem:[%s7842_s4 + $0x2ac] sm:$0xf] %vm4176_vm3, %v5123_v12  ;;  %v2686_v23 = vadd.f32 %v6766_v44, %v2423_v13 }
 0x142   :  { %v2814_v24 = vadd.f32 %v6766_v44, %v2551_v14  ;;  %v2424_v25 = vmul.f32 %v6741_v33, %v5386_v21  ;;  %v2552_v26 = vmul.f32 %v6741_v33, %v5514_v22  ;;  %4218 = vst.msk [vmem:[%s7842_s4 + $0xa4] sm:$0xf] %vm4176_vm3, %v4993_v17  ;;  %4346 = vst.msk [vmem:[%s7842_s4 + $0x2a4] sm:$0xf] %vm4176_vm3, %v5121_v18 }
 0x143   :  { %v2684_v29 = vadd.f32 %v6766_v44, %v2421_v19  ;;  %v2812_v51 = vadd.f32 %v6766_v44, %v2549_v20  ;;  %v2422_v30 = vmul.f32 %v6741_v33, %v1526_v27  ;;  %v2550_v31 = vmul.f32 %v6741_v33, %v2038_v28 }
 0x144   :  { %v2942_v53 = vmax.f32 %v2686_v23, 0.0  ;;  %v3070_v32 = vmax.f32 %v2814_v24, 0.0  ;;  %v2687_v34 = vadd.f32 %v6766_v44, %v2424_v25  ;;  %v2815_v35 = vadd.f32 %v6766_v44, %v2552_v26  ;;  %v5393_v27 = vpop.f32.mrb[52].mxu0  ;;  %v5521_v28 = vpop.f32.mrb[52].mxu1 }
 0x145   :  { %v2940_v36 = vmax.f32 %v2684_v29, 0.0  ;;  %v3068_v37 = vmax.f32 %v2812_v51, 0.0  ;;  %v2685_v38 = vadd.f32 %v6766_v44, %v2422_v30  ;;  %v2813_v39 = vadd.f32 %v6766_v44, %v2550_v31 }
 0x146   :  { %v4998_v40 = vpack.c.bf16 %v2942_v53, %v2942_v53  ;;  %v5126_v41 = vpack.c.bf16 %v3070_v32, %v3070_v32  ;;  %v2943_v42 = vmax.f32 %v2687_v34, 0.0  ;;  %v3071_v43 = vmax.f32 %v2815_v35, 0.0  ;;  %v1555_v53 = vpop.f32.mrb[53].mxu0  ;;  %v2067_v32 = vpop.f32.mrb[53].mxu1 }
 0x147   :  { %v4996_v45 = vpack.c.bf16 %v2940_v36, %v2940_v36  ;;  %v5124_v46 = vpack.c.bf16 %v3068_v37, %v3068_v37  ;;  %v2941_v47 = vmax.f32 %v2685_v38, 0.0  ;;  %v3069_v48 = vmax.f32 %v2813_v39, 0.0  ;;  %v5394_v38 = vpop.f32.mrb[54].mxu0  ;;  %v5522_v39 = vpop.f32.mrb[54].mxu1 }
 0x148   :  { %4223 = vst.msk [vmem:[%s7842_s4 + $0xb8] sm:$0xf] %vm4176_vm3, %v4998_v40  ;;  %4351 = vst.msk [vmem:[%s7842_s4 + $0x2b8] sm:$0xf] %vm4176_vm3, %v5126_v41  ;;  %v4999_v52 = vpack.c.bf16 %v2943_v42, %v2943_v42  ;;  %v5127_v54 = vpack.c.bf16 %v3071_v43, %v3071_v43  ;;  %v2427_v55 = vmul.f32 %v6741_v33, %v5389_v49 }
 0x149   :  { %v2555_v56 = vmul.f32 %v6741_v33, %v5517_v50  ;;  %4221 = vst.msk [vmem:[%s7842_s4 + $0xb0] sm:$0xf] %vm4176_vm3, %v4996_v45  ;;  %4349 = vst.msk [vmem:[%s7842_s4 + $0x2b0] sm:$0xf] %vm4176_vm3, %v5124_v46  ;;  %v4997_v59 = vpack.c.bf16 %v2941_v47, %v2941_v47  ;;  %v5125_v60 = vpack.c.bf16 %v3069_v48, %v3069_v48  ;;  %v1558_v45 = vpop.f32.mrb[55].mxu0  ;;  %v2070_v46 = vpop.f32.mrb[55].mxu1 }
 0x14a   :  { %v2425_v61 = vmul.f32 %v6741_v33, %v1539_v57  ;;  %v2553_v62 = vmul.f32 %v6741_v33, %v2051_v58  ;;  %4224 = vst.msk [vmem:[%s7842_s4 + $0xbc] sm:$0xf] %vm4176_vm3, %v4999_v52  ;;  %4352 = vst.msk [vmem:[%s7842_s4 + $0x2bc] sm:$0xf] %vm4176_vm3, %v5127_v54  ;;  %v2690_v1 = vadd.f32 %v6766_v44, %v2427_v55 }
 0x14b   :  { %v2818_v2 = vadd.f32 %v6766_v44, %v2555_v56  ;;  %v2428_v3 = vmul.f32 %v6741_v33, %v5390_v63  ;;  %v2556_v4 = vmul.f32 %v6741_v33, %v5518_v0  ;;  %4222 = vst.msk [vmem:[%s7842_s4 + $0xb4] sm:$0xf] %vm4176_vm3, %v4997_v59  ;;  %4350 = vst.msk [vmem:[%s7842_s4 + $0x2b4] sm:$0xf] %vm4176_vm3, %v5125_v60 }
 0x14c   :  { %v2688_v7 = vadd.f32 %v6766_v44, %v2425_v61  ;;  %v2816_v8 = vadd.f32 %v6766_v44, %v2553_v62  ;;  %v2426_v9 = vmul.f32 %v6741_v33, %v1542_v5  ;;  %v2554_v10 = vmul.f32 %v6741_v33, %v2054_v6  ;;  %v5397_v5 = vpop.f32.mrb[56].mxu0  ;;  %v5525_v6 = vpop.f32.mrb[56].mxu1 }
 0x14d   :  { %v2946_v11 = vmax.f32 %v2690_v1, 0.0  ;;  %v3074_v12 = vmax.f32 %v2818_v2, 0.0  ;;  %v2691_v13 = vadd.f32 %v6766_v44, %v2428_v3  ;;  %v2819_v14 = vadd.f32 %v6766_v44, %v2556_v4 }
 0x14e   :  { %v2944_v15 = vmax.f32 %v2688_v7, 0.0  ;;  %v3072_v16 = vmax.f32 %v2816_v8, 0.0  ;;  %v2689_v17 = vadd.f32 %v6766_v44, %v2426_v9  ;;  %v2817_v18 = vadd.f32 %v6766_v44, %v2554_v10 }
 0x14f   :  { %v5002_v19 = vpack.c.bf16 %v2946_v11, %v2946_v11  ;;  %v5130_v20 = vpack.c.bf16 %v3074_v12, %v3074_v12  ;;  %v2947_v21 = vmax.f32 %v2691_v13, 0.0  ;;  %v3075_v22 = vmax.f32 %v2819_v14, 0.0  ;;  %v1571_v11 = vpop.f32.mrb[57].mxu0  ;;  %v2083_v12 = vpop.f32.mrb[57].mxu1 }
 0x150   :  { %v5000_v23 = vpack.c.bf16 %v2944_v15, %v2944_v15  ;;  %v5128_v24 = vpack.c.bf16 %v3072_v16, %v3072_v16  ;;  %v2945_v25 = vmax.f32 %v2689_v17, 0.0  ;;  %v3073_v26 = vmax.f32 %v2817_v18, 0.0  ;;  %v5398_v17 = vpop.f32.mrb[58].mxu0  ;;  %v5526_v18 = vpop.f32.mrb[58].mxu1 }
 0x151   :  { %4227 = vst.msk [vmem:[%s7842_s4 + $0xc8] sm:$0xf] %vm4176_vm3, %v5002_v19  ;;  %4355 = vst.msk [vmem:[%s7842_s4 + $0x2c8] sm:$0xf] %vm4176_vm3, %v5130_v20  ;;  %v5003_v29 = vpack.c.bf16 %v2947_v21, %v2947_v21  ;;  %v5131_v51 = vpack.c.bf16 %v3075_v22, %v3075_v22  ;;  %v2431_v30 = vmul.f32 %v6741_v33, %v5393_v27 }
 0x152   :  { %v2559_v31 = vmul.f32 %v6741_v33, %v5521_v28  ;;  %4225 = vst.msk [vmem:[%s7842_s4 + $0xc0] sm:$0xf] %vm4176_vm3, %v5000_v23  ;;  %4353 = vst.msk [vmem:[%s7842_s4 + $0x2c0] sm:$0xf] %vm4176_vm3, %v5128_v24  ;;  %v5001_v34 = vpack.c.bf16 %v2945_v25, %v2945_v25  ;;  %v5129_v35 = vpack.c.bf16 %v3073_v26, %v3073_v26  ;;  %v1574_v23 = vpop.f32.mrb[59].mxu0  ;;  %v2086_v24 = vpop.f32.mrb[59].mxu1 }
 0x153   :  { %v2429_v36 = vmul.f32 %v6741_v33, %v1555_v53  ;;  %v2557_v37 = vmul.f32 %v6741_v33, %v2067_v32  ;;  %4228 = vst.msk [vmem:[%s7842_s4 + $0xcc] sm:$0xf] %vm4176_vm3, %v5003_v29  ;;  %4356 = vst.msk [vmem:[%s7842_s4 + $0x2cc] sm:$0xf] %vm4176_vm3, %v5131_v51  ;;  %v2694_v40 = vadd.f32 %v6766_v44, %v2431_v30 }
 0x154   :  { %v2822_v41 = vadd.f32 %v6766_v44, %v2559_v31  ;;  %v2432_v42 = vmul.f32 %v6741_v33, %v5394_v38  ;;  %v2560_v43 = vmul.f32 %v6741_v33, %v5522_v39  ;;  %4226 = vst.msk [vmem:[%s7842_s4 + $0xc4] sm:$0xf] %vm4176_vm3, %v5001_v34  ;;  %4354 = vst.msk [vmem:[%s7842_s4 + $0x2c4] sm:$0xf] %vm4176_vm3, %v5129_v35 }
 0x155   :  { %v2692_v47 = vadd.f32 %v6766_v44, %v2429_v36  ;;  %v2820_v48 = vadd.f32 %v6766_v44, %v2557_v37  ;;  %v2430_v49 = vmul.f32 %v6741_v33, %v1558_v45  ;;  %v2558_v50 = vmul.f32 %v6741_v33, %v2070_v46  ;;  %v5401_v45 = vpop.f32.mrb[60].mxu0  ;;  %v5529_v46 = vpop.f32.mrb[60].mxu1 }
 0x156   :  { %v2950_v52 = vmax.f32 %v2694_v40, 0.0  ;;  %v3078_v54 = vmax.f32 %v2822_v41, 0.0  ;;  %v2695_v55 = vadd.f32 %v6766_v44, %v2432_v42  ;;  %v2823_v56 = vadd.f32 %v6766_v44, %v2560_v43 }
 0x157   :  { %v2948_v57 = vmax.f32 %v2692_v47, 0.0  ;;  %v3076_v58 = vmax.f32 %v2820_v48, 0.0  ;;  %v2693_v59 = vadd.f32 %v6766_v44, %v2430_v49  ;;  %v2821_v60 = vadd.f32 %v6766_v44, %v2558_v50 }
 0x158   :  { %v5006_v61 = vpack.c.bf16 %v2950_v52, %v2950_v52  ;;  %v5134_v62 = vpack.c.bf16 %v3078_v54, %v3078_v54  ;;  %v2951_v63 = vmax.f32 %v2695_v55, 0.0  ;;  %v3079_v0 = vmax.f32 %v2823_v56, 0.0  ;;  %v1587_v52 = vpop.f32.mrb[61].mxu0  ;;  %v2099_v54 = vpop.f32.mrb[61].mxu1 }
 0x159   :  { %v5004_v1 = vpack.c.bf16 %v2948_v57, %v2948_v57  ;;  %v5132_v2 = vpack.c.bf16 %v3076_v58, %v3076_v58  ;;  %v2949_v3 = vmax.f32 %v2693_v59, 0.0  ;;  %v3077_v4 = vmax.f32 %v2821_v60, 0.0  ;;  %v5402_v59 = vpop.f32.mrb[62].mxu0  ;;  %v5530_v60 = vpop.f32.mrb[62].mxu1 }
 0x15a   :  { %4231 = vst.msk [vmem:[%s7842_s4 + $0xd8] sm:$0xf] %vm4176_vm3, %v5006_v61  ;;  %4359 = vst.msk [vmem:[%s7842_s4 + $0x2d8] sm:$0xf] %vm4176_vm3, %v5134_v62  ;;  %v5007_v7 = vpack.c.bf16 %v2951_v63, %v2951_v63  ;;  %v5135_v8 = vpack.c.bf16 %v3079_v0, %v3079_v0  ;;  %v2435_v9 = vmul.f32 %v6741_v33, %v5397_v5 }
 0x15b   :  { %v2563_v10 = vmul.f32 %v6741_v33, %v5525_v6  ;;  %4229 = vst.msk [vmem:[%s7842_s4 + $0xd0] sm:$0xf] %vm4176_vm3, %v5004_v1  ;;  %4357 = vst.msk [vmem:[%s7842_s4 + $0x2d0] sm:$0xf] %vm4176_vm3, %v5132_v2  ;;  %v5005_v13 = vpack.c.bf16 %v2949_v3, %v2949_v3  ;;  %v5133_v14 = vpack.c.bf16 %v3077_v4, %v3077_v4  ;;  %v1590_v1 = vpop.f32.mrb[63].mxu0  ;;  %v2102_v2 = vpop.f32.mrb[63].mxu1 }
 0x15c   :  { %v2433_v15 = vmul.f32 %v6741_v33, %v1571_v11  ;;  %v2561_v16 = vmul.f32 %v6741_v33, %v2083_v12  ;;  %4232 = vst.msk [vmem:[%s7842_s4 + $0xdc] sm:$0xf] %vm4176_vm3, %v5007_v7  ;;  %4360 = vst.msk [vmem:[%s7842_s4 + $0x2dc] sm:$0xf] %vm4176_vm3, %v5135_v8  ;;  %v2698_v19 = vadd.f32 %v6766_v44, %v2435_v9 }
 0x15d   :  { %v2826_v20 = vadd.f32 %v6766_v44, %v2563_v10  ;;  %v2436_v21 = vmul.f32 %v6741_v33, %v5398_v17  ;;  %v2564_v22 = vmul.f32 %v6741_v33, %v5526_v18  ;;  %4230 = vst.msk [vmem:[%s7842_s4 + $0xd4] sm:$0xf] %vm4176_vm3, %v5005_v13  ;;  %4358 = vst.msk [vmem:[%s7842_s4 + $0x2d4] sm:$0xf] %vm4176_vm3, %v5133_v14 }
 0x15e   :  { %v2696_v25 = vadd.f32 %v6766_v44, %v2433_v15  ;;  %v2824_v26 = vadd.f32 %v6766_v44, %v2561_v16  ;;  %v2434_v27 = vmul.f32 %v6741_v33, %v1574_v23  ;;  %v2562_v28 = vmul.f32 %v6741_v33, %v2086_v24  ;;  %v5405_v23 = vpop.f32.mrb[64].mxu0  ;;  %v5533_v24 = vpop.f32.mrb[64].mxu1 }
 0x15f   :  { %v2954_v29 = vmax.f32 %v2698_v19, 0.0  ;;  %v3082_v51 = vmax.f32 %v2826_v20, 0.0  ;;  %v2699_v30 = vadd.f32 %v6766_v44, %v2436_v21  ;;  %v2827_v31 = vadd.f32 %v6766_v44, %v2564_v22 }
 0x160   :  { %v2952_v53 = vmax.f32 %v2696_v25, 0.0  ;;  %v3080_v32 = vmax.f32 %v2824_v26, 0.0  ;;  %v2697_v34 = vadd.f32 %v6766_v44, %v2434_v27  ;;  %v2825_v35 = vadd.f32 %v6766_v44, %v2562_v28 }
 0x161   :  { %v5010_v36 = vpack.c.bf16 %v2954_v29, %v2954_v29  ;;  %v5138_v37 = vpack.c.bf16 %v3082_v51, %v3082_v51  ;;  %v2955_v38 = vmax.f32 %v2699_v30, 0.0  ;;  %v3083_v39 = vmax.f32 %v2827_v31, 0.0  ;;  %v1603_v29 = vpop.f32.mrb[65].mxu0  ;;  %v2115_v51 = vpop.f32.mrb[65].mxu1 }
 0x162   :  { %v5008_v40 = vpack.c.bf16 %v2952_v53, %v2952_v53  ;;  %v5136_v41 = vpack.c.bf16 %v3080_v32, %v3080_v32  ;;  %v2953_v42 = vmax.f32 %v2697_v34, 0.0  ;;  %v3081_v43 = vmax.f32 %v2825_v35, 0.0  ;;  %v5406_v34 = vpop.f32.mrb[66].mxu0  ;;  %v5534_v35 = vpop.f32.mrb[66].mxu1 }
 0x163   :  { %4235 = vst.msk [vmem:[%s7842_s4 + $0xe8] sm:$0xf] %vm4176_vm3, %v5010_v36  ;;  %4363 = vst.msk [vmem:[%s7842_s4 + $0x2e8] sm:$0xf] %vm4176_vm3, %v5138_v37  ;;  %v5011_v47 = vpack.c.bf16 %v2955_v38, %v2955_v38  ;;  %v5139_v48 = vpack.c.bf16 %v3083_v39, %v3083_v39  ;;  %v2439_v49 = vmul.f32 %v6741_v33, %v5401_v45 }
 0x164   :  { %v2567_v50 = vmul.f32 %v6741_v33, %v5529_v46  ;;  %4233 = vst.msk [vmem:[%s7842_s4 + $0xe0] sm:$0xf] %vm4176_vm3, %v5008_v40  ;;  %4361 = vst.msk [vmem:[%s7842_s4 + $0x2e0] sm:$0xf] %vm4176_vm3, %v5136_v41  ;;  %v5009_v55 = vpack.c.bf16 %v2953_v42, %v2953_v42  ;;  %v5137_v56 = vpack.c.bf16 %v3081_v43, %v3081_v43  ;;  %v1606_v40 = vpop.f32.mrb[67].mxu0  ;;  %v2118_v41 = vpop.f32.mrb[67].mxu1 }
 0x165   :  { %v2437_v57 = vmul.f32 %v6741_v33, %v1587_v52  ;;  %v2565_v58 = vmul.f32 %v6741_v33, %v2099_v54  ;;  %4236 = vst.msk [vmem:[%s7842_s4 + $0xec] sm:$0xf] %vm4176_vm3, %v5011_v47  ;;  %4364 = vst.msk [vmem:[%s7842_s4 + $0x2ec] sm:$0xf] %vm4176_vm3, %v5139_v48  ;;  %v2702_v61 = vadd.f32 %v6766_v44, %v2439_v49 }
 0x166   :  { %v2830_v62 = vadd.f32 %v6766_v44, %v2567_v50  ;;  %v2440_v63 = vmul.f32 %v6741_v33, %v5402_v59  ;;  %v2568_v0 = vmul.f32 %v6741_v33, %v5530_v60  ;;  %4234 = vst.msk [vmem:[%s7842_s4 + $0xe4] sm:$0xf] %vm4176_vm3, %v5009_v55  ;;  %4362 = vst.msk [vmem:[%s7842_s4 + $0x2e4] sm:$0xf] %vm4176_vm3, %v5137_v56 }
 0x167   :  { %v2700_v3 = vadd.f32 %v6766_v44, %v2437_v57  ;;  %v2828_v4 = vadd.f32 %v6766_v44, %v2565_v58  ;;  %v2438_v5 = vmul.f32 %v6741_v33, %v1590_v1  ;;  %v2566_v6 = vmul.f32 %v6741_v33, %v2102_v2  ;;  %v5409_v1 = vpop.f32.mrb[68].mxu0  ;;  %v5537_v2 = vpop.f32.mrb[68].mxu1 }
 0x168   :  { %v2958_v7 = vmax.f32 %v2702_v61, 0.0  ;;  %v3086_v8 = vmax.f32 %v2830_v62, 0.0  ;;  %v2703_v9 = vadd.f32 %v6766_v44, %v2440_v63  ;;  %v2831_v10 = vadd.f32 %v6766_v44, %v2568_v0 }
 0x169   :  { %v2956_v11 = vmax.f32 %v2700_v3, 0.0  ;;  %v3084_v12 = vmax.f32 %v2828_v4, 0.0  ;;  %v2701_v13 = vadd.f32 %v6766_v44, %v2438_v5  ;;  %v2829_v14 = vadd.f32 %v6766_v44, %v2566_v6 }
 0x16a   :  { %v5014_v15 = vpack.c.bf16 %v2958_v7, %v2958_v7  ;;  %v5142_v16 = vpack.c.bf16 %v3086_v8, %v3086_v8  ;;  %v2959_v17 = vmax.f32 %v2703_v9, 0.0  ;;  %v3087_v18 = vmax.f32 %v2831_v10, 0.0  ;;  %v1619_v7 = vpop.f32.mrb[69].mxu0  ;;  %v2131_v8 = vpop.f32.mrb[69].mxu1 }
 0x16b   :  { %v5012_v19 = vpack.c.bf16 %v2956_v11, %v2956_v11  ;;  %v5140_v20 = vpack.c.bf16 %v3084_v12, %v3084_v12  ;;  %v2957_v21 = vmax.f32 %v2701_v13, 0.0  ;;  %v3085_v22 = vmax.f32 %v2829_v14, 0.0  ;;  %v5410_v13 = vpop.f32.mrb[70].mxu0  ;;  %v5538_v14 = vpop.f32.mrb[70].mxu1 }
 0x16c   :  { %4239 = vst.msk [vmem:[%s7842_s4 + $0xf8] sm:$0xf] %vm4176_vm3, %v5014_v15  ;;  %4367 = vst.msk [vmem:[%s7842_s4 + $0x2f8] sm:$0xf] %vm4176_vm3, %v5142_v16  ;;  %v5015_v25 = vpack.c.bf16 %v2959_v17, %v2959_v17  ;;  %v5143_v26 = vpack.c.bf16 %v3087_v18, %v3087_v18  ;;  %v2443_v27 = vmul.f32 %v6741_v33, %v5405_v23 }
 0x16d   :  { %v2571_v28 = vmul.f32 %v6741_v33, %v5533_v24  ;;  %4237 = vst.msk [vmem:[%s7842_s4 + $0xf0] sm:$0xf] %vm4176_vm3, %v5012_v19  ;;  %4365 = vst.msk [vmem:[%s7842_s4 + $0x2f0] sm:$0xf] %vm4176_vm3, %v5140_v20  ;;  %v5013_v30 = vpack.c.bf16 %v2957_v21, %v2957_v21  ;;  %v5141_v31 = vpack.c.bf16 %v3085_v22, %v3085_v22  ;;  %v1622_v19 = vpop.f32.mrb[71].mxu0  ;;  %v2134_v20 = vpop.f32.mrb[71].mxu1 }
 0x16e   :  { %v2441_v53 = vmul.f32 %v6741_v33, %v1603_v29  ;;  %v2569_v32 = vmul.f32 %v6741_v33, %v2115_v51  ;;  %4240 = vst.msk [vmem:[%s7842_s4 + $0xfc] sm:$0xf] %vm4176_vm3, %v5015_v25  ;;  %4368 = vst.msk [vmem:[%s7842_s4 + $0x2fc] sm:$0xf] %vm4176_vm3, %v5143_v26  ;;  %v2706_v36 = vadd.f32 %v6766_v44, %v2443_v27 }
 0x16f   :  { %v2834_v37 = vadd.f32 %v6766_v44, %v2571_v28  ;;  %v2444_v38 = vmul.f32 %v6741_v33, %v5406_v34  ;;  %v2572_v39 = vmul.f32 %v6741_v33, %v5534_v35  ;;  %4238 = vst.msk [vmem:[%s7842_s4 + $0xf4] sm:$0xf] %vm4176_vm3, %v5013_v30  ;;  %4366 = vst.msk [vmem:[%s7842_s4 + $0x2f4] sm:$0xf] %vm4176_vm3, %v5141_v31 }
 0x170   :  { %v2704_v42 = vadd.f32 %v6766_v44, %v2441_v53  ;;  %v2832_v43 = vadd.f32 %v6766_v44, %v2569_v32  ;;  %v2442_v45 = vmul.f32 %v6741_v33, %v1606_v40  ;;  %v2570_v46 = vmul.f32 %v6741_v33, %v2118_v41  ;;  %v5413_v40 = vpop.f32.mrb[72].mxu0  ;;  %v5541_v41 = vpop.f32.mrb[72].mxu1 }
 0x171   :  { %v2962_v47 = vmax.f32 %v2706_v36, 0.0  ;;  %v3090_v48 = vmax.f32 %v2834_v37, 0.0  ;;  %v2707_v49 = vadd.f32 %v6766_v44, %v2444_v38  ;;  %v2835_v50 = vadd.f32 %v6766_v44, %v2572_v39 }
 0x172   :  { %v2960_v52 = vmax.f32 %v2704_v42, 0.0  ;;  %v3088_v54 = vmax.f32 %v2832_v43, 0.0  ;;  %v2705_v55 = vadd.f32 %v6766_v44, %v2442_v45  ;;  %v2833_v56 = vadd.f32 %v6766_v44, %v2570_v46 }
 0x173   :  { %v5018_v57 = vpack.c.bf16 %v2962_v47, %v2962_v47  ;;  %v5146_v58 = vpack.c.bf16 %v3090_v48, %v3090_v48  ;;  %v2963_v59 = vmax.f32 %v2707_v49, 0.0  ;;  %v3091_v60 = vmax.f32 %v2835_v50, 0.0  ;;  %v1635_v47 = vpop.f32.mrb[73].mxu0  ;;  %v2147_v48 = vpop.f32.mrb[73].mxu1 }
 0x174   :  { %v5016_v61 = vpack.c.bf16 %v2960_v52, %v2960_v52  ;;  %v5144_v62 = vpack.c.bf16 %v3088_v54, %v3088_v54  ;;  %v2961_v63 = vmax.f32 %v2705_v55, 0.0  ;;  %v3089_v0 = vmax.f32 %v2833_v56, 0.0  ;;  %v5414_v55 = vpop.f32.mrb[74].mxu0  ;;  %v5542_v56 = vpop.f32.mrb[74].mxu1 }
 0x175   :  { %4243 = vst.msk [vmem:[%s7842_s4 + $0x108] sm:$0xf] %vm4176_vm3, %v5018_v57  ;;  %4371 = vst.msk [vmem:[%s7842_s4 + $0x308] sm:$0xf] %vm4176_vm3, %v5146_v58  ;;  %v5019_v3 = vpack.c.bf16 %v2963_v59, %v2963_v59  ;;  %v5147_v4 = vpack.c.bf16 %v3091_v60, %v3091_v60  ;;  %v2447_v5 = vmul.f32 %v6741_v33, %v5409_v1 }
 0x176   :  { %v2575_v6 = vmul.f32 %v6741_v33, %v5537_v2  ;;  %4241 = vst.msk [vmem:[%s7842_s4 + $0x100] sm:$0xf] %vm4176_vm3, %v5016_v61  ;;  %4369 = vst.msk [vmem:[%s7842_s4 + $0x300] sm:$0xf] %vm4176_vm3, %v5144_v62  ;;  %v5017_v9 = vpack.c.bf16 %v2961_v63, %v2961_v63  ;;  %v5145_v10 = vpack.c.bf16 %v3089_v0, %v3089_v0  ;;  %v1638_v61 = vpop.f32.mrb[75].mxu0  ;;  %v2150_v62 = vpop.f32.mrb[75].mxu1 }
 0x177   :  { %v2445_v11 = vmul.f32 %v6741_v33, %v1619_v7  ;;  %v2573_v12 = vmul.f32 %v6741_v33, %v2131_v8  ;;  %4244 = vst.msk [vmem:[%s7842_s4 + $0x10c] sm:$0xf] %vm4176_vm3, %v5019_v3  ;;  %4372 = vst.msk [vmem:[%s7842_s4 + $0x30c] sm:$0xf] %vm4176_vm3, %v5147_v4  ;;  %v2710_v15 = vadd.f32 %v6766_v44, %v2447_v5 }
 0x178   :  { %v2838_v16 = vadd.f32 %v6766_v44, %v2575_v6  ;;  %v2448_v17 = vmul.f32 %v6741_v33, %v5410_v13  ;;  %v2576_v18 = vmul.f32 %v6741_v33, %v5538_v14  ;;  %4242 = vst.msk [vmem:[%s7842_s4 + $0x104] sm:$0xf] %vm4176_vm3, %v5017_v9  ;;  %4370 = vst.msk [vmem:[%s7842_s4 + $0x304] sm:$0xf] %vm4176_vm3, %v5145_v10 }
 0x179   :  { %v2708_v21 = vadd.f32 %v6766_v44, %v2445_v11  ;;  %v2836_v22 = vadd.f32 %v6766_v44, %v2573_v12  ;;  %v2446_v23 = vmul.f32 %v6741_v33, %v1622_v19  ;;  %v2574_v24 = vmul.f32 %v6741_v33, %v2134_v20  ;;  %v5417_v19 = vpop.f32.mrb[76].mxu0  ;;  %v5545_v20 = vpop.f32.mrb[76].mxu1 }
 0x17a   :  { %v2966_v25 = vmax.f32 %v2710_v15, 0.0  ;;  %v3094_v26 = vmax.f32 %v2838_v16, 0.0  ;;  %v2711_v27 = vadd.f32 %v6766_v44, %v2448_v17  ;;  %v2839_v28 = vadd.f32 %v6766_v44, %v2576_v18 }
 0x17b   :  { %v2964_v29 = vmax.f32 %v2708_v21, 0.0  ;;  %v3092_v51 = vmax.f32 %v2836_v22, 0.0  ;;  %v2709_v30 = vadd.f32 %v6766_v44, %v2446_v23  ;;  %v2837_v31 = vadd.f32 %v6766_v44, %v2574_v24 }
 0x17c   :  { %v5022_v53 = vpack.c.bf16 %v2966_v25, %v2966_v25  ;;  %v5150_v32 = vpack.c.bf16 %v3094_v26, %v3094_v26  ;;  %v2967_v34 = vmax.f32 %v2711_v27, 0.0  ;;  %v3095_v35 = vmax.f32 %v2839_v28, 0.0  ;;  %v1651_v25 = vpop.f32.mrb[77].mxu0  ;;  %v2163_v26 = vpop.f32.mrb[77].mxu1 }
 0x17d   :  { %v5020_v36 = vpack.c.bf16 %v2964_v29, %v2964_v29  ;;  %v5148_v37 = vpack.c.bf16 %v3092_v51, %v3092_v51  ;;  %v2965_v38 = vmax.f32 %v2709_v30, 0.0  ;;  %v3093_v39 = vmax.f32 %v2837_v31, 0.0  ;;  %v5418_v30 = vpop.f32.mrb[78].mxu0  ;;  %v5546_v31 = vpop.f32.mrb[78].mxu1 }
 0x17e   :  { %4247 = vst.msk [vmem:[%s7842_s4 + $0x118] sm:$0xf] %vm4176_vm3, %v5022_v53  ;;  %4375 = vst.msk [vmem:[%s7842_s4 + $0x318] sm:$0xf] %vm4176_vm3, %v5150_v32  ;;  %v5023_v42 = vpack.c.bf16 %v2967_v34, %v2967_v34  ;;  %v5151_v43 = vpack.c.bf16 %v3095_v35, %v3095_v35  ;;  %v2451_v45 = vmul.f32 %v6741_v33, %v5413_v40 }
 0x17f   :  { %v2579_v46 = vmul.f32 %v6741_v33, %v5541_v41  ;;  %4245 = vst.msk [vmem:[%s7842_s4 + $0x110] sm:$0xf] %vm4176_vm3, %v5020_v36  ;;  %4373 = vst.msk [vmem:[%s7842_s4 + $0x310] sm:$0xf] %vm4176_vm3, %v5148_v37  ;;  %v5021_v49 = vpack.c.bf16 %v2965_v38, %v2965_v38  ;;  %v5149_v50 = vpack.c.bf16 %v3093_v39, %v3093_v39  ;;  %v1654_v36 = vpop.f32.mrb[79].mxu0  ;;  %v2166_v37 = vpop.f32.mrb[79].mxu1 }
 0x180   :  { %v2449_v52 = vmul.f32 %v6741_v33, %v1635_v47  ;;  %v2577_v54 = vmul.f32 %v6741_v33, %v2147_v48  ;;  %4248 = vst.msk [vmem:[%s7842_s4 + $0x11c] sm:$0xf] %vm4176_vm3, %v5023_v42  ;;  %4376 = vst.msk [vmem:[%s7842_s4 + $0x31c] sm:$0xf] %vm4176_vm3, %v5151_v43  ;;  %v2714_v57 = vadd.f32 %v6766_v44, %v2451_v45 }
 0x181   :  { %v2842_v58 = vadd.f32 %v6766_v44, %v2579_v46  ;;  %v2452_v59 = vmul.f32 %v6741_v33, %v5414_v55  ;;  %v2580_v60 = vmul.f32 %v6741_v33, %v5542_v56  ;;  %4246 = vst.msk [vmem:[%s7842_s4 + $0x114] sm:$0xf] %vm4176_vm3, %v5021_v49  ;;  %4374 = vst.msk [vmem:[%s7842_s4 + $0x314] sm:$0xf] %vm4176_vm3, %v5149_v50 }
 0x182   :  { %v2712_v63 = vadd.f32 %v6766_v44, %v2449_v52  ;;  %v2840_v0 = vadd.f32 %v6766_v44, %v2577_v54  ;;  %v2450_v1 = vmul.f32 %v6741_v33, %v1638_v61  ;;  %v2578_v2 = vmul.f32 %v6741_v33, %v2150_v62  ;;  %v5421_v61 = vpop.f32.mrb[80].mxu0  ;;  %v5549_v62 = vpop.f32.mrb[80].mxu1 }
 0x183   :  { %v2970_v3 = vmax.f32 %v2714_v57, 0.0  ;;  %v3098_v4 = vmax.f32 %v2842_v58, 0.0  ;;  %v2715_v5 = vadd.f32 %v6766_v44, %v2452_v59  ;;  %v2843_v6 = vadd.f32 %v6766_v44, %v2580_v60 }
 0x184   :  { %v2968_v7 = vmax.f32 %v2712_v63, 0.0  ;;  %v3096_v8 = vmax.f32 %v2840_v0, 0.0  ;;  %v2713_v9 = vadd.f32 %v6766_v44, %v2450_v1  ;;  %v2841_v10 = vadd.f32 %v6766_v44, %v2578_v2 }
 0x185   :  { %v5026_v11 = vpack.c.bf16 %v2970_v3, %v2970_v3  ;;  %v5154_v12 = vpack.c.bf16 %v3098_v4, %v3098_v4  ;;  %v2971_v13 = vmax.f32 %v2715_v5, 0.0  ;;  %v3099_v14 = vmax.f32 %v2843_v6, 0.0  ;;  %v1667_v3 = vpop.f32.mrb[81].mxu0  ;;  %v2179_v4 = vpop.f32.mrb[81].mxu1 }
 0x186   :  { %v5024_v15 = vpack.c.bf16 %v2968_v7, %v2968_v7  ;;  %v5152_v16 = vpack.c.bf16 %v3096_v8, %v3096_v8  ;;  %v2969_v17 = vmax.f32 %v2713_v9, 0.0  ;;  %v3097_v18 = vmax.f32 %v2841_v10, 0.0  ;;  %v5422_v9 = vpop.f32.mrb[82].mxu0  ;;  %v5550_v10 = vpop.f32.mrb[82].mxu1 }
 0x187   :  { %4251 = vst.msk [vmem:[%s7842_s4 + $0x128] sm:$0xf] %vm4176_vm3, %v5026_v11  ;;  %4379 = vst.msk [vmem:[%s7842_s4 + $0x328] sm:$0xf] %vm4176_vm3, %v5154_v12  ;;  %v5027_v21 = vpack.c.bf16 %v2971_v13, %v2971_v13  ;;  %v5155_v22 = vpack.c.bf16 %v3099_v14, %v3099_v14  ;;  %v2455_v23 = vmul.f32 %v6741_v33, %v5417_v19 }
 0x188   :  { %v2583_v24 = vmul.f32 %v6741_v33, %v5545_v20  ;;  %4249 = vst.msk [vmem:[%s7842_s4 + $0x120] sm:$0xf] %vm4176_vm3, %v5024_v15  ;;  %4377 = vst.msk [vmem:[%s7842_s4 + $0x320] sm:$0xf] %vm4176_vm3, %v5152_v16  ;;  %v5025_v27 = vpack.c.bf16 %v2969_v17, %v2969_v17  ;;  %v5153_v28 = vpack.c.bf16 %v3097_v18, %v3097_v18  ;;  %v1670_v15 = vpop.f32.mrb[83].mxu0  ;;  %v2182_v16 = vpop.f32.mrb[83].mxu1 }
 0x189   :  { %v2453_v29 = vmul.f32 %v6741_v33, %v1651_v25  ;;  %v2581_v51 = vmul.f32 %v6741_v33, %v2163_v26  ;;  %4252 = vst.msk [vmem:[%s7842_s4 + $0x12c] sm:$0xf] %vm4176_vm3, %v5027_v21  ;;  %4380 = vst.msk [vmem:[%s7842_s4 + $0x32c] sm:$0xf] %vm4176_vm3, %v5155_v22  ;;  %v2718_v53 = vadd.f32 %v6766_v44, %v2455_v23 }
 0x18a   :  { %v2846_v32 = vadd.f32 %v6766_v44, %v2583_v24  ;;  %v2456_v34 = vmul.f32 %v6741_v33, %v5418_v30  ;;  %v2584_v35 = vmul.f32 %v6741_v33, %v5546_v31  ;;  %4250 = vst.msk [vmem:[%s7842_s4 + $0x124] sm:$0xf] %vm4176_vm3, %v5025_v27  ;;  %4378 = vst.msk [vmem:[%s7842_s4 + $0x324] sm:$0xf] %vm4176_vm3, %v5153_v28 }
 0x18b   :  { %v2716_v38 = vadd.f32 %v6766_v44, %v2453_v29  ;;  %v2844_v39 = vadd.f32 %v6766_v44, %v2581_v51  ;;  %v2454_v40 = vmul.f32 %v6741_v33, %v1654_v36  ;;  %v2582_v41 = vmul.f32 %v6741_v33, %v2166_v37  ;;  %v5553_v36 = vpop.f32.mrb[84].mxu1 }
 0x18c   :  { %v2974_v42 = vmax.f32 %v2718_v53, 0.0  ;;  %v3102_v43 = vmax.f32 %v2846_v32, 0.0  ;;  %v2719_v45 = vadd.f32 %v6766_v44, %v2456_v34  ;;  %v2847_v46 = vadd.f32 %v6766_v44, %v2584_v35  ;;  %v5425_v35 = vpop.f32.mrb[84].mxu0 }
 0x18d   :  { %v2972_v47 = vmax.f32 %v2716_v38, 0.0  ;;  %v3100_v48 = vmax.f32 %v2844_v39, 0.0  ;;  %v2717_v49 = vadd.f32 %v6766_v44, %v2454_v40  ;;  %v2845_v50 = vadd.f32 %v6766_v44, %v2582_v41  ;;  %v7279_v38 = vld [vmem:[%s7840_s2] ss:$0 sm:$0xff]  ;;  %v1683_v41 = vpop.f32.mrb[85].mxu0 }
 0x18e   :  { %v5030_v52 = vpack.c.bf16 %v2974_v42, %v2974_v42  ;;  %v5158_v54 = vpack.c.bf16 %v3102_v43, %v3102_v43  ;;  %v2975_v55 = vmax.f32 %v2719_v45, 0.0  ;;  %v3103_v56 = vmax.f32 %v2847_v46, 0.0  ;;  %v2195_v42 = vpop.f32.mrb[85].mxu1 }
 0x18f   :  { %v5028_v57 = vpack.c.bf16 %v2972_v47, %v2972_v47  ;;  %v5156_v58 = vpack.c.bf16 %v3100_v48, %v3100_v48  ;;  %v2973_v59 = vmax.f32 %v2717_v49, 0.0  ;;  %v3101_v60 = vmax.f32 %v2845_v50, 0.0  ;;  %v5426_v48 = vpop.f32.mrb[86].mxu0  ;;  %v5554_v49 = vpop.f32.mrb[86].mxu1  ;;  %v7304_v50 = vld [vmem:[%s7841_s3] ss:$0 sm:$0xff] }
 0x190   :  { %4255 = vst.msk [vmem:[%s7842_s4 + $0x138] sm:$0xf] %vm4176_vm3, %v5030_v52  ;;  %4383 = vst.msk [vmem:[%s7842_s4 + $0x338] sm:$0xf] %vm4176_vm3, %v5158_v54  ;;  %v5031_v63 = vpack.c.bf16 %v2975_v55, %v2975_v55  ;;  %v5159_v0 = vpack.c.bf16 %v3103_v56, %v3103_v56  ;;  %v2459_v1 = vmul.f32 %v6741_v33, %v5421_v61 }
 0x191   :  { %v2587_v2 = vmul.f32 %v6741_v33, %v5549_v62  ;;  %4253 = vst.msk [vmem:[%s7842_s4 + $0x130] sm:$0xf] %vm4176_vm3, %v5028_v57  ;;  %4381 = vst.msk [vmem:[%s7842_s4 + $0x330] sm:$0xf] %vm4176_vm3, %v5156_v58  ;;  %v5029_v5 = vpack.c.bf16 %v2973_v59, %v2973_v59  ;;  %v5157_v6 = vpack.c.bf16 %v3101_v60, %v3101_v60  ;;  %v1686_v57 = vpop.f32.mrb[87].mxu0  ;;  %v2198_v58 = vpop.f32.mrb[87].mxu1 }
 0x192   :  { %v2457_v7 = vmul.f32 %v6741_v33, %v1667_v3  ;;  %v2585_v8 = vmul.f32 %v6741_v33, %v2179_v4  ;;  %4256 = vst.msk [vmem:[%s7842_s4 + $0x13c] sm:$0xf] %vm4176_vm3, %v5031_v63  ;;  %4384 = vst.msk [vmem:[%s7842_s4 + $0x33c] sm:$0xf] %vm4176_vm3, %v5159_v0  ;;  %v2722_v11 = vadd.f32 %v6766_v44, %v2459_v1 }
 0x193   :  { %v2850_v12 = vadd.f32 %v6766_v44, %v2587_v2  ;;  %v2460_v13 = vmul.f32 %v6741_v33, %v5422_v9  ;;  %v2588_v14 = vmul.f32 %v6741_v33, %v5550_v10  ;;  %4254 = vst.msk [vmem:[%s7842_s4 + $0x134] sm:$0xf] %vm4176_vm3, %v5029_v5  ;;  %4382 = vst.msk [vmem:[%s7842_s4 + $0x334] sm:$0xf] %vm4176_vm3, %v5157_v6 }
 0x194   :  { %v2720_v17 = vadd.f32 %v6766_v44, %v2457_v7  ;;  %v2848_v18 = vadd.f32 %v6766_v44, %v2585_v8  ;;  %v2458_v19 = vmul.f32 %v6741_v33, %v1670_v15  ;;  %v2586_v20 = vmul.f32 %v6741_v33, %v2182_v16  ;;  %v5429_v15 = vpop.f32.mrb[88].mxu0  ;;  %v5557_v16 = vpop.f32.mrb[88].mxu1 }
 0x195   :  { %v2978_v21 = vmax.f32 %v2722_v11, 0.0  ;;  %v3106_v22 = vmax.f32 %v2850_v12, 0.0  ;;  %v2723_v23 = vadd.f32 %v6766_v44, %v2460_v13  ;;  %v2851_v24 = vadd.f32 %v6766_v44, %v2588_v14 }
 0x196   :  { %v2976_v25 = vmax.f32 %v2720_v17, 0.0  ;;  %v3104_v26 = vmax.f32 %v2848_v18, 0.0  ;;  %v2721_v27 = vadd.f32 %v6766_v44, %v2458_v19  ;;  %v2849_v28 = vadd.f32 %v6766_v44, %v2586_v20 }
 0x197   :  { %v5034_v29 = vpack.c.bf16 %v2978_v21, %v2978_v21  ;;  %v5162_v51 = vpack.c.bf16 %v3106_v22, %v3106_v22  ;;  %v2979_v30 = vmax.f32 %v2723_v23, 0.0  ;;  %v3107_v31 = vmax.f32 %v2851_v24, 0.0  ;;  %v1699_v21 = vpop.f32.mrb[89].mxu0  ;;  %v2211_v22 = vpop.f32.mrb[89].mxu1 }
 0x198   :  { %v5032_v53 = vpack.c.bf16 %v2976_v25, %v2976_v25  ;;  %v5160_v32 = vpack.c.bf16 %v3104_v26, %v3104_v26  ;;  %v2977_v34 = vmax.f32 %v2721_v27, 0.0  ;;  %v3105_v33 = vmax.f32 %v2849_v28, 0.0  ;;  %v5430_v27 = vpop.f32.mrb[90].mxu0  ;;  %v5558_v28 = vpop.f32.mrb[90].mxu1 }
 0x199   :  { %4259 = vst.msk [vmem:[%s7842_s4 + $0x148] sm:$0xf] %vm4176_vm3, %v5034_v29  ;;  %4387 = vst.msk [vmem:[%s7842_s4 + $0x348] sm:$0xf] %vm4176_vm3, %v5162_v51  ;;  %v5035_v44 = vpack.c.bf16 %v2979_v30, %v2979_v30  ;;  %v5163_v37 = vpack.c.bf16 %v3107_v31, %v3107_v31  ;;  %v2463_v39 = vmul.f32 %v7279_v38, %v5425_v35 }
 0x19a   :  { %v2591_v40 = vmul.f32 %v7279_v38, %v5553_v36  ;;  %4257 = vst.msk [vmem:[%s7842_s4 + $0x140] sm:$0xf] %vm4176_vm3, %v5032_v53  ;;  %4385 = vst.msk [vmem:[%s7842_s4 + $0x340] sm:$0xf] %vm4176_vm3, %v5160_v32  ;;  %v5033_v43 = vpack.c.bf16 %v2977_v34, %v2977_v34  ;;  %v5161_v45 = vpack.c.bf16 %v3105_v33, %v3105_v33  ;;  %v1702_v53 = vpop.f32.mrb[91].mxu0  ;;  %v2214_v32 = vpop.f32.mrb[91].mxu1 }
 0x19b   :  { %v2461_v46 = vmul.f32 %v7279_v38, %v1683_v41  ;;  %v2589_v47 = vmul.f32 %v7279_v38, %v2195_v42  ;;  %4260 = vst.msk [vmem:[%s7842_s4 + $0x14c] sm:$0xf] %vm4176_vm3, %v5035_v44  ;;  %4388 = vst.msk [vmem:[%s7842_s4 + $0x34c] sm:$0xf] %vm4176_vm3, %v5163_v37  ;;  %v2726_v52 = vadd.f32 %v7304_v50, %v2463_v39 }
 0x19c   :  { %v2854_v54 = vadd.f32 %v7304_v50, %v2591_v40  ;;  %v2464_v55 = vmul.f32 %v7279_v38, %v5426_v48  ;;  %v2592_v56 = vmul.f32 %v7279_v38, %v5554_v49  ;;  %4258 = vst.msk [vmem:[%s7842_s4 + $0x144] sm:$0xf] %vm4176_vm3, %v5033_v43  ;;  %4386 = vst.msk [vmem:[%s7842_s4 + $0x344] sm:$0xf] %vm4176_vm3, %v5161_v45 }
 0x19d   :  { %v2724_v59 = vadd.f32 %v7304_v50, %v2461_v46  ;;  %v2852_v60 = vadd.f32 %v7304_v50, %v2589_v47  ;;  %v2462_v61 = vmul.f32 %v7279_v38, %v1686_v57  ;;  %v2590_v62 = vmul.f32 %v7279_v38, %v2198_v58  ;;  %v5433_v57 = vpop.f32.mrb[92].mxu0  ;;  %v5561_v58 = vpop.f32.mrb[92].mxu1 }
 0x19e   :  { %v2982_v63 = vmax.f32 %v2726_v52, 0.0  ;;  %v3110_v0 = vmax.f32 %v2854_v54, 0.0  ;;  %v2727_v1 = vadd.f32 %v7304_v50, %v2464_v55  ;;  %v2855_v2 = vadd.f32 %v7304_v50, %v2592_v56 }
 0x19f   :  { %v2980_v3 = vmax.f32 %v2724_v59, 0.0  ;;  %v3108_v4 = vmax.f32 %v2852_v60, 0.0  ;;  %v2725_v5 = vadd.f32 %v7304_v50, %v2462_v61  ;;  %v2853_v6 = vadd.f32 %v7304_v50, %v2590_v62 }
 0x1a0   :  { %v5038_v7 = vpack.c.bf16 %v2982_v63, %v2982_v63  ;;  %v5166_v8 = vpack.c.bf16 %v3110_v0, %v3110_v0  ;;  %v2983_v9 = vmax.f32 %v2727_v1, 0.0  ;;  %v3111_v10 = vmax.f32 %v2855_v2, 0.0  ;;  %v1715_v63 = vpop.f32.mrb[93].mxu0  ;;  %v2227_v0 = vpop.f32.mrb[93].mxu1 }
 0x1a1   :  { %v5036_v11 = vpack.c.bf16 %v2980_v3, %v2980_v3  ;;  %v5164_v12 = vpack.c.bf16 %v3108_v4, %v3108_v4  ;;  %v2981_v13 = vmax.f32 %v2725_v5, 0.0  ;;  %v3109_v14 = vmax.f32 %v2853_v6, 0.0  ;;  %v5434_v5 = vpop.f32.mrb[94].mxu0  ;;  %v5562_v6 = vpop.f32.mrb[94].mxu1 }
 0x1a2   :  { %4263 = vst.msk [vmem:[%s7842_s4 + $0x158] sm:$0xf] %vm4176_vm3, %v5038_v7  ;;  %4391 = vst.msk [vmem:[%s7842_s4 + $0x358] sm:$0xf] %vm4176_vm3, %v5166_v8  ;;  %v5039_v17 = vpack.c.bf16 %v2983_v9, %v2983_v9  ;;  %v5167_v18 = vpack.c.bf16 %v3111_v10, %v3111_v10  ;;  %v2467_v19 = vmul.f32 %v7279_v38, %v5429_v15 }
 0x1a3   :  { %v2595_v20 = vmul.f32 %v7279_v38, %v5557_v16  ;;  %4261 = vst.msk [vmem:[%s7842_s4 + $0x150] sm:$0xf] %vm4176_vm3, %v5036_v11  ;;  %4389 = vst.msk [vmem:[%s7842_s4 + $0x350] sm:$0xf] %vm4176_vm3, %v5164_v12  ;;  %v5037_v23 = vpack.c.bf16 %v2981_v13, %v2981_v13  ;;  %v5165_v24 = vpack.c.bf16 %v3109_v14, %v3109_v14  ;;  %v1718_v11 = vpop.f32.mrb[95].mxu0  ;;  %v2230_v12 = vpop.f32.mrb[95].mxu1 }
 0x1a4   :  { %v2465_v25 = vmul.f32 %v7279_v38, %v1699_v21  ;;  %v2593_v26 = vmul.f32 %v7279_v38, %v2211_v22  ;;  %4264 = vst.msk [vmem:[%s7842_s4 + $0x15c] sm:$0xf] %vm4176_vm3, %v5039_v17  ;;  %4392 = vst.msk [vmem:[%s7842_s4 + $0x35c] sm:$0xf] %vm4176_vm3, %v5167_v18  ;;  %v2730_v29 = vadd.f32 %v7304_v50, %v2467_v19 }
 0x1a5   :  { %v2858_v51 = vadd.f32 %v7304_v50, %v2595_v20  ;;  %v2468_v30 = vmul.f32 %v7279_v38, %v5430_v27  ;;  %v2596_v31 = vmul.f32 %v7279_v38, %v5558_v28  ;;  %4262 = vst.msk [vmem:[%s7842_s4 + $0x154] sm:$0xf] %vm4176_vm3, %v5037_v23  ;;  %4390 = vst.msk [vmem:[%s7842_s4 + $0x354] sm:$0xf] %vm4176_vm3, %v5165_v24 }
 0x1a6   :  { %v2728_v34 = vadd.f32 %v7304_v50, %v2465_v25  ;;  %v2856_v33 = vadd.f32 %v7304_v50, %v2593_v26  ;;  %v2466_v35 = vmul.f32 %v7279_v38, %v1702_v53  ;;  %v2594_v36 = vmul.f32 %v7279_v38, %v2214_v32  ;;  %v5437_v53 = vpop.f32.mrb[96].mxu0  ;;  %v5565_v32 = vpop.f32.mrb[96].mxu1 }
 0x1a7   :  { %v2986_v44 = vmax.f32 %v2730_v29, 0.0  ;;  %v3114_v37 = vmax.f32 %v2858_v51, 0.0  ;;  %v2731_v39 = vadd.f32 %v7304_v50, %v2468_v30  ;;  %v2859_v40 = vadd.f32 %v7304_v50, %v2596_v31 }
 0x1a8   :  { %v2984_v41 = vmax.f32 %v2728_v34, 0.0  ;;  %v3112_v42 = vmax.f32 %v2856_v33, 0.0  ;;  %v2729_v43 = vadd.f32 %v7304_v50, %v2466_v35  ;;  %v2857_v45 = vadd.f32 %v7304_v50, %v2594_v36 }
 0x1a9   :  { %v5042_v46 = vpack.c.bf16 %v2986_v44, %v2986_v44  ;;  %v5170_v47 = vpack.c.bf16 %v3114_v37, %v3114_v37  ;;  %v2987_v48 = vmax.f32 %v2731_v39, 0.0  ;;  %v3115_v49 = vmax.f32 %v2859_v40, 0.0  ;;  %v1731_v44 = vpop.f32.mrb[97].mxu0  ;;  %v2243_v37 = vpop.f32.mrb[97].mxu1 }
 0x1aa   :  { %v5040_v52 = vpack.c.bf16 %v2984_v41, %v2984_v41  ;;  %v5168_v54 = vpack.c.bf16 %v3112_v42, %v3112_v42  ;;  %v2985_v55 = vmax.f32 %v2729_v43, 0.0  ;;  %v3113_v56 = vmax.f32 %v2857_v45, 0.0  ;;  %v5438_v43 = vpop.f32.mrb[98].mxu0  ;;  %v5566_v45 = vpop.f32.mrb[98].mxu1 }
 0x1ab   :  { %4267 = vst.msk [vmem:[%s7842_s4 + $0x168] sm:$0xf] %vm4176_vm3, %v5042_v46  ;;  %4395 = vst.msk [vmem:[%s7842_s4 + $0x368] sm:$0xf] %vm4176_vm3, %v5170_v47  ;;  %v5043_v59 = vpack.c.bf16 %v2987_v48, %v2987_v48  ;;  %v5171_v60 = vpack.c.bf16 %v3115_v49, %v3115_v49  ;;  %v2471_v61 = vmul.f32 %v7279_v38, %v5433_v57 }
 0x1ac   :  { %v2599_v62 = vmul.f32 %v7279_v38, %v5561_v58  ;;  %4265 = vst.msk [vmem:[%s7842_s4 + $0x160] sm:$0xf] %vm4176_vm3, %v5040_v52  ;;  %4393 = vst.msk [vmem:[%s7842_s4 + $0x360] sm:$0xf] %vm4176_vm3, %v5168_v54  ;;  %v5041_v1 = vpack.c.bf16 %v2985_v55, %v2985_v55  ;;  %v5169_v2 = vpack.c.bf16 %v3113_v56, %v3113_v56  ;;  %v1734_v52 = vpop.f32.mrb[99].mxu0  ;;  %v2246_v54 = vpop.f32.mrb[99].mxu1 }
 0x1ad   :  { %v2469_v3 = vmul.f32 %v7279_v38, %v1715_v63  ;;  %v2597_v4 = vmul.f32 %v7279_v38, %v2227_v0  ;;  %4268 = vst.msk [vmem:[%s7842_s4 + $0x16c] sm:$0xf] %vm4176_vm3, %v5043_v59  ;;  %4396 = vst.msk [vmem:[%s7842_s4 + $0x36c] sm:$0xf] %vm4176_vm3, %v5171_v60  ;;  %v2734_v7 = vadd.f32 %v7304_v50, %v2471_v61 }
 0x1ae   :  { %v2862_v8 = vadd.f32 %v7304_v50, %v2599_v62  ;;  %v2472_v9 = vmul.f32 %v7279_v38, %v5434_v5  ;;  %v2600_v10 = vmul.f32 %v7279_v38, %v5562_v6  ;;  %4266 = vst.msk [vmem:[%s7842_s4 + $0x164] sm:$0xf] %vm4176_vm3, %v5041_v1  ;;  %4394 = vst.msk [vmem:[%s7842_s4 + $0x364] sm:$0xf] %vm4176_vm3, %v5169_v2 }
 0x1af   :  { %v2732_v13 = vadd.f32 %v7304_v50, %v2469_v3  ;;  %v2860_v14 = vadd.f32 %v7304_v50, %v2597_v4  ;;  %v2470_v15 = vmul.f32 %v7279_v38, %v1718_v11  ;;  %v2598_v16 = vmul.f32 %v7279_v38, %v2230_v12  ;;  %v5441_v11 = vpop.f32.mrb[100].mxu0  ;;  %v5569_v12 = vpop.f32.mrb[100].mxu1 }
 0x1b0   :  { %v2990_v17 = vmax.f32 %v2734_v7, 0.0  ;;  %v3118_v18 = vmax.f32 %v2862_v8, 0.0  ;;  %v2735_v19 = vadd.f32 %v7304_v50, %v2472_v9  ;;  %v2863_v20 = vadd.f32 %v7304_v50, %v2600_v10 }
 0x1b1   :  { %v2988_v21 = vmax.f32 %v2732_v13, 0.0  ;;  %v3116_v22 = vmax.f32 %v2860_v14, 0.0  ;;  %v2733_v23 = vadd.f32 %v7304_v50, %v2470_v15  ;;  %v2861_v24 = vadd.f32 %v7304_v50, %v2598_v16 }
 0x1b2   :  { %v5046_v25 = vpack.c.bf16 %v2990_v17, %v2990_v17  ;;  %v5174_v26 = vpack.c.bf16 %v3118_v18, %v3118_v18  ;;  %v2991_v27 = vmax.f32 %v2735_v19, 0.0  ;;  %v3119_v28 = vmax.f32 %v2863_v20, 0.0  ;;  %v1747_v17 = vpop.f32.mrb[101].mxu0  ;;  %v2259_v18 = vpop.f32.mrb[101].mxu1 }
 0x1b3   :  { %v5044_v29 = vpack.c.bf16 %v2988_v21, %v2988_v21  ;;  %v5172_v51 = vpack.c.bf16 %v3116_v22, %v3116_v22  ;;  %v2989_v30 = vmax.f32 %v2733_v23, 0.0  ;;  %v3117_v31 = vmax.f32 %v2861_v24, 0.0  ;;  %v5442_v23 = vpop.f32.mrb[102].mxu0  ;;  %v5570_v24 = vpop.f32.mrb[102].mxu1 }
 0x1b4   :  { %4271 = vst.msk [vmem:[%s7842_s4 + $0x178] sm:$0xf] %vm4176_vm3, %v5046_v25  ;;  %4399 = vst.msk [vmem:[%s7842_s4 + $0x378] sm:$0xf] %vm4176_vm3, %v5174_v26  ;;  %v5047_v34 = vpack.c.bf16 %v2991_v27, %v2991_v27  ;;  %v5175_v33 = vpack.c.bf16 %v3119_v28, %v3119_v28  ;;  %v2475_v35 = vmul.f32 %v7279_v38, %v5437_v53 }
 0x1b5   :  { %v2603_v36 = vmul.f32 %v7279_v38, %v5565_v32  ;;  %4269 = vst.msk [vmem:[%s7842_s4 + $0x170] sm:$0xf] %vm4176_vm3, %v5044_v29  ;;  %4397 = vst.msk [vmem:[%s7842_s4 + $0x370] sm:$0xf] %vm4176_vm3, %v5172_v51  ;;  %v5045_v39 = vpack.c.bf16 %v2989_v30, %v2989_v30  ;;  %v5173_v40 = vpack.c.bf16 %v3117_v31, %v3117_v31  ;;  %v1750_v29 = vpop.f32.mrb[103].mxu0  ;;  %v2262_v51 = vpop.f32.mrb[103].mxu1 }
 0x1b6   :  { %v2473_v41 = vmul.f32 %v7279_v38, %v1731_v44  ;;  %v2601_v42 = vmul.f32 %v7279_v38, %v2243_v37  ;;  %4272 = vst.msk [vmem:[%s7842_s4 + $0x17c] sm:$0xf] %vm4176_vm3, %v5047_v34  ;;  %4400 = vst.msk [vmem:[%s7842_s4 + $0x37c] sm:$0xf] %vm4176_vm3, %v5175_v33  ;;  %v2738_v46 = vadd.f32 %v7304_v50, %v2475_v35 }
 0x1b7   :  { %v2866_v47 = vadd.f32 %v7304_v50, %v2603_v36  ;;  %v2476_v48 = vmul.f32 %v7279_v38, %v5438_v43  ;;  %v2604_v49 = vmul.f32 %v7279_v38, %v5566_v45  ;;  %4270 = vst.msk [vmem:[%s7842_s4 + $0x174] sm:$0xf] %vm4176_vm3, %v5045_v39  ;;  %4398 = vst.msk [vmem:[%s7842_s4 + $0x374] sm:$0xf] %vm4176_vm3, %v5173_v40 }
 0x1b8   :  { %v2736_v55 = vadd.f32 %v7304_v50, %v2473_v41  ;;  %v2864_v56 = vadd.f32 %v7304_v50, %v2601_v42  ;;  %v2474_v57 = vmul.f32 %v7279_v38, %v1734_v52  ;;  %v2602_v58 = vmul.f32 %v7279_v38, %v2246_v54  ;;  %v5445_v52 = vpop.f32.mrb[104].mxu0  ;;  %v5573_v54 = vpop.f32.mrb[104].mxu1 }
 0x1b9   :  { %v2994_v59 = vmax.f32 %v2738_v46, 0.0  ;;  %v3122_v60 = vmax.f32 %v2866_v47, 0.0  ;;  %v2739_v61 = vadd.f32 %v7304_v50, %v2476_v48  ;;  %v2867_v62 = vadd.f32 %v7304_v50, %v2604_v49 }
 0x1ba   :  { %v2992_v63 = vmax.f32 %v2736_v55, 0.0  ;;  %v3120_v0 = vmax.f32 %v2864_v56, 0.0  ;;  %v2737_v1 = vadd.f32 %v7304_v50, %v2474_v57  ;;  %v2865_v2 = vadd.f32 %v7304_v50, %v2602_v58 }
 0x1bb   :  { %v5050_v3 = vpack.c.bf16 %v2994_v59, %v2994_v59  ;;  %v5178_v4 = vpack.c.bf16 %v3122_v60, %v3122_v60  ;;  %v2995_v5 = vmax.f32 %v2739_v61, 0.0  ;;  %v3123_v6 = vmax.f32 %v2867_v62, 0.0  ;;  %v1763_v59 = vpop.f32.mrb[105].mxu0  ;;  %v2275_v60 = vpop.f32.mrb[105].mxu1 }
 0x1bc   :  { %v5048_v7 = vpack.c.bf16 %v2992_v63, %v2992_v63  ;;  %v5176_v8 = vpack.c.bf16 %v3120_v0, %v3120_v0  ;;  %v2993_v9 = vmax.f32 %v2737_v1, 0.0  ;;  %v3121_v10 = vmax.f32 %v2865_v2, 0.0  ;;  %v5446_v1 = vpop.f32.mrb[106].mxu0  ;;  %v5574_v2 = vpop.f32.mrb[106].mxu1 }
 0x1bd   :  { %4275 = vst.msk [vmem:[%s7842_s4 + $0x188] sm:$0xf] %vm4176_vm3, %v5050_v3  ;;  %4403 = vst.msk [vmem:[%s7842_s4 + $0x388] sm:$0xf] %vm4176_vm3, %v5178_v4  ;;  %v5051_v13 = vpack.c.bf16 %v2995_v5, %v2995_v5  ;;  %v5179_v14 = vpack.c.bf16 %v3123_v6, %v3123_v6  ;;  %v2479_v15 = vmul.f32 %v7279_v38, %v5441_v11 }
 0x1be   :  { %v2607_v16 = vmul.f32 %v7279_v38, %v5569_v12  ;;  %4273 = vst.msk [vmem:[%s7842_s4 + $0x180] sm:$0xf] %vm4176_vm3, %v5048_v7  ;;  %4401 = vst.msk [vmem:[%s7842_s4 + $0x380] sm:$0xf] %vm4176_vm3, %v5176_v8  ;;  %v5049_v19 = vpack.c.bf16 %v2993_v9, %v2993_v9  ;;  %v5177_v20 = vpack.c.bf16 %v3121_v10, %v3121_v10  ;;  %v1766_v7 = vpop.f32.mrb[107].mxu0  ;;  %v2278_v8 = vpop.f32.mrb[107].mxu1 }
 0x1bf   :  { %v2477_v21 = vmul.f32 %v7279_v38, %v1747_v17  ;;  %v2605_v22 = vmul.f32 %v7279_v38, %v2259_v18  ;;  %4276 = vst.msk [vmem:[%s7842_s4 + $0x18c] sm:$0xf] %vm4176_vm3, %v5051_v13  ;;  %4404 = vst.msk [vmem:[%s7842_s4 + $0x38c] sm:$0xf] %vm4176_vm3, %v5179_v14  ;;  %v2742_v25 = vadd.f32 %v7304_v50, %v2479_v15 }
 0x1c0   :  { %v2870_v26 = vadd.f32 %v7304_v50, %v2607_v16  ;;  %v2480_v27 = vmul.f32 %v7279_v38, %v5442_v23  ;;  %v2608_v28 = vmul.f32 %v7279_v38, %v5570_v24  ;;  %4274 = vst.msk [vmem:[%s7842_s4 + $0x184] sm:$0xf] %vm4176_vm3, %v5049_v19  ;;  %4402 = vst.msk [vmem:[%s7842_s4 + $0x384] sm:$0xf] %vm4176_vm3, %v5177_v20 }
 0x1c1   :  { %v2740_v30 = vadd.f32 %v7304_v50, %v2477_v21  ;;  %v2868_v31 = vadd.f32 %v7304_v50, %v2605_v22  ;;  %v2478_v53 = vmul.f32 %v7279_v38, %v1750_v29  ;;  %v2606_v32 = vmul.f32 %v7279_v38, %v2262_v51  ;;  %v5449_v29 = vpop.f32.mrb[108].mxu0  ;;  %v5577_v51 = vpop.f32.mrb[108].mxu1 }
 0x1c2   :  { %v2998_v34 = vmax.f32 %v2742_v25, 0.0  ;;  %v3126_v33 = vmax.f32 %v2870_v26, 0.0  ;;  %v2743_v35 = vadd.f32 %v7304_v50, %v2480_v27  ;;  %v2871_v36 = vadd.f32 %v7304_v50, %v2608_v28 }
 0x1c3   :  { %v2996_v44 = vmax.f32 %v2740_v30, 0.0  ;;  %v3124_v37 = vmax.f32 %v2868_v31, 0.0  ;;  %v2741_v39 = vadd.f32 %v7304_v50, %v2478_v53  ;;  %v2869_v40 = vadd.f32 %v7304_v50, %v2606_v32 }
 0x1c4   :  { %v5054_v41 = vpack.c.bf16 %v2998_v34, %v2998_v34  ;;  %v5182_v42 = vpack.c.bf16 %v3126_v33, %v3126_v33  ;;  %v2999_v43 = vmax.f32 %v2743_v35, 0.0  ;;  %v3127_v45 = vmax.f32 %v2871_v36, 0.0  ;;  %v1779_v34 = vpop.f32.mrb[109].mxu0  ;;  %v2291_v33 = vpop.f32.mrb[109].mxu1 }
 0x1c5   :  { %v5052_v46 = vpack.c.bf16 %v2996_v44, %v2996_v44  ;;  %v5180_v47 = vpack.c.bf16 %v3124_v37, %v3124_v37  ;;  %v2997_v48 = vmax.f32 %v2741_v39, 0.0  ;;  %v3125_v49 = vmax.f32 %v2869_v40, 0.0  ;;  %v5450_v39 = vpop.f32.mrb[110].mxu0  ;;  %v5578_v40 = vpop.f32.mrb[110].mxu1 }
 0x1c6   :  { %4279 = vst.msk [vmem:[%s7842_s4 + $0x198] sm:$0xf] %vm4176_vm3, %v5054_v41  ;;  %4407 = vst.msk [vmem:[%s7842_s4 + $0x398] sm:$0xf] %vm4176_vm3, %v5182_v42  ;;  %v5055_v55 = vpack.c.bf16 %v2999_v43, %v2999_v43  ;;  %v5183_v56 = vpack.c.bf16 %v3127_v45, %v3127_v45  ;;  %v2483_v57 = vmul.f32 %v7279_v38, %v5445_v52 }
 0x1c7   :  { %v2611_v58 = vmul.f32 %v7279_v38, %v5573_v54  ;;  %4277 = vst.msk [vmem:[%s7842_s4 + $0x190] sm:$0xf] %vm4176_vm3, %v5052_v46  ;;  %4405 = vst.msk [vmem:[%s7842_s4 + $0x390] sm:$0xf] %vm4176_vm3, %v5180_v47  ;;  %v5053_v61 = vpack.c.bf16 %v2997_v48, %v2997_v48  ;;  %v5181_v62 = vpack.c.bf16 %v3125_v49, %v3125_v49  ;;  %v1782_v46 = vpop.f32.mrb[111].mxu0  ;;  %v2294_v47 = vpop.f32.mrb[111].mxu1 }
 0x1c8   :  { %v2481_v63 = vmul.f32 %v7279_v38, %v1763_v59  ;;  %v2609_v0 = vmul.f32 %v7279_v38, %v2275_v60  ;;  %4280 = vst.msk [vmem:[%s7842_s4 + $0x19c] sm:$0xf] %vm4176_vm3, %v5055_v55  ;;  %4408 = vst.msk [vmem:[%s7842_s4 + $0x39c] sm:$0xf] %vm4176_vm3, %v5183_v56  ;;  %v2746_v3 = vadd.f32 %v7304_v50, %v2483_v57 }
 0x1c9   :  { %v2874_v4 = vadd.f32 %v7304_v50, %v2611_v58  ;;  %v2484_v5 = vmul.f32 %v7279_v38, %v5446_v1  ;;  %v2612_v6 = vmul.f32 %v7279_v38, %v5574_v2  ;;  %4278 = vst.msk [vmem:[%s7842_s4 + $0x194] sm:$0xf] %vm4176_vm3, %v5053_v61  ;;  %4406 = vst.msk [vmem:[%s7842_s4 + $0x394] sm:$0xf] %vm4176_vm3, %v5181_v62 }
 0x1ca   :  { %v2744_v9 = vadd.f32 %v7304_v50, %v2481_v63  ;;  %v2872_v10 = vadd.f32 %v7304_v50, %v2609_v0  ;;  %v2482_v11 = vmul.f32 %v7279_v38, %v1766_v7  ;;  %v2610_v12 = vmul.f32 %v7279_v38, %v2278_v8  ;;  %v5453_v7 = vpop.f32.mrb[112].mxu0  ;;  %v5581_v8 = vpop.f32.mrb[112].mxu1 }
 0x1cb   :  { %v3002_v13 = vmax.f32 %v2746_v3, 0.0  ;;  %v3130_v14 = vmax.f32 %v2874_v4, 0.0  ;;  %v2747_v15 = vadd.f32 %v7304_v50, %v2484_v5  ;;  %v2875_v16 = vadd.f32 %v7304_v50, %v2612_v6 }
 0x1cc   :  { %v3000_v17 = vmax.f32 %v2744_v9, 0.0  ;;  %v3128_v18 = vmax.f32 %v2872_v10, 0.0  ;;  %v2745_v19 = vadd.f32 %v7304_v50, %v2482_v11  ;;  %v2873_v20 = vadd.f32 %v7304_v50, %v2610_v12 }
 0x1cd   :  { %v5058_v21 = vpack.c.bf16 %v3002_v13, %v3002_v13  ;;  %v5186_v22 = vpack.c.bf16 %v3130_v14, %v3130_v14  ;;  %v3003_v23 = vmax.f32 %v2747_v15, 0.0  ;;  %v3131_v24 = vmax.f32 %v2875_v16, 0.0  ;;  %v1795_v13 = vpop.f32.mrb[113].mxu0  ;;  %v2307_v14 = vpop.f32.mrb[113].mxu1 }
 0x1ce   :  { %v5056_v25 = vpack.c.bf16 %v3000_v17, %v3000_v17  ;;  %v5184_v26 = vpack.c.bf16 %v3128_v18, %v3128_v18  ;;  %v3001_v27 = vmax.f32 %v2745_v19, 0.0  ;;  %v3129_v28 = vmax.f32 %v2873_v20, 0.0  ;;  %v5454_v19 = vpop.f32.mrb[114].mxu0  ;;  %v5582_v20 = vpop.f32.mrb[114].mxu1 }
 0x1cf   :  { %4283 = vst.msk [vmem:[%s7842_s4 + $0x1a8] sm:$0xf] %vm4176_vm3, %v5058_v21  ;;  %4411 = vst.msk [vmem:[%s7842_s4 + $0x3a8] sm:$0xf] %vm4176_vm3, %v5186_v22  ;;  %v5059_v30 = vpack.c.bf16 %v3003_v23, %v3003_v23  ;;  %v5187_v31 = vpack.c.bf16 %v3131_v24, %v3131_v24  ;;  %v2487_v53 = vmul.f32 %v7279_v38, %v5449_v29 }
 0x1d0   :  { %v2615_v32 = vmul.f32 %v7279_v38, %v5577_v51  ;;  %4281 = vst.msk [vmem:[%s7842_s4 + $0x1a0] sm:$0xf] %vm4176_vm3, %v5056_v25  ;;  %4409 = vst.msk [vmem:[%s7842_s4 + $0x3a0] sm:$0xf] %vm4176_vm3, %v5184_v26  ;;  %v5057_v35 = vpack.c.bf16 %v3001_v27, %v3001_v27  ;;  %v5185_v36 = vpack.c.bf16 %v3129_v28, %v3129_v28  ;;  %v1798_v25 = vpop.f32.mrb[115].mxu0  ;;  %v2310_v26 = vpop.f32.mrb[115].mxu1 }
 0x1d1   :  { %v2485_v44 = vmul.f32 %v7279_v38, %v1779_v34  ;;  %v2613_v37 = vmul.f32 %v7279_v38, %v2291_v33  ;;  %4284 = vst.msk [vmem:[%s7842_s4 + $0x1ac] sm:$0xf] %vm4176_vm3, %v5059_v30  ;;  %4412 = vst.msk [vmem:[%s7842_s4 + $0x3ac] sm:$0xf] %vm4176_vm3, %v5187_v31  ;;  %v2750_v41 = vadd.f32 %v7304_v50, %v2487_v53 }
 0x1d2   :  { %v2878_v42 = vadd.f32 %v7304_v50, %v2615_v32  ;;  %v2488_v43 = vmul.f32 %v7279_v38, %v5450_v39  ;;  %v2616_v45 = vmul.f32 %v7279_v38, %v5578_v40  ;;  %4282 = vst.msk [vmem:[%s7842_s4 + $0x1a4] sm:$0xf] %vm4176_vm3, %v5057_v35  ;;  %4410 = vst.msk [vmem:[%s7842_s4 + $0x3a4] sm:$0xf] %vm4176_vm3, %v5185_v36 }
 0x1d3   :  { %v2748_v48 = vadd.f32 %v7304_v50, %v2485_v44  ;;  %v2876_v49 = vadd.f32 %v7304_v50, %v2613_v37  ;;  %v2486_v52 = vmul.f32 %v7279_v38, %v1782_v46  ;;  %v2614_v54 = vmul.f32 %v7279_v38, %v2294_v47  ;;  %v5457_v46 = vpop.f32.mrb[116].mxu0  ;;  %v5585_v47 = vpop.f32.mrb[116].mxu1 }
 0x1d4   :  { %v3006_v55 = vmax.f32 %v2750_v41, 0.0  ;;  %v3134_v56 = vmax.f32 %v2878_v42, 0.0  ;;  %v2751_v57 = vadd.f32 %v7304_v50, %v2488_v43  ;;  %v2879_v58 = vadd.f32 %v7304_v50, %v2616_v45 }
 0x1d5   :  { %v3004_v59 = vmax.f32 %v2748_v48, 0.0  ;;  %v3132_v60 = vmax.f32 %v2876_v49, 0.0  ;;  %v2749_v61 = vadd.f32 %v7304_v50, %v2486_v52  ;;  %v2877_v62 = vadd.f32 %v7304_v50, %v2614_v54 }
 0x1d6   :  { %v5062_v63 = vpack.c.bf16 %v3006_v55, %v3006_v55  ;;  %v5190_v0 = vpack.c.bf16 %v3134_v56, %v3134_v56  ;;  %v3007_v1 = vmax.f32 %v2751_v57, 0.0  ;;  %v3135_v2 = vmax.f32 %v2879_v58, 0.0  ;;  %v1811_v55 = vpop.f32.mrb[117].mxu0  ;;  %v2323_v56 = vpop.f32.mrb[117].mxu1 }
 0x1d7   :  { %v5060_v3 = vpack.c.bf16 %v3004_v59, %v3004_v59  ;;  %v5188_v4 = vpack.c.bf16 %v3132_v60, %v3132_v60  ;;  %v3005_v5 = vmax.f32 %v2749_v61, 0.0  ;;  %v3133_v6 = vmax.f32 %v2877_v62, 0.0  ;;  %v5458_v61 = vpop.f32.mrb[118].mxu0  ;;  %v5586_v62 = vpop.f32.mrb[118].mxu1 }
 0x1d8   :  { %4287 = vst.msk [vmem:[%s7842_s4 + $0x1b8] sm:$0xf] %vm4176_vm3, %v5062_v63  ;;  %4415 = vst.msk [vmem:[%s7842_s4 + $0x3b8] sm:$0xf] %vm4176_vm3, %v5190_v0  ;;  %v5063_v9 = vpack.c.bf16 %v3007_v1, %v3007_v1  ;;  %v5191_v10 = vpack.c.bf16 %v3135_v2, %v3135_v2  ;;  %v2491_v11 = vmul.f32 %v7279_v38, %v5453_v7 }
 0x1d9   :  { %v2619_v12 = vmul.f32 %v7279_v38, %v5581_v8  ;;  %4285 = vst.msk [vmem:[%s7842_s4 + $0x1b0] sm:$0xf] %vm4176_vm3, %v5060_v3  ;;  %4413 = vst.msk [vmem:[%s7842_s4 + $0x3b0] sm:$0xf] %vm4176_vm3, %v5188_v4  ;;  %v5061_v15 = vpack.c.bf16 %v3005_v5, %v3005_v5  ;;  %v5189_v16 = vpack.c.bf16 %v3133_v6, %v3133_v6  ;;  %v1814_v3 = vpop.f32.mrb[119].mxu0  ;;  %v2326_v4 = vpop.f32.mrb[119].mxu1 }
 0x1da   :  { %v2489_v17 = vmul.f32 %v7279_v38, %v1795_v13  ;;  %v2617_v18 = vmul.f32 %v7279_v38, %v2307_v14  ;;  %4288 = vst.msk [vmem:[%s7842_s4 + $0x1bc] sm:$0xf] %vm4176_vm3, %v5063_v9  ;;  %4416 = vst.msk [vmem:[%s7842_s4 + $0x3bc] sm:$0xf] %vm4176_vm3, %v5191_v10  ;;  %v2754_v21 = vadd.f32 %v7304_v50, %v2491_v11 }
 0x1db   :  { %v2882_v22 = vadd.f32 %v7304_v50, %v2619_v12  ;;  %v2492_v23 = vmul.f32 %v7279_v38, %v5454_v19  ;;  %v2620_v24 = vmul.f32 %v7279_v38, %v5582_v20  ;;  %4286 = vst.msk [vmem:[%s7842_s4 + $0x1b4] sm:$0xf] %vm4176_vm3, %v5061_v15  ;;  %4414 = vst.msk [vmem:[%s7842_s4 + $0x3b4] sm:$0xf] %vm4176_vm3, %v5189_v16 }
 0x1dc   :  { %v2752_v27 = vadd.f32 %v7304_v50, %v2489_v17  ;;  %v2880_v28 = vadd.f32 %v7304_v50, %v2617_v18  ;;  %v2490_v29 = vmul.f32 %v7279_v38, %v1798_v25  ;;  %v2618_v51 = vmul.f32 %v7279_v38, %v2310_v26  ;;  %v5461_v25 = vpop.f32.mrb[120].mxu0  ;;  %v5589_v26 = vpop.f32.mrb[120].mxu1 }
 0x1dd   :  { %v3010_v30 = vmax.f32 %v2754_v21, 0.0  ;;  %v3138_v31 = vmax.f32 %v2882_v22, 0.0  ;;  %v2755_v53 = vadd.f32 %v7304_v50, %v2492_v23  ;;  %v2883_v32 = vadd.f32 %v7304_v50, %v2620_v24 }
 0x1de   :  { %v3008_v34 = vmax.f32 %v2752_v27, 0.0  ;;  %v3136_v33 = vmax.f32 %v2880_v28, 0.0  ;;  %v2753_v35 = vadd.f32 %v7304_v50, %v2490_v29  ;;  %v2881_v36 = vadd.f32 %v7304_v50, %v2618_v51 }
 0x1df   :  { %v5066_v44 = vpack.c.bf16 %v3010_v30, %v3010_v30  ;;  %v5194_v37 = vpack.c.bf16 %v3138_v31, %v3138_v31  ;;  %v3011_v39 = vmax.f32 %v2755_v53, 0.0  ;;  %v3139_v40 = vmax.f32 %v2883_v32, 0.0  ;;  %v1827_v30 = vpop.f32.mrb[121].mxu0  ;;  %v2339_v31 = vpop.f32.mrb[121].mxu1 }
 0x1e0   :  { %v5064_v41 = vpack.c.bf16 %v3008_v34, %v3008_v34  ;;  %v5192_v42 = vpack.c.bf16 %v3136_v33, %v3136_v33  ;;  %v3009_v43 = vmax.f32 %v2753_v35, 0.0  ;;  %v3137_v45 = vmax.f32 %v2881_v36, 0.0  ;;  %v5462_v35 = vpop.f32.mrb[122].mxu0  ;;  %v5590_v36 = vpop.f32.mrb[122].mxu1 }
 0x1e1   :  { %4291 = vst.msk [vmem:[%s7842_s4 + $0x1c8] sm:$0xf] %vm4176_vm3, %v5066_v44  ;;  %4419 = vst.msk [vmem:[%s7842_s4 + $0x3c8] sm:$0xf] %vm4176_vm3, %v5194_v37  ;;  %v5067_v48 = vpack.c.bf16 %v3011_v39, %v3011_v39  ;;  %v5195_v49 = vpack.c.bf16 %v3139_v40, %v3139_v40  ;;  %v2495_v52 = vmul.f32 %v7279_v38, %v5457_v46 }
 0x1e2   :  { %v2623_v54 = vmul.f32 %v7279_v38, %v5585_v47  ;;  %4289 = vst.msk [vmem:[%s7842_s4 + $0x1c0] sm:$0xf] %vm4176_vm3, %v5064_v41  ;;  %4417 = vst.msk [vmem:[%s7842_s4 + $0x3c0] sm:$0xf] %vm4176_vm3, %v5192_v42  ;;  %v5065_v57 = vpack.c.bf16 %v3009_v43, %v3009_v43  ;;  %v5193_v58 = vpack.c.bf16 %v3137_v45, %v3137_v45  ;;  %v1830_v41 = vpop.f32.mrb[123].mxu0  ;;  %v2342_v42 = vpop.f32.mrb[123].mxu1 }
 0x1e3   :  { %v2493_v59 = vmul.f32 %v7279_v38, %v1811_v55  ;;  %v2621_v60 = vmul.f32 %v7279_v38, %v2323_v56  ;;  %4292 = vst.msk [vmem:[%s7842_s4 + $0x1cc] sm:$0xf] %vm4176_vm3, %v5067_v48  ;;  %4420 = vst.msk [vmem:[%s7842_s4 + $0x3cc] sm:$0xf] %vm4176_vm3, %v5195_v49  ;;  %v2758_v63 = vadd.f32 %v7304_v50, %v2495_v52 }
 0x1e4   :  { %v2886_v0 = vadd.f32 %v7304_v50, %v2623_v54  ;;  %v2496_v1 = vmul.f32 %v7279_v38, %v5458_v61  ;;  %v2624_v2 = vmul.f32 %v7279_v38, %v5586_v62  ;;  %4290 = vst.msk [vmem:[%s7842_s4 + $0x1c4] sm:$0xf] %vm4176_vm3, %v5065_v57  ;;  %4418 = vst.msk [vmem:[%s7842_s4 + $0x3c4] sm:$0xf] %vm4176_vm3, %v5193_v58 }
 0x1e5   :  { %v2756_v5 = vadd.f32 %v7304_v50, %v2493_v59  ;;  %v2884_v6 = vadd.f32 %v7304_v50, %v2621_v60  ;;  %v2494_v7 = vmul.f32 %v7279_v38, %v1814_v3  ;;  %v2622_v8 = vmul.f32 %v7279_v38, %v2326_v4  ;;  %v5465_v3 = vpop.f32.mrb[124].mxu0  ;;  %v5593_v4 = vpop.f32.mrb[124].mxu1 }
 0x1e6   :  { %v3014_v9 = vmax.f32 %v2758_v63, 0.0  ;;  %v3142_v10 = vmax.f32 %v2886_v0, 0.0  ;;  %v2759_v11 = vadd.f32 %v7304_v50, %v2496_v1  ;;  %v2887_v12 = vadd.f32 %v7304_v50, %v2624_v2 }
 0x1e7   :  { %v3012_v13 = vmax.f32 %v2756_v5, 0.0  ;;  %v3140_v14 = vmax.f32 %v2884_v6, 0.0  ;;  %v2757_v15 = vadd.f32 %v7304_v50, %v2494_v7  ;;  %v2885_v16 = vadd.f32 %v7304_v50, %v2622_v8 }
 0x1e8   :  { %v5070_v17 = vpack.c.bf16 %v3014_v9, %v3014_v9  ;;  %v5198_v18 = vpack.c.bf16 %v3142_v10, %v3142_v10  ;;  %v3015_v19 = vmax.f32 %v2759_v11, 0.0  ;;  %v3143_v20 = vmax.f32 %v2887_v12, 0.0  ;;  %v1843_v9 = vpop.f32.mrb[125].mxu0  ;;  %v2355_v10 = vpop.f32.mrb[125].mxu1 }
 0x1e9   :  { %v5068_v21 = vpack.c.bf16 %v3012_v13, %v3012_v13  ;;  %v5196_v22 = vpack.c.bf16 %v3140_v14, %v3140_v14  ;;  %v3013_v23 = vmax.f32 %v2757_v15, 0.0  ;;  %v3141_v24 = vmax.f32 %v2885_v16, 0.0  ;;  %v5466_v15 = vpop.f32.mrb[126].mxu0  ;;  %v5594_v16 = vpop.f32.mrb[126].mxu1 }
 0x1ea   :  { %4295 = vst.msk [vmem:[%s7842_s4 + $0x1d8] sm:$0xf] %vm4176_vm3, %v5070_v17  ;;  %4423 = vst.msk [vmem:[%s7842_s4 + $0x3d8] sm:$0xf] %vm4176_vm3, %v5198_v18  ;;  %v5071_v27 = vpack.c.bf16 %v3015_v19, %v3015_v19  ;;  %v5199_v28 = vpack.c.bf16 %v3143_v20, %v3143_v20  ;;  %v2499_v29 = vmul.f32 %v7279_v38, %v5461_v25 }
 0x1eb   :  { %v2627_v51 = vmul.f32 %v7279_v38, %v5589_v26  ;;  %4293 = vst.msk [vmem:[%s7842_s4 + $0x1d0] sm:$0xf] %vm4176_vm3, %v5068_v21  ;;  %4421 = vst.msk [vmem:[%s7842_s4 + $0x3d0] sm:$0xf] %vm4176_vm3, %v5196_v22  ;;  %v5069_v53 = vpack.c.bf16 %v3013_v23, %v3013_v23  ;;  %v5197_v32 = vpack.c.bf16 %v3141_v24, %v3141_v24  ;;  %v1846_v21 = vpop.f32.mrb[127].mxu0  ;;  %v2358_v22 = vpop.f32.mrb[127].mxu1 }
 0x1ec   :  { %v2497_v34 = vmul.f32 %v7279_v38, %v1827_v30  ;;  %v2625_v33 = vmul.f32 %v7279_v38, %v2339_v31  ;;  %4296 = vst.msk [vmem:[%s7842_s4 + $0x1dc] sm:$0xf] %vm4176_vm3, %v5071_v27  ;;  %4424 = vst.msk [vmem:[%s7842_s4 + $0x3dc] sm:$0xf] %vm4176_vm3, %v5199_v28  ;;  %v2762_v44 = vadd.f32 %v7304_v50, %v2499_v29 }
 0x1ed   :  { %v2890_v37 = vadd.f32 %v7304_v50, %v2627_v51  ;;  %v2500_v39 = vmul.f32 %v7279_v38, %v5462_v35  ;;  %v2628_v40 = vmul.f32 %v7279_v38, %v5590_v36  ;;  %4294 = vst.msk [vmem:[%s7842_s4 + $0x1d4] sm:$0xf] %vm4176_vm3, %v5069_v53  ;;  %4422 = vst.msk [vmem:[%s7842_s4 + $0x3d4] sm:$0xf] %vm4176_vm3, %v5197_v32 }
 0x1ee   :  { %v2760_v43 = vadd.f32 %v7304_v50, %v2497_v34  ;;  %v2888_v45 = vadd.f32 %v7304_v50, %v2625_v33  ;;  %v2498_v46 = vmul.f32 %v7279_v38, %v1830_v41  ;;  %v2626_v47 = vmul.f32 %v7279_v38, %v2342_v42 }
 0x1ef   :  { %v3018_v48 = vmax.f32 %v2762_v44, 0.0  ;;  %v3146_v49 = vmax.f32 %v2890_v37, 0.0  ;;  %v2763_v52 = vadd.f32 %v7304_v50, %v2500_v39  ;;  %v2891_v54 = vadd.f32 %v7304_v50, %v2628_v40 }
 0x1f0   :  { %v3016_v55 = vmax.f32 %v2760_v43, 0.0  ;;  %v3144_v56 = vmax.f32 %v2888_v45, 0.0  ;;  %v2761_v57 = vadd.f32 %v7304_v50, %v2498_v46  ;;  %v2889_v58 = vadd.f32 %v7304_v50, %v2626_v47 }
 0x1f1   :  { %v5074_v59 = vpack.c.bf16 %v3018_v48, %v3018_v48  ;;  %v5202_v60 = vpack.c.bf16 %v3146_v49, %v3146_v49  ;;  %v3019_v61 = vmax.f32 %v2763_v52, 0.0  ;;  %v3147_v62 = vmax.f32 %v2891_v54, 0.0 }
 0x1f2   :  { %v5072_v63 = vpack.c.bf16 %v3016_v55, %v3016_v55  ;;  %v5200_v0 = vpack.c.bf16 %v3144_v56, %v3144_v56  ;;  %v3017_v1 = vmax.f32 %v2761_v57, 0.0  ;;  %v3145_v2 = vmax.f32 %v2889_v58, 0.0 }
 0x1f3   :  { %4299 = vst.msk [vmem:[%s7842_s4 + $0x1e8] sm:$0xf] %vm4176_vm3, %v5074_v59  ;;  %4427 = vst.msk [vmem:[%s7842_s4 + $0x3e8] sm:$0xf] %vm4176_vm3, %v5202_v60  ;;  %v5075_v5 = vpack.c.bf16 %v3019_v61, %v3019_v61  ;;  %v5203_v6 = vpack.c.bf16 %v3147_v62, %v3147_v62  ;;  %v2503_v7 = vmul.f32 %v7279_v38, %v5465_v3 }
 0x1f4   :  { %v2631_v8 = vmul.f32 %v7279_v38, %v5593_v4  ;;  %4297 = vst.msk [vmem:[%s7842_s4 + $0x1e0] sm:$0xf] %vm4176_vm3, %v5072_v63  ;;  %4425 = vst.msk [vmem:[%s7842_s4 + $0x3e0] sm:$0xf] %vm4176_vm3, %v5200_v0  ;;  %v5073_v11 = vpack.c.bf16 %v3017_v1, %v3017_v1  ;;  %v5201_v12 = vpack.c.bf16 %v3145_v2, %v3145_v2 }
 0x1f5   :  { %v2501_v13 = vmul.f32 %v7279_v38, %v1843_v9  ;;  %v2629_v14 = vmul.f32 %v7279_v38, %v2355_v10  ;;  %4300 = vst.msk [vmem:[%s7842_s4 + $0x1ec] sm:$0xf] %vm4176_vm3, %v5075_v5  ;;  %4428 = vst.msk [vmem:[%s7842_s4 + $0x3ec] sm:$0xf] %vm4176_vm3, %v5203_v6  ;;  %v2766_v17 = vadd.f32 %v7304_v50, %v2503_v7 }
 0x1f6   :  { %v2894_v18 = vadd.f32 %v7304_v50, %v2631_v8  ;;  %v2504_v19 = vmul.f32 %v7279_v38, %v5466_v15  ;;  %v2632_v20 = vmul.f32 %v7279_v38, %v5594_v16  ;;  %4298 = vst.msk [vmem:[%s7842_s4 + $0x1e4] sm:$0xf] %vm4176_vm3, %v5073_v11  ;;  %4426 = vst.msk [vmem:[%s7842_s4 + $0x3e4] sm:$0xf] %vm4176_vm3, %v5201_v12 }
 0x1f7   :  { %v2764_v23 = vadd.f32 %v7304_v50, %v2501_v13  ;;  %v2892_v24 = vadd.f32 %v7304_v50, %v2629_v14  ;;  %v2502_v25 = vmul.f32 %v7279_v38, %v1846_v21  ;;  %v2630_v26 = vmul.f32 %v7279_v38, %v2358_v22 }
 0x1f8   :  { %v3022_v27 = vmax.f32 %v2766_v17, 0.0  ;;  %v3150_v28 = vmax.f32 %v2894_v18, 0.0  ;;  %v2767_v29 = vadd.f32 %v7304_v50, %v2504_v19  ;;  %v2895_v51 = vadd.f32 %v7304_v50, %v2632_v20 }
 0x1f9   :  { %v3020_v30 = vmax.f32 %v2764_v23, 0.0  ;;  %v3148_v31 = vmax.f32 %v2892_v24, 0.0  ;;  %v2765_v53 = vadd.f32 %v7304_v50, %v2502_v25  ;;  %v2893_v32 = vadd.f32 %v7304_v50, %v2630_v26 }
 0x1fa   :  { %v5078_v34 = vpack.c.bf16 %v3022_v27, %v3022_v27  ;;  %v5206_v33 = vpack.c.bf16 %v3150_v28, %v3150_v28  ;;  %v3023_v35 = vmax.f32 %v2767_v29, 0.0  ;;  %v3151_v36 = vmax.f32 %v2895_v51, 0.0 }
 0x1fb   :  { %v5076_v44 = vpack.c.bf16 %v3020_v30, %v3020_v30  ;;  %v5204_v37 = vpack.c.bf16 %v3148_v31, %v3148_v31  ;;  %v3021_v39 = vmax.f32 %v2765_v53, 0.0  ;;  %v3149_v38 = vmax.f32 %v2893_v32, 0.0 }
 0x1fc   :  { %4303 = vst.msk [vmem:[%s7842_s4 + $0x1f8] sm:$0xf] %vm4176_vm3, %v5078_v34  ;;  %4431 = vst.msk [vmem:[%s7842_s4 + $0x3f8] sm:$0xf] %vm4176_vm3, %v5206_v33  ;;  %v5079_v40 = vpack.c.bf16 %v3023_v35, %v3023_v35  ;;  %v5207_v50 = vpack.c.bf16 %v3151_v36, %v3151_v36 }
 0x1fd   :  { %4301 = vst.msk [vmem:[%s7842_s4 + $0x1f0] sm:$0xf] %vm4176_vm3, %v5076_v44  ;;  %4429 = vst.msk [vmem:[%s7842_s4 + $0x3f0] sm:$0xf] %vm4176_vm3, %v5204_v37  ;;  %v5077_v41 = vpack.c.bf16 %v3021_v39, %v3021_v39  ;;  %v5205_v42 = vpack.c.bf16 %v3149_v38, %v3149_v38 }
 0x1fe   :  { %4304 = vst.msk [vmem:[%s7842_s4 + $0x1fc] sm:$0xf] %vm4176_vm3, %v5079_v40  ;;  %4432 = vst.msk [vmem:[%s7842_s4 + $0x3fc] sm:$0xf] %vm4176_vm3, %v5207_v50 }
 0x1ff   :  { %4302 = vst.msk [vmem:[%s7842_s4 + $0x1f4] sm:$0xf] %vm4176_vm3, %v5077_v41  ;;  %4430 = vst.msk [vmem:[%s7842_s4 + $0x3f4] sm:$0xf] %vm4176_vm3, %v5205_v42 }

</bundles_post_ra>
